<compile_context>
chip_gen: v6e
topology: v6e:2x2x1
jax: 0.10.0
libtpu: 0.0.40
codegen_flags: <defaults>
</compile_context>

<pallas_src>
import jax
import jax.numpy as jnp
from jax.experimental import pallas as pl
from jax.experimental.pallas import tpu as pltpu


def _round_up(x, m):
    return ((x + m - 1) // m) * m


def _siren_kernel(x_ref, w_ref, b_ref, o_ref):
    # Hot path: MXU matmul + bias add + sine, all in VMEM.
    # w0 is already folded into w_ref / b_ref on the host.
    acc = jnp.dot(x_ref[...], w_ref[...], preferred_element_type=jnp.float32)
    o_ref[...] = jnp.sin(acc + b_ref[...]).astype(o_ref.dtype)


def siren_fold_params(weight_t, bias, *, w0=30.0):
    """One-time parameter transform: fold w0 into weight and bias.

    weight_t: (dim_in, dim_out)  (transpose of PyTorch nn.Linear weight)
    bias:     (dim_out,) or (1, dim_out)
    """
    w_s = (weight_t * jnp.float32(w0)).astype(jnp.float32)
    b_s = (jnp.reshape(bias, (1, -1)) * jnp.float32(w0)).astype(jnp.float32)
    return w_s, b_s


def siren_layer_folded(x, w_s, b_s, *, tm=4096, min_grid_steps=4, out_dtype=None):
    """sin(x @ w_s + b_s) with w0 pre-folded into (w_s, b_s).

    Args:
      x:   (N, dim_in) float32 coordinates.
      w_s: (dim_in, dim_out) float32, = w0 * weight_t.
      b_s: (1, dim_out) float32, = w0 * bias.
      tm:  max row tile (multiple of 8); clamped so the grid keeps at least
           `min_grid_steps` steps (v7x dual-TC sharding) and never exceeds N.
    """
    n, dim_in = x.shape
    dim_out = w_s.shape[1]
    out_dtype = x.dtype if out_dtype is None else out_dtype

    # Row tile: multiple of 8, <= N (8-aligned), and small enough to keep
    # >= min_grid_steps grid steps so the "parallel" axis shards across TCs.
    tm = max(8, (int(tm) // 8) * 8)
    tm = min(tm, max(8, _round_up(pl.cdiv(n, min_grid_steps), 8)))
    tm = min(tm, _round_up(n, 8))
    grid = (pl.cdiv(n, tm),)  # ragged last block: OOB reads harmless, writes masked

    itemsize_in = jnp.dtype(x.dtype).itemsize
    itemsize_out = jnp.dtype(out_dtype).itemsize
    cost = pl.CostEstimate(
        flops=2 * n * dim_in * dim_out,
        transcendentals=n * dim_out,
        bytes_accessed=(
            itemsize_in * n * dim_in
            + 4 * (dim_in * dim_out + dim_out)
            + itemsize_out * n * dim_out
        ),
    )

    return pl.pallas_call(
        _siren_kernel,
        out_shape=jax.ShapeDtypeStruct((n, dim_out), out_dtype),
        grid_spec=pltpu.PrefetchScalarGridSpec(
            num_scalar_prefetch=0,
            grid=grid,
            in_specs=[
                pl.BlockSpec((tm, dim_in), lambda i: (i, 0)),       # x row tile
                pl.BlockSpec((dim_in, dim_out), lambda i: (0, 0)),  # full weight
                pl.BlockSpec((1, dim_out), lambda i: (0, 0)),       # bias
            ],
            out_specs=pl.BlockSpec((tm, dim_out), lambda i: (i, 0)),
        ),
        compiler_params=pltpu.CompilerParams(
            dimension_semantics=("parallel",),
        ),
        cost_estimate=cost,
    )(x, w_s, b_s)


def siren_layer(x, weight_t, bias, *, w0=30.0, tm=4096):
    """Convenience wrapper: fold + forward in one call (matches the module)."""
    w_s, b_s = siren_fold_params(weight_t, bias, w0=w0)
    return siren_layer_folded(x, w_s, b_s, tm=tm)


def siren_ref(x, weight_t, bias, w0):
    # Pure-JAX reference (matches the PyTorch SirenLayer forward).
    return jnp.sin(w0 * (x @ weight_t + bias.reshape(1, -1)))


if __name__ == "__main__":
    # Module hyperparameters (matching SirenLayer defaults).
    dim_in, dim_out = 32, 64
    w0, c = 30.0, 6.0
    is_first = False
    # Deliberately NOT a multiple of the row tile -> exercises the ragged last
    # grid block (masked output writes), which replaced the host-side row pad.
    n = 1000

    # PyTorch init: w_std = 1/dim_in if is_first else sqrt(c/dim_in)/w0;
    # weight, bias ~ Uniform(-w_std, w_std).
    w_std = (1.0 / dim_in) if is_first else ((c / dim_in) ** 0.5) / w0

    key = jax.random.PRNGKey(0)
    kx, kw, kb = jax.random.split(key, 3)

    x = jax.random.normal(kx, (n, dim_in), dtype=jnp.float32)
    # PyTorch nn.Linear weight is (dim_out, dim_in); kernel uses the transpose.
    weight = jax.random.uniform(
        kw, (dim_out, dim_in), minval=-w_std, maxval=w_std, dtype=jnp.float32
    )
    bias = jax.random.uniform(
        kb, (dim_out,), minval=-w_std, maxval=w_std, dtype=jnp.float32
    )
    weight_t = weight.T  # (dim_in, dim_out)

    # Fold w0 once (hoisted out of the per-call forward path), jit the forward.
    w_s, b_s = siren_fold_params(weight_t, bias, w0=w0)
    fwd = jax.jit(siren_layer_folded)
    out = jax.block_until_ready(fwd(x, w_s, b_s))

    ref = siren_ref(x, weight_t, bias, w0)
    assert out.shape == (n, dim_out)
    assert jnp.allclose(out, ref, atol=1e-5, rtol=1e-5), "mismatch vs reference"

    print("KERNEL_OK")
</pallas_src>

<mosaic_0001>
module attributes {stable_mosaic.version = 11 : i64} {
  func.func @_siren_kernel(%arg0: i32, %arg1: memref<256x32xf32, #tpu.memory_space<vmem>>, %arg2: memref<32x64xf32, #tpu.memory_space<vmem>>, %arg3: memref<1x64xf32, #tpu.memory_space<vmem>>, %arg4: memref<256x64xf32, #tpu.memory_space<vmem>>) attributes {dimension_semantics = [#tpu.dimension_semantics<parallel>], iteration_bounds = array<i64: 4>, scalar_prefetch = 0 : i64, scratch_operands = 0 : i64, tpu.core_type = #tpu.core_type<tc>, window_params = [{transform_indices = @transform_0, window_bounds = array<i64: 256, 32>}, {pipeline_mode = #tpu.pipeline_mode<synchronous>, transform_indices = @transform_1, window_bounds = array<i64: 32, 64>}, {pipeline_mode = #tpu.pipeline_mode<synchronous>, transform_indices = @transform_2, window_bounds = array<i64: 1, 64>}, {transform_indices = @transform_3, window_bounds = array<i64: 256, 64>}]} {
    %c0 = arith.constant 0 : index
    %c0_0 = arith.constant 0 : index
    %0 = vector.load %arg1[%c0, %c0_0] : memref<256x32xf32, #tpu.memory_space<vmem>>, vector<256x32xf32>
    %c0_1 = arith.constant 0 : index
    %c0_2 = arith.constant 0 : index
    %1 = vector.load %arg2[%c0_1, %c0_2] : memref<32x64xf32, #tpu.memory_space<vmem>>, vector<32x64xf32>
    %cst = arith.constant dense<0.000000e+00> : vector<256x64xf32>
    %2 = tpu.matmul %0, %1, %cst {dimension_numbers = #tpu.dot_dimension_numbers<[1], [0], [0], [1], [0, 0, 1, 1], [], []>} : vector<256x32xf32>, vector<32x64xf32>, vector<256x64xf32> -> vector<256x64xf32>
    %c0_3 = arith.constant 0 : index
    %c0_4 = arith.constant 0 : index
    %3 = vector.load %arg3[%c0_3, %c0_4] : memref<1x64xf32, #tpu.memory_space<vmem>>, vector<1x64xf32>
    %4 = vector.broadcast %3 : vector<1x64xf32> to vector<256x64xf32>
    %5 = arith.addf %2, %4 : vector<256x64xf32>
    %6 = math.sin %5 : vector<256x64xf32>
    %c0_5 = arith.constant 0 : index
    %c0_6 = arith.constant 0 : index
    %7 = vector.load %arg4[%c0_5, %c0_6] : memref<256x64xf32, #tpu.memory_space<vmem>>, vector<256x64xf32>
    tpu.vector_store %arg4[%c0_5, %c0_6], %6 {strides = array<i32>} : memref<256x64xf32, #tpu.memory_space<vmem>>, vector<256x64xf32>,
    return
  }
  func.func @transform_0(%arg0: i32) -> (i32, i32) {
    %c0_i32 = arith.constant 0 : i32
    %c0_i32_0 = arith.constant 0 : i32
    return %arg0, %c0_i32 : i32, i32
  }
  func.func @transform_1(%arg0: i32) -> (i32, i32) {
    %c0_i32 = arith.constant 0 : i32
    %c0_i32_0 = arith.constant 0 : i32
    %c0_i32_1 = arith.constant 0 : i32
    return %c0_i32, %c0_i32_0 : i32, i32
  }
  func.func @transform_2(%arg0: i32) -> (i32, i32) {
    %c0_i32 = arith.constant 0 : i32
    %c0_i32_0 = arith.constant 0 : i32
    %c0_i32_1 = arith.constant 0 : i32
    return %c0_i32, %c0_i32_0 : i32, i32
  }
  func.func @transform_3(%arg0: i32) -> (i32, i32) {
    %c0_i32 = arith.constant 0 : i32
    %c0_i32_0 = arith.constant 0 : i32
    return %arg0, %c0_i32 : i32, i32
  }
}

</mosaic_0001>

<bundles_post_ra>
// kernel: siren_layer_folded.1
= control target key start
LH: loop header
LB: loop body
LE: loop exit
PB: predicated region body
PF: predicated region fallthrough
CT: control target
= control target key end

     0   :  { %s5015_s12 = smov 0   ;;  %s5017_s13 = smov 0   ;;  %s7690_s0 = inlined_call_operand.vmem [shape: f32[1000,32], index: 0, kind: input, shape index: {}]   ;;  %s7691_s1 = inlined_call_operand.vmem [shape: f32[32,64], index: 1, kind: input, shape index: {}]   ;;  %s7692_s2 = inlined_call_operand.vmem [shape: f32[1,64], index: 2, kind: input, shape index: {}]   ;;  %s7693_s3 = inlined_call_operand.vmem [shape: f32[1000,64], index: 3, kind: output, shape index: {}]  }
   0x1   :  { %s5019_s14 = smov 0  }
   0x2 LB: > { %s5028_s15 = sadd.s32 4294967295, %s4955_s14   ;;  %s5030_s16 = sadd.s32 1, %s4955_s14   ;;  %s4955_s14 = sphi %s5019_s14, %s7762_s14   ;;  %s4951_s13 = sphi %s5017_s13, %s7761_s13   ;;  %s4947_s12 = sphi %s5015_s12, %s7760_s12  }
   0x3   : > { %s85_s17 = ssub.s32 %s4955_s14, %s5030_s16  ;;  %s88_s18 = sadd.s32 1, %s4951_s13 }
   0x4   : > { %p86_p0 = scmp.eq.s32.totalorder %s85_s17, 0  ;;  %p98_p1 = scmp.ne.s32.totalorder %s4951_s13, %s4947_s12 }
   0x5   : > { %p99_p2 = scmp.eq.s32.totalorder %s5028_s15, 3  ;;  %p4261_p3 = scmp.ge.s32.totalorder %s4955_s14, 1 }
   0x6   : > { %s5038_s19 = scalar_select %p86_p0, %s4951_s13, %s88_s18  }
   0x7   : > { %p5040_p4 = por %p99_p2, %p98_p1  ;;  %p146_p5 = scmp.lt.s32.totalorder %s4955_s14, 5 }
   0x9   : > { %p147_p6 = pnand %p4261_p3, %p146_p5 }
   0xa   : > { %s5051_s25 = sshll.u32 (!%p147_p6), %s5028_s15, 5  ;;  %s170_s10 = sand.u32 (!%p147_p6), 1, %s4947_s12  }
   0xb   : > { %150 = sbr.rel (%p147_p6) target bundleno = 1101 (0x44d), region = 32  ;;  %p178_p7 = scmp.lt.s32.totalorder (!%p147_p6), %s5051_s25, 124 }
   0xc   : > { %s4262_s11 = sshll.u32 (!%p147_p6), %s170_s10, 8 }
   0xd   : > { %s5437_s12 = scalar_lea.vmem (!%p147_p6), [#allocation2], %s4262_s11  }
  0x10   : > { %v227_v0 = vld [vmem:[%s7691_s1 + $0x18] sm:$0xff]  ;;  %v226_v1 = vld [vmem:[%s7691_s1 + $0x10] sm:$0xff]  ;;  %v225_v2 = vld [vmem:[%s7691_s1 + $0x8] sm:$0xff]  ;;  %s179_s28 = scalar_select %p178_p7, %s5051_s25, 124  ;;  %vm235_vm0 = vcmask 261120  }
  0x11   : > { %4482 = vmatprep.subr.mxu0 %v227_v0  ;;  %4538 = vmatprep.subr.mxu1 %v227_v0  ;;  %v224_v3 = vld [vmem:[%s7691_s1] sm:$0xff]  ;;  %s3926_s29 = ssub.s32 (%p5040_p4), 125, %s5051_s25  ;;  %s4443_s30 = sshll.u32 (%p5040_p4), %s5028_s15, 8 }
  0x12   : > { %4483 = vmatpush3.msra.mxu0 %v227_v0  ;;  %4542 = vmatpush3.msra.mxu1 %v227_v0  ;;  %s4264_s4 = sshll.u32 %s179_s28, 3  ;;  %v5133_v36 = vld [vmem:[%s7692_s2] ss:$0 sm:$0xff]  ;;  %p3927_p8 = scmp.lt.s32.totalorder (%p5040_p4), %s3926_s29, 32 }
  0x13   : > { %4484 = vmatprep.subr.mxu0 %v226_v1  ;;  %4539 = vmatprep.subr.mxu1 %v226_v1  ;;  %s5064_s7 = scalar_lea.vmem %s7690_s0, %s4264_s4  ;;  %s7558_s6 = scalar_lea.vmem (%p5040_p4), %s7693_s3, %s4443_s30  }
  0x14   : > { %4485 = vmatpush3.msra.mxu0 %v226_v1  ;;  %4543 = vmatpush3.msra.mxu1 %v226_v1  ;;  %v192_v4 = vld [vmem:[%s5064_s7] sm:$0xff]  ;;  %v193_v6 = vld [vmem:[%s5064_s7 + $0x8] sm:$0xff]  ;;  %v194_v8 = vld [vmem:[%s5064_s7 + $0x10] sm:$0xff] }
  0x15   : > { %4486 = vmatprep.subr.mxu0 %v225_v2  ;;  %4540 = vmatprep.subr.mxu1 %v225_v2  ;;  %v208_v5 = vld [vmem:[%s5064_s7 + $0x80] sm:$0xff]  ;;  %v209_v7 = vld [vmem:[%s5064_s7 + $0x88] sm:$0xff]  ;;  %v210_v9 = vld [vmem:[%s5064_s7 + $0x90] sm:$0xff] }
  0x16   : > { %4487 = vmatpush3.msra.mxu0 %v225_v2  ;;  %4544 = vmatpush3.msra.mxu1 %v225_v2  ;;  %v195_v10 = vld [vmem:[%s5064_s7 + $0x18] sm:$0xff]  ;;  %v196_v12 = vld [vmem:[%s5064_s7 + $0x20] sm:$0xff]  ;;  %v197_v14 = vld [vmem:[%s5064_s7 + $0x28] sm:$0xff] }
  0x17   : > { %4488 = vmatprep.subr.mxu0 %v224_v3  ;;  %4541 = vmatprep.subr.mxu1 %v224_v3  ;;  %v211_v11 = vld [vmem:[%s5064_s7 + $0x98] sm:$0xff]  ;;  %v212_v13 = vld [vmem:[%s5064_s7 + $0xa0] sm:$0xff]  ;;  %v213_v15 = vld [vmem:[%s5064_s7 + $0xa8] sm:$0xff] }
  0x18   : > { %4489 = vmatpush3.msra.mxu0 %v224_v3  ;;  %4545 = vmatpush3.msra.mxu1 %v224_v3  ;;  %v198_v16 = vld [vmem:[%s5064_s7 + $0x30] sm:$0xff]  ;;  %v199_v18 = vld [vmem:[%s5064_s7 + $0x38] sm:$0xff]  ;;  %v200_v20 = vld [vmem:[%s5064_s7 + $0x40] sm:$0xff] }
  0x19   : > { %4490 = vmatprep.mubr.msk.f32.mxu0 %vm235_vm0, %v192_v4  ;;  %4514 = vmatprep.mubr.msk.f32.mxu1 %vm235_vm0, %v208_v5  ;;  %v214_v17 = vld [vmem:[%s5064_s7 + $0xb0] sm:$0xff]  ;;  %v215_v19 = vld [vmem:[%s5064_s7 + $0xb8] sm:$0xff]  ;;  %v216_v21 = vld [vmem:[%s5064_s7 + $0xc0] sm:$0xff] }
  0x1a   : > { %4491 = vmatmul.mubr.msk.f32.vlgmr.msra.gmra.mxu0 %vm235_vm0, %v193_v6  ;;  %4515 = vmatmul.mubr.msk.f32.vlgmr.msra.gmra.mxu1 %vm235_vm0, %v209_v7  ;;  %v201_v22 = vld [vmem:[%s5064_s7 + $0x48] sm:$0xff]  ;;  %v202_v24 = vld [vmem:[%s5064_s7 + $0x50] sm:$0xff]  ;;  %v203_v26 = vld [vmem:[%s5064_s7 + $0x58] sm:$0xff] }
  0x1b   : > { %4493 = vmatprep.mubr.msk.f32.mxu0 %vm235_vm0, %v194_v8  ;;  %4517 = vmatprep.mubr.msk.f32.mxu1 %vm235_vm0, %v210_v9  ;;  %v217_v23 = vld [vmem:[%s5064_s7 + $0xc8] sm:$0xff]  ;;  %v218_v25 = vld [vmem:[%s5064_s7 + $0xd0] sm:$0xff]  ;;  %v219_v27 = vld [vmem:[%s5064_s7 + $0xd8] sm:$0xff]  ;;  %v4989_v8 = vmov 683565275  }
  0x1c   : > { %v204_v28 = vld [vmem:[%s5064_s7 + $0x60] sm:$0xff]  ;;  %v205_v30 = vld [vmem:[%s5064_s7 + $0x68] sm:$0xff]  ;;  %v206_v32 = vld [vmem:[%s5064_s7 + $0x70] sm:$0xff] }
  0x1d   : > { %v220_v29 = vld [vmem:[%s5064_s7 + $0xe0] sm:$0xff]  ;;  %v221_v31 = vld [vmem:[%s5064_s7 + $0xe8] sm:$0xff]  ;;  %v222_v33 = vld [vmem:[%s5064_s7 + $0xf0] sm:$0xff] }
  0x1e   : > { %4494 = vmatmul.mubr.msk.f32.gmra.mxu0 %vm235_vm0, %v195_v10  ;;  %4518 = vmatmul.mubr.msk.f32.gmra.mxu1 %vm235_vm0, %v211_v11  ;;  %v207_v34 = vld [vmem:[%s5064_s7 + $0x78] sm:$0xff] }
  0x1f   : > { %4496 = vmatprep.mubr.msk.f32.mxu0 %vm235_vm0, %v196_v12  ;;  %4520 = vmatprep.mubr.msk.f32.mxu1 %vm235_vm0, %v212_v13  ;;  %v223_v35 = vld [vmem:[%s5064_s7 + $0xf8] sm:$0xff]  ;;  %v4990_v12 = vmov 2475754826  }
  0x22   : > { %4497 = vmatmul.mubr.msk.f32.gmra.mxu0 %vm235_vm0, %v197_v14  ;;  %4521 = vmatmul.mubr.msk.f32.gmra.mxu1 %vm235_vm0, %v213_v15  ;;  %v4991_v14 = vmov 2131351028  }
  0x23   : > { %4499 = vmatprep.mubr.msk.f32.mxu0 %vm235_vm0, %v198_v16  ;;  %4523 = vmatprep.mubr.msk.f32.mxu1 %vm235_vm0, %v214_v17  ;;  %v4992_v16 = vmov 2102212464  }
  0x26   : > { %4500 = vmatmul.mubr.msk.f32.gmra.mxu0 %vm235_vm0, %v199_v18  ;;  %4524 = vmatmul.mubr.msk.f32.gmra.mxu1 %vm235_vm0, %v215_v19  ;;  %v4993_v18 = vmov 920167782  }
  0x27   : > { %4502 = vmatprep.mubr.msk.f32.mxu0 %vm235_vm0, %v200_v20  ;;  %4526 = vmatprep.mubr.msk.f32.mxu1 %vm235_vm0, %v216_v21 }
  0x2a   : > { %4503 = vmatmul.mubr.msk.f32.gmra.mxu0 %vm235_vm0, %v201_v22  ;;  %4527 = vmatmul.mubr.msk.f32.gmra.mxu1 %vm235_vm0, %v217_v23 }
  0x2b   : > { %4505 = vmatprep.mubr.msk.f32.mxu0 %vm235_vm0, %v202_v24  ;;  %4529 = vmatprep.mubr.msk.f32.mxu1 %vm235_vm0, %v218_v25  ;;  %v4994_v25 = vmov 1326507024  }
  0x2e   : > { %4506 = vmatmul.mubr.msk.f32.gmra.mxu0 %vm235_vm0, %v203_v26  ;;  %4530 = vmatmul.mubr.msk.f32.gmra.mxu1 %vm235_vm0, %v219_v27 }
  0x2f   : > { %4508 = vmatprep.mubr.msk.f32.mxu0 %vm235_vm0, %v204_v28  ;;  %4532 = vmatprep.mubr.msk.f32.mxu1 %vm235_vm0, %v220_v29 }
  0x32   : > { %4509 = vmatmul.mubr.msk.f32.gmra.mxu0 %vm235_vm0, %v205_v30  ;;  %4533 = vmatmul.mubr.msk.f32.gmra.mxu1 %vm235_vm0, %v221_v31 }
  0x33   : > { %4511 = vmatprep.mubr.msk.f32.mxu0 %vm235_vm0, %v206_v32  ;;  %4535 = vmatprep.mubr.msk.f32.mxu1 %vm235_vm0, %v222_v33 }
  0x36   : > { %4512 = vmatmul.mubr.msk.f32.gmra.mxu0 %vm235_vm0, %v207_v34  ;;  %4536 = vmatmul.mubr.msk.f32.gmra.mxu1 %vm235_vm0, %v223_v35 }
  0xda   : > { %v4492_v37 = vpop.f32.mrf.mxu0  ;;  %v4516_v38 = vpop.f32.mrf.mxu1 }
  0xdb   : > { %v5136_v39 = vadd.f32 %v4492_v37, %v5133_v36  ;;  %v5139_v40 = vadd.f32 %v4516_v38, %v5133_v36 }
  0xdc   : > { %v398_v41 = vpop.f32.mrf.mxu0  ;;  %v478_v60 = vpop.f32.mrf.mxu1 }
  0xdd   : > { %v661_v42 = vand.u32 2147483647, %v5136_v39  ;;  %v664_v43 = vand.u32 2139095040, %v5136_v39  ;;  %v2325_v44 = vand.u32 2147483647, %v5139_v40  ;;  %v2328_v45 = vand.u32 2139095040, %v5139_v40 }
  0xde   : > { %v5148_v48 = vadd.f32 %v5133_v36, %v398_v41  ;;  %v5155_v2 = vadd.f32 %v5133_v36, %v478_v60  ;;  %vm663_vm14 = vcmp.lt.s32.totalorder %v5136_v39, 0 }
  0xdf   : > { %v665_v46 = vshrl.u32 %v664_v43, 23  ;;  %v668_v47 = vand.u32 8388607, %v661_v42  ;;  %v2329_v49 = vshrl.u32 %v2328_v45, 23  ;;  %v2332_v50 = vand.u32 8388607, %v2325_v44 }
  0xe0   : > { %v560_v53 = vand.u32 2139095040, %v5148_v48  ;;  %v557_v58 = vand.u32 2147483647, %v5148_v48  ;;  %vm5260_vm15 = vcmp.le.f32.partialorder %v661_v42, 0.7853982 }
  0xe1   : > { %v4302_v51 = vadd.s32 4294967169, %v665_v46  ;;  %v4366_v52 = vadd.s32 4294967169, %v2329_v49  ;;  %v669_v54 = vor.u32 8388608, %v668_v47  ;;  %v2333_v56 = vor.u32 8388608, %v2332_v50 }
  0xe2   : > { %v561_v59 = vshrl.u32 %v560_v53, 23  ;;  %v5165_v6 = vand.u32 8388607, %v557_v58 }
  0xe3   : > { %v671_v55 = vadd.s32 1, %v4302_v51  ;;  %v2335_v57 = vadd.s32 1, %v4366_v52  ;;  %v5157_v3 = vshll.u32 %v669_v54, 8  ;;  %v5161_v5 = vshll.u32 %v2333_v56, 8 }
  0xe4   : > { %v4298_v62 = vadd.s32 4294967169, %v561_v59 }
  0xe5   : > { %vm672_vm1 = vcmp.gt.s32.totalorder %v671_v55, 0  ;;  %vm2336_vm2 = vcmp.gt.s32.totalorder %v2335_v57, 0 }
  0xe6   : > { %v673_v61 = vsel %vm672_vm1, %v671_v55, 0  ;;  %v2337_v1 = vsel %vm2336_vm2, %v2335_v57, 0  ;;  %v5168_v11 = vadd.s32 1, %v4298_v62 }
  0xe7   : > { %v674_v63 = vshrl.u32 %v673_v61, 5  ;;  %v675_v0 = vand.u32 31, %v673_v61  ;;  %v5159_v4 = vshrl.u32 %v2337_v1, 5  ;;  %v2339_v10 = vand.u32 31, %v2337_v1 }
  0xe8   : > { %vm568_vm12 = vcmp.gt.s32.totalorder %v5168_v11, 0 }
  0xe9   : > { %v676_v7 = vsub.s32 32, %v675_v0  ;;  %v678_v9 = vshll.u32 %v4989_v8, %v675_v0  ;;  %v681_v13 = vshll.u32 %v4990_v12, %v675_v0  ;;  %v684_v15 = vshll.u32 %v4991_v14, %v675_v0 }
  0xea   : > { %v687_v17 = vshll.u32 %v4992_v16, %v675_v0  ;;  %v690_v19 = vshll.u32 %v4993_v18, %v675_v0  ;;  %vm693_vm3 = vcmp.lt.s32.totalorder %v674_v63, 1  ;;  %vm694_vm4 = vcmp.lt.s32.totalorder %v674_v63, 2 }
  0xeb   : > { %v679_v20 = vshrl.u32 %v4990_v12, %v676_v7  ;;  %v682_v21 = vshrl.u32 %v4991_v14, %v676_v7  ;;  %v685_v22 = vshrl.u32 %v4992_v16, %v676_v7  ;;  %v677_v23 = vshrl.u32 %v4989_v8, %v676_v7 }
  0xec   : > { %v688_v24 = vshrl.u32 %v4993_v18, %v676_v7  ;;  %v691_v26 = vshrl.u32 %v4994_v25, %v676_v7  ;;  %v2340_v30 = vsub.s32 32, %v2339_v10  ;;  %vm695_vm5 = vcmp.lt.s32.totalorder %v674_v63, 3 }
  0xed   : > { %v680_v27 = vor.u32 %v679_v20, %v678_v9  ;;  %v683_v28 = vor.u32 %v682_v21, %v681_v13  ;;  %v686_v29 = vor.u32 %v685_v22, %v684_v15  ;;  %vm696_vm6 = vcmp.lt.s32.totalorder %v674_v63, 4 }
  0xee   : > { %v689_v31 = vor.u32 %v688_v24, %v687_v17  ;;  %v692_v32 = vor.u32 %v691_v26, %v690_v19  ;;  %v2342_v45 = vshll.u32 %v4989_v8, %v2339_v10  ;;  %v2343_v49 = vshrl.u32 %v4990_v12, %v2340_v30 }
  0xef   : > { %v697_v33 = vsel %vm693_vm3, %v677_v23, %v680_v27  ;;  %v698_v34 = vsel %vm696_vm6, %v686_v29, 2102212464  ;;  %v701_v35 = vsel %vm693_vm3, %v680_v27, %v683_v28  ;;  %v705_v37 = vsel %vm693_vm3, %v683_v28, %v686_v29 }
  0xf0   : > { %v699_v38 = vsel %vm695_vm5, %v683_v28, %v698_v34  ;;  %v702_v41 = vsel %vm696_vm6, %v689_v31, 920167782  ;;  %v706_v43 = vsel %vm696_vm6, %v692_v32, 1326507024  ;;  %v2345_v50 = vshll.u32 %v4990_v12, %v2339_v10 }
  0xf1   : > { %v703_v46 = vsel %vm695_vm5, %v686_v29, %v702_v41  ;;  %v707_v47 = vsel %vm695_vm5, %v689_v31, %v706_v43  ;;  %v700_v51 = vsel %vm694_vm4, %v697_v33, %v699_v38  ;;  %v2346_v54 = vshrl.u32 %v4991_v14, %v2340_v30 }
  0xf2   : > { %v704_v52 = vsel %vm694_vm4, %v701_v35, %v703_v46  ;;  %v708_v53 = vsel %vm694_vm4, %v705_v37, %v707_v47  ;;  %v2344_v60 = vor.u32 %v2343_v49, %v2342_v45  ;;  %v2348_v62 = vshll.u32 %v4991_v14, %v2339_v10 }
  0xf3   : > { %v5191_v55 = vmul.u32.u64.low %v5157_v3, %v708_v53  ;;  %v5192_v56 = vmul.u32.u64.high %v5157_v3, %v708_v53, %v5191_v55  ;;  %v5195_v57 = vmul.u32.u64.low %v5157_v3, %v704_v52  ;;  %v5196_v59 = vmul.u32.u64.high %v5157_v3, %v704_v52, %v5195_v57 }
  0xf4   : > { %v2347_v61 = vor.u32 %v2346_v54, %v2345_v50  ;;  %v2349_v0 = vshrl.u32 %v4992_v16, %v2340_v30  ;;  %v2341_v1 = vshrl.u32 %v4989_v8, %v2340_v30  ;;  %v2351_v63 = vshll.u32 %v4992_v16, %v2339_v10 }
  0xf5   : > { %v2352_v7 = vshrl.u32 %v4993_v18, %v2340_v30  ;;  %v2355_v9 = vshrl.u32 %v4994_v25, %v2340_v30  ;;  %v716_v13 = vmul.u32 %v5157_v3, %v700_v51  ;;  %v2354_v17 = vshll.u32 %v4993_v18, %v2339_v10 }
  0xf6   : > { %v2350_v15 = vor.u32 %v2349_v0, %v2348_v62  ;;  %vm2357_vm7 = vcmp.lt.s32.totalorder %v5159_v4, 1  ;;  %vm718_vm8 = vc.u32 %v5192_v56, %v5195_v57  ;;  %v719_v19 = vadd.s32 1, %v5196_v59 }
  0xf7   : > { %v2353_v20 = vor.u32 %v2352_v7, %v2351_v63  ;;  %vm2358_vm9 = vcmp.lt.s32.totalorder %v5159_v4, 2  ;;  %v2356_v21 = vor.u32 %v2355_v9, %v2354_v17  ;;  %vm2359_vm10 = vcmp.lt.s32.totalorder %v5159_v4, 3 }
  0xf8   : > { %vm2360_vm11 = vcmp.lt.s32.totalorder %v5159_v4, 4  ;;  %v2365_v22 = vsel %vm2357_vm7, %v2344_v60, %v2347_v61  ;;  %v720_v3 = vsel %vm718_vm8, %v719_v19, %v5196_v59  ;;  %v2369_v10 = vsel %vm2357_vm7, %v2347_v61, %v2350_v15 }
  0xf9   : > { %v2362_v23 = vsel %vm2360_vm11, %v2350_v15, 2102212464  ;;  %v2366_v24 = vsel %vm2360_vm11, %v2353_v20, 920167782  ;;  %v721_v26 = vadd.s32 %v720_v3, %v716_v13  ;;  %v2361_v27 = vsel %vm2357_vm7, %v2341_v1, %v2344_v60 }
  0xfa   : > { %v2367_v28 = vsel %vm2359_vm10, %v2350_v15, %v2366_v24  ;;  %v2370_v29 = vsel %vm2360_vm11, %v2356_v21, 1326507024  ;;  %v2363_v30 = vsel %vm2359_vm10, %v2347_v61, %v2362_v23  ;;  %v569_v43 = vsel %vm568_vm12, %v5168_v11, 0 }
  0xfb   : > { %v2368_v31 = vsel %vm2358_vm9, %v2365_v22, %v2367_v28  ;;  %v2371_v32 = vsel %vm2359_vm10, %v2353_v20, %v2370_v29  ;;  %v722_v33 = vadd.s32 536870912, %v721_v26  ;;  %v2364_v46 = vsel %vm2358_vm9, %v2361_v27, %v2363_v30 }
  0xfc   : > { %v2372_v34 = vsel %vm2358_vm9, %v2369_v10, %v2371_v32  ;;  %v5219_v35 = vmul.u32.u64.low %v5161_v5, %v2368_v31  ;;  %v5220_v37 = vmul.u32.u64.high %v5161_v5, %v2368_v31, %v5219_v35  ;;  %v571_v47 = vand.u32 31, %v569_v43 }
  0xfd   : > { %v5224_v38 = vmul.u32.u64.low %v5161_v5, %v2372_v34  ;;  %v5225_v41 = vmul.u32.u64.high %v5161_v5, %v2372_v34, %v5224_v38  ;;  %v723_v45 = vshrl.u32 %v722_v33, 30  ;;  %v2224_v49 = vand.u32 2139095040, %v5155_v2 }
  0xfe   : > { %v2383_v51 = vadd.s32 1, %v5220_v37  ;;  %v565_v52 = vor.u32 8388608, %v5165_v6  ;;  %v2380_v53 = vmul.u32 %v5161_v5, %v2364_v46  ;;  %v572_v54 = vsub.s32 32, %v571_v47 }
  0xff   : > { %v724_v50 = vshll.u32 %v723_v45, 30  ;;  %vm2382_vm13 = vc.u32 %v5225_v41, %v5219_v35  ;;  %v2225_v4 = vshrl.u32 %v2224_v49, 23  ;;  %v717_v60 = vadd.s32 %v5195_v57, %v5192_v56 }
 0x100   : > { %v2384_v11 = vsel %vm2382_vm13, %v2383_v51, %v5220_v37  ;;  %v5242_v62 = vshll.u32 %v565_v52, 8  ;;  %v2221_v5 = vand.u32 2147483647, %v5155_v2  ;;  %v5245_v0 = vshrl.u32 %v569_v43, 5 }
 0x101   : > { %v5236_v55 = vsub.s32 %v721_v26, %v724_v50  ;;  %v2385_v59 = vadd.s32 %v2384_v11, %v2380_v53  ;;  %v575_v1 = vshrl.u32 %v4990_v12, %v572_v54  ;;  %v578_v63 = vshrl.u32 %v4991_v14, %v572_v54 }
 0x102   : > { %v581_v9 = vshrl.u32 %v4992_v16, %v572_v54  ;;  %v584_v13 = vshrl.u32 %v4993_v18, %v572_v54  ;;  %v5252_v56 = vadd.s32 4294967169, %v2225_v4  ;;  %v747_v57 = vsub.s32 4, %v723_v45 }
 0x103   : > { %v727_v61 = vsub.s32 0, %v5236_v55  ;;  %v2386_v6 = vadd.s32 536870912, %v2385_v59  ;;  %v574_v17 = vshll.u32 %v4989_v8, %v571_v47  ;;  %v577_v19 = vshll.u32 %v4990_v12, %v571_v47 }
 0x104   : > { %v580_v22 = vshll.u32 %v4991_v14, %v571_v47  ;;  %v583_v3 = vshll.u32 %v4992_v16, %v571_v47  ;;  %v587_v23 = vshrl.u32 %v4994_v25, %v572_v54  ;;  %v5270_v27 = vand.u32 8388607, %v2221_v5 }
 0x105   : > { %v4303_v7 = vmin.u32 %v727_v61, %v5236_v55  ;;  %v5254_v15 = vshrl.u32 %v2386_v6, 30  ;;  %v576_v10 = vor.u32 %v575_v1, %v574_v17  ;;  %v579_v26 = vor.u32 %v578_v63, %v577_v19 }
 0x106   : > { %v582_v42 = vor.u32 %v581_v9, %v580_v22  ;;  %v585_v29 = vor.u32 %v584_v13, %v583_v3  ;;  %v586_v30 = vshll.u32 %v4993_v18, %v571_v47  ;;  %v748_v31 = vsel %vm663_vm14, %v747_v57, %v723_v45 }
 0x107   : > { %v729_v21 = vclz %v4303_v7  ;;  %v2388_v24 = vshll.u32 %v5254_v15, 30  ;;  %v573_v33 = vshrl.u32 %v4989_v8, %v572_v54  ;;  %vm589_vm0 = vcmp.lt.s32.totalorder %v5245_v0, 1 }
 0x108   : > { %v588_v34 = vor.u32 %v587_v23, %v586_v30  ;;  %vm590_vm2 = vcmp.lt.s32.totalorder %v5245_v0, 2  ;;  %vm591_vm3 = vcmp.lt.s32.totalorder %v5245_v0, 3  ;;  %vm2327_vm4 = vcmp.lt.s32.totalorder %v5139_v40, 0 }
 0x109   : > { %v4304_v28 = vadd.s32 4294967294, %v729_v21  ;;  %v5275_v32 = vsub.s32 %v2385_v59, %v2388_v24  ;;  %vm592_vm5 = vcmp.lt.s32.totalorder %v5245_v0, 4  ;;  %v597_v43 = vsel %vm589_vm0, %v576_v10, %v579_v26 }
 0x10a   : > { %v594_v47 = vsel %vm592_vm5, %v582_v42, 2102212464  ;;  %v598_v49 = vsel %vm592_vm5, %v585_v29, 920167782  ;;  %v601_v53 = vsel %vm589_vm0, %v579_v26, %v582_v42  ;;  %v602_v59 = vsel %vm592_vm5, %v588_v34, 1326507024 }
 0x10b   : > { %vm4305_vm1 = vcmp.lt.s32.totalorder %v4304_v28, 0  ;;  %v2391_v38 = vsub.s32 0, %v5275_v32  ;;  %v599_v52 = vsel %vm591_vm3, %v582_v42, %v598_v49  ;;  %v750_v61 = vsel %vm5260_vm15, 0, %v748_v31 }
 0x10c   : > { %v732_v37 = vsel %vm4305_vm1, 0, %v4304_v28  ;;  %v600_v4 = vsel %vm590_vm2, %v597_v43, %v599_v52  ;;  %vm5298_vm6 = vcmp.le.f32.partialorder %v2325_v44, 0.7853982  ;;  %v593_v1 = vsel %vm589_vm0, %v573_v33, %v576_v10 }
 0x10d   : > { %v733_v45 = vsub.s32 32, %v732_v37  ;;  %v737_v46 = vsub.s32 4294967266, %v732_v37  ;;  %v734_v50 = vshll.u32 %v5236_v55, %v732_v37  ;;  %v4367_v51 = vmin.u32 %v2391_v38, %v5275_v32 }
 0x10e   : > { %v2411_v9 = vsub.s32 4, %v5254_v15  ;;  %v603_v13 = vsel %vm591_vm3, %v585_v29, %v602_v59  ;;  %v5312_v17 = vmul.u32.u64.low %v5242_v62, %v600_v4  ;;  %v5313_v19 = vmul.u32.u64.high %v5242_v62, %v600_v4, %v5312_v17 }
 0x10f   : > { %v735_v54 = vshrl.u32 %v717_v60, %v733_v45  ;;  %v738_v11 = vadd.s32 127, %v737_v46  ;;  %v2393_v6 = vclz %v4367_v51  ;;  %v595_v60 = vsel %vm591_vm3, %v579_v26, %v594_v47  ;;  %v4495_v45 = vpop.f32.mrf.mxu0 }
 0x110   : > { %v604_v44 = vsel %vm590_vm2, %v601_v53, %v603_v13  ;;  %v596_v22 = vsel %vm590_vm2, %v593_v1, %v595_v60  ;;  %v754_v24 = vadd.s32 3, %v750_v61  ;;  %v2381_v10 = vadd.s32 %v5219_v35, %v5225_v41 }
 0x111   : > { %v736_v63 = vor.u32 %v735_v54, %v734_v50  ;;  %v739_v7 = vshll.u32 %v738_v11, 23  ;;  %v4368_v57 = vadd.s32 4294967294, %v2393_v6  ;;  %v2231_v26 = vadd.s32 1, %v5252_v56 }
 0x112   : > { %v5319_v3 = vmul.u32.u64.low %v5242_v62, %v604_v44  ;;  %v5320_v23 = vmul.u32.u64.high %v5242_v62, %v604_v44, %v5319_v3  ;;  %v2412_v30 = vsel %vm2327_vm4, %v2411_v9, %v5254_v15  ;;  %v612_v33 = vmul.u32 %v5242_v62, %v596_v22 }
 0x113   : > { %v740_v21 = vor.u32 4788187, %v739_v7  ;;  %vm4369_vm7 = vcmp.lt.s32.totalorder %v4368_v57, 0  ;;  %v743_v42 = vcvt.s32.f32 %v736_v63  ;;  %v615_v34 = vadd.s32 1, %v5313_v19 }
 0x114   : > { %v2396_v29 = vsel %vm4369_vm7, 0, %v4368_v57  ;;  %vm614_vm8 = vc.u32 %v5320_v23, %v5312_v17  ;;  %vm2232_vm9 = vcmp.gt.s32.totalorder %v2231_v26, 0  ;;  %v2414_v46 = vsel %vm5298_vm6, 0, %v2412_v30 }
 0x115   : > { %v741_v28 = vand.u32 2147483647, %v740_v21  ;;  %v2397_v0 = vsub.s32 32, %v2396_v29  ;;  %v2401_v31 = vsub.s32 4294967266, %v2396_v29  ;;  %v2398_v38 = vshll.u32 %v5275_v32, %v2396_v29 }
 0x116   : > { %v616_v56 = vsel %vm614_vm8, %v615_v34, %v5313_v19  ;;  %v2233_v43 = vsel %vm2232_vm9, %v2231_v26, 0  ;;  %v5339_v53 = vadd.f32 %v4495_v45, %v5133_v36  ;;  %v5344_v11 = vand.u32 3, %v754_v24 }
 0x117   : > { %v744_v37 = vmul.f32 %v743_v42, %v741_v28  ;;  %v2399_v35 = vshrl.u32 %v2381_v10, %v2397_v0  ;;  %v2402_v41 = vadd.s32 127, %v2401_v31  ;;  %v617_v62 = vadd.s32 %v616_v56, %v612_v33 }
 0x118   : > { %v2235_v47 = vand.u32 31, %v2233_v43  ;;  %v5346_v59 = vadd.s32 3, %v2414_v46  ;;  %v2229_v6 = vor.u32 8388608, %v5270_v27  ;;  %vm559_vm10 = vcmp.lt.s32.totalorder %v5148_v48, 0 }
 0x119   : > { %v745_v15 = vxor.u32 2147483648, %v744_v37  ;;  %v2400_v49 = vor.u32 %v2399_v35, %v2398_v38  ;;  %v2403_v50 = vshll.u32 %v2402_v41, 23  ;;  %v618_v51 = vadd.s32 536870912, %v617_v62 }
 0x11a   : > { %v2236_v52 = vsub.s32 32, %v2235_v47  ;;  %v5352_v9 = vshrl.u32 %v2233_v43, 5  ;;  %v2238_v13 = vshll.u32 %v4989_v8, %v2235_v47  ;;  %v2241_v19 = vshll.u32 %v4990_v12, %v2235_v47 }
 0x11b   : > { %v746_v32 = vsel %vm663_vm14, %v745_v15, %v744_v37  ;;  %v2404_v4 = vor.u32 4788187, %v2403_v50  ;;  %v619_v61 = vshrl.u32 %v618_v51, 30  ;;  %v2407_v63 = vcvt.s32.f32 %v2400_v49 }
 0x11c   : > { %v749_v54 = vsel %vm5260_vm15, %v5136_v39, %v746_v32  ;;  %v2239_v1 = vshrl.u32 %v4990_v12, %v2236_v52  ;;  %v2242_v7 = vshrl.u32 %v4991_v14, %v2236_v52  ;;  %v2245_v57 = vshrl.u32 %v4992_v16, %v2236_v52 }
 0x11d   : > { %4768 = vcosq.f32 %v749_v54  ;;  %v2405_v60 = vand.u32 2147483647, %v2404_v4  ;;  %v620_v20 = vshll.u32 %v619_v61, 30  ;;  %v2247_v27 = vshll.u32 %v4992_v16, %v2235_v47 }
 0x11e   : > { %4770 = vsinq.f32 %v749_v54  ;;  %v2248_v21 = vshrl.u32 %v4993_v18, %v2236_v52  ;;  %v2240_v3 = vor.u32 %v2239_v1, %v2238_v13  ;;  %v2244_v24 = vshll.u32 %v4991_v14, %v2235_v47 }
 0x11f   : > { %v2408_v44 = vmul.f32 %v2407_v63, %v2405_v60  ;;  %v5359_v22 = vsub.s32 %v617_v62, %v620_v20  ;;  %v872_v10 = vand.u32 2139095040, %v5339_v53  ;;  %v2243_v28 = vor.u32 %v2242_v7, %v2241_v19 }
 0x120   : > { %v2249_v42 = vor.u32 %v2248_v21, %v2247_v27  ;;  %v2251_v29 = vshrl.u32 %v4994_v25, %v2236_v52  ;;  %v613_v30 = vadd.s32 %v5312_v17, %v5320_v23  ;;  %v2246_v31 = vor.u32 %v2245_v57, %v2244_v24 }
 0x121   : > { %v2409_v26 = vxor.u32 2147483648, %v2408_v44  ;;  %v623_v0 = vsub.s32 0, %v5359_v22  ;;  %v2250_v33 = vshll.u32 %v4993_v18, %v2235_v47  ;;  %vm760_vm11 = vcmp.eq.s32.totalorder %v5344_v11, 2 }
 0x122   : > { %v643_v37 = vsub.s32 4, %v619_v61  ;;  %vm2253_vm12 = vcmp.lt.s32.totalorder %v5352_v9, 1  ;;  %v5372_v38 = vshll.u32 %v2229_v6, 8  ;;  %vm757_vm13 = vcmp.eq.s32.totalorder %v5344_v11, 0 }
 0x123   : > { %v2410_v34 = vsel %vm2327_vm4, %v2409_v26, %v2408_v44  ;;  %v4299_v23 = vmin.u32 %v623_v0, %v5359_v22  ;;  %v2252_v35 = vor.u32 %v2251_v29, %v2250_v33  ;;  %vm2256_vm14 = vcmp.lt.s32.totalorder %v5352_v9, 4 }
 0x124   : > { %v2413_v17 = vsel %vm5298_vm6, %v5139_v40, %v2410_v34  ;;  %vm756_vm15 = vcmp.lt.s32.totalorder %v5344_v11, 2  ;;  %vm3885_vm0 = vcmask 523264   ;;  %v2237_v41 = vshrl.u32 %v4989_v8, %v2236_v52 }
 0x125   : > { %4772 = vcosq.f32 %v2413_v17  ;;  %v2261_v56 = vsel %vm2253_vm12, %v2240_v3, %v2243_v28  ;;  %v2262_v43 = vsel %vm2256_vm14, %v2249_v42, 920167782  ;;  %vm753_vm1 = vweird.f32 %v5136_v39 }
 0x126   : > { %4774 = vsinq.f32 %v2413_v17  ;;  %vm5389_vm2 = vcmp.le.f32.partialorder %v557_v58, 0.7853982  ;;  %v625_v45 = vclz %v4299_v23  ;;  %vm2255_vm3 = vcmp.lt.s32.totalorder %v5352_v9, 3 }
 0x127   : > { %v2258_v15 = vsel %vm2256_vm14, %v2246_v31, 2102212464  ;;  %v644_v46 = vsel %vm559_vm10, %v643_v37, %v619_v61  ;;  %vm2254_vm4 = vcmp.lt.s32.totalorder %v5352_v9, 2  ;;  %v2263_v62 = vsel %vm2255_vm3, %v2246_v31, %v2262_v43 }
 0x128   : > { %v2265_v47 = vsel %vm2253_vm12, %v2243_v28, %v2246_v31  ;;  %v4300_v58 = vadd.s32 4294967294, %v625_v45  ;;  %v2257_v49 = vsel %vm2253_vm12, %v2237_v41, %v2240_v3  ;;  %v2264_v50 = vsel %vm2254_vm4, %v2261_v56, %v2263_v62 }
 0x129   : > { %v2266_v32 = vsel %vm2256_vm14, %v2252_v35, 1326507024  ;;  %v2259_v52 = vsel %vm2255_vm3, %v2243_v28, %v2258_v15  ;;  %v5409_v4 = vmul.u32.u64.low %v5372_v38, %v2264_v50  ;;  %v5410_v61 = vmul.u32.u64.high %v5372_v38, %v2264_v50, %v5409_v4 }
 0x12a   : > { %v4769_v51 = vpop.eup %4768  ;;  %v2267_v54 = vsel %vm2255_vm3, %v2249_v42, %v2266_v32  ;;  %vm4301_vm5 = vcmp.lt.s32.totalorder %v4300_v58, 0  ;;  %v873_v63 = vshrl.u32 %v872_v10, 23  ;;  %v2260_v21 = vsel %vm2254_vm4, %v2257_v49, %v2259_v52 }
 0x12b   : > { %v4771_v6 = vpop.eup %4770  ;;  %v761_v1 = vxor.u32 2147483648, %v4769_v51  ;;  %v2268_v60 = vsel %vm2254_vm4, %v2265_v47, %v2267_v54  ;;  %v628_v20 = vsel %vm4301_vm5, 0, %v4300_v58  ;;  %v2419_v24 = vand.u32 3, %v5346_v59  ;;  %v4519_v59 = vpop.f32.mrf.mxu1 }
 0x12c   : > { %v758_v7 = vxor.u32 2147483648, %v4771_v6  ;;  %v5416_v13 = vmul.u32.u64.low %v5372_v38, %v2268_v60  ;;  %v5417_v57 = vmul.u32.u64.high %v5372_v38, %v2268_v60, %v5416_v13  ;;  %v629_v19 = vsub.s32 32, %v628_v20 }
 0x12d   : > { %v762_v44 = vsel %vm760_vm11, %v761_v1, %v4771_v6  ;;  %v633_v27 = vsub.s32 4294967266, %v628_v20  ;;  %v2279_v10 = vadd.s32 1, %v5410_v61  ;;  %v4310_v26 = vadd.s32 4294967169, %v873_v63 }
 0x12e   : > { %v759_v3 = vsel %vm757_vm13, %v4769_v51, %v758_v7  ;;  %v630_v42 = vshll.u32 %v5359_v22, %v628_v20  ;;  %v631_v29 = vshrl.u32 %v613_v30, %v629_v19  ;;  %v646_v9 = vsel %vm5389_vm2, 0, %v644_v46 }
 0x12f   : > { %v763_v28 = vsel %vm756_vm15, %v759_v3, %v762_v44  ;;  %v634_v0 = vadd.s32 127, %v633_v27  ;;  %v2276_v33 = vmul.u32 %v5372_v38, %v2260_v21  ;;  %vm2278_vm6 = vc.u32 %v5417_v57, %v5409_v4 }
 0x130   : > { %v764_v31 = vsel %vm753_vm1, nan, %v763_v28  ;;  %v632_v11 = vor.u32 %v631_v29, %v630_v42  ;;  %v2280_v30 = vsel %vm2278_vm6, %v2279_v10, %v5410_v61  ;;  %v879_v39 = vadd.s32 1, %v4310_v26 }
 0x131   : > { %3887 = vst.msk [vmem:[%s5437_s12 + $0x8] sm:$0xff] %vm3885_vm0, %v764_v31  ;;  %v635_v22 = vshll.u32 %v634_v0, 23  ;;  %v2281_v34 = vadd.s32 %v2280_v30, %v2276_v33  ;;  %v869_v37 = vand.u32 2147483647, %v5339_v53  ;;  %vm2424_vm7 = vcmp.eq.s32.totalorder %v2419_v24, 2 }
 0x132   : > { %v4773_v17 = vpop.eup %4772  ;;  %vm880_vm8 = vcmp.gt.s32.totalorder %v879_v39, 0  ;;  %v5444_v23 = vadd.f32 %v4519_v59, %v5133_v36  ;;  %v650_v56 = vadd.s32 3, %v646_v9  ;;  %v639_v62 = vcvt.s32.f32 %v632_v11 }
 0x133   : > { %v636_v38 = vor.u32 4788187, %v635_v22  ;;  %v4775_v35 = vpop.eup %4774  ;;  %v2425_v41 = vxor.u32 2147483648, %v4773_v17  ;;  %v2282_v43 = vadd.s32 536870912, %v2281_v34  ;;  %v881_v45 = vsel %vm880_vm8, %v879_v39, 0 }
 0x134   : > { %v2422_v15 = vxor.u32 2147483648, %v4775_v35  ;;  %v883_v47 = vand.u32 31, %v881_v45  ;;  %vm2421_vm9 = vcmp.eq.s32.totalorder %v2419_v24, 0  ;;  %v876_v50 = vand.u32 8388607, %v869_v37 }
 0x135   : > { %v637_v46 = vand.u32 2147483647, %v636_v38  ;;  %v2426_v58 = vsel %vm2424_vm7, %v2425_v41, %v4775_v35  ;;  %v5446_v49 = vshrl.u32 %v2282_v43, 30  ;;  %vm2420_vm11 = vcmp.lt.s32.totalorder %v2419_v24, 2 }
 0x136   : > { %v2423_v32 = vsel %vm2421_vm9, %v4773_v17, %v2422_v15  ;;  %v884_v52 = vsub.s32 32, %v883_v47  ;;  %vm2417_vm12 = vweird.f32 %v5139_v40  ;;  %v5452_v60 = vand.u32 3, %v650_v56 }
 0x137   : > { %v640_v51 = vmul.f32 %v639_v62, %v637_v46  ;;  %v2427_v54 = vsel %vm2420_vm11, %v2423_v32, %v2426_v58  ;;  %v2284_v61 = vshll.u32 %v5446_v49, 30  ;;  %v877_v20 = vor.u32 8388608, %v876_v50 }
 0x138   : > { %v2428_v6 = vsel %vm2417_vm12, nan, %v2427_v54  ;;  %v887_v63 = vshrl.u32 %v4990_v12, %v884_v52  ;;  %v890_v13 = vshrl.u32 %v4991_v14, %v884_v52  ;;  %v2536_v44 = vand.u32 2139095040, %v5444_v23 }
 0x139   : > { %v641_v1 = vxor.u32 2147483648, %v640_v51  ;;  %3903 = vst.msk [vmem:[%s5437_s12 + $0x88] sm:$0xff] %vm3885_vm0, %v2428_v6  ;;  %v5457_v7 = vsub.s32 %v2281_v34, %v2284_v61  ;;  %v882_v19 = vshrl.u32 %v881_v45, 5  ;;  %v886_v27 = vshll.u32 %v4989_v8, %v883_v47 }
 0x13a   : > { %v893_v21 = vshrl.u32 %v4992_v16, %v884_v52  ;;  %v889_v10 = vshll.u32 %v4990_v12, %v883_v47  ;;  %v892_v26 = vshll.u32 %v4991_v14, %v883_v47  ;;  %v895_v42 = vshll.u32 %v4992_v16, %v883_v47 }
 0x13b   : > { %v642_v40 = vsel %vm559_vm10, %v641_v1, %v640_v51  ;;  %v2287_v24 = vsub.s32 0, %v5457_v7  ;;  %v888_v28 = vor.u32 %v887_v63, %v886_v27  ;;  %v896_v29 = vshrl.u32 %v4993_v18, %v884_v52 }
 0x13c   : > { %v645_v3 = vsel %vm5389_vm2, %v5148_v48, %v642_v40  ;;  %v891_v31 = vor.u32 %v890_v13, %v889_v10  ;;  %v894_v9 = vor.u32 %v893_v21, %v892_v26  ;;  %v898_v55 = vshll.u32 %v4993_v18, %v883_v47 }
 0x13d   : > { %4776 = vcosq.f32 %v645_v3  ;;  %v4363_v0 = vmin.u32 %v2287_v24, %v5457_v7  ;;  %v897_v33 = vor.u32 %v896_v29, %v895_v42  ;;  %v899_v59 = vshrl.u32 %v4994_v25, %v884_v52 }
 0x13e   : > { %4778 = vsinq.f32 %v645_v3  ;;  %v917_v11 = vshll.u32 %v877_v20, 8  ;;  %v885_v30 = vshrl.u32 %v4989_v8, %v884_v52  ;;  %vm901_vm10 = vcmp.lt.s32.totalorder %v882_v19, 1 }
 0x13f   : > { %v2289_v22 = vclz %v4363_v0  ;;  %v2537_v39 = vshrl.u32 %v2536_v44, 23  ;;  %vm2223_vm13 = vcmp.lt.s32.totalorder %v5155_v2, 0  ;;  %v900_v34 = vor.u32 %v899_v59, %v898_v55 }
 0x140   : > { %vm902_vm14 = vcmp.lt.s32.totalorder %v882_v19, 2  ;;  %vm903_vm15 = vcmp.lt.s32.totalorder %v882_v19, 3  ;;  %vm904_vm1 = vcmp.lt.s32.totalorder %v882_v19, 4  ;;  %v909_v35 = vsel %vm901_vm10, %v888_v28, %v891_v31 }
 0x141   : > { %v4364_v17 = vadd.s32 4294967294, %v2289_v22  ;;  %v906_v38 = vsel %vm904_vm1, %v894_v9, 2102212464  ;;  %v910_v41 = vsel %vm904_vm1, %v897_v33, 920167782  ;;  %v905_v56 = vsel %vm901_vm10, %v885_v30, %v888_v28 }
 0x142   : > { %v911_v43 = vsel %vm903_vm15, %v894_v9, %v910_v41  ;;  %v913_v45 = vsel %vm901_vm10, %v891_v31, %v894_v9  ;;  %v914_v15 = vsel %vm904_vm1, %v900_v34, 1326507024  ;;  %vm5480_vm2 = vcmp.le.f32.partialorder %v2221_v5, 0.7853982 }
 0x143   : > { %vm4365_vm3 = vcmp.lt.s32.totalorder %v4364_v17, 0  ;;  %v907_v62 = vsel %vm903_vm15, %v891_v31, %v906_v38  ;;  %v912_v47 = vsel %vm902_vm14, %v909_v35, %v911_v43  ;;  %v915_v58 = vsel %vm903_vm15, %v897_v33, %v914_v15 }
 0x144   : > { %v2292_v50 = vsel %vm4365_vm3, 0, %v4364_v17  ;;  %v916_v32 = vsel %vm902_vm14, %v913_v45, %v915_v58  ;;  %v5486_v51 = vmul.u32.u64.low %v917_v11, %v912_v47  ;;  %v5487_v52 = vmul.u32.u64.high %v917_v11, %v912_v47, %v5486_v51 }
 0x145   : > { %v2277_v54 = vadd.s32 %v5409_v4, %v5417_v57  ;;  %v2293_v61 = vsub.s32 32, %v2292_v50  ;;  %v2297_v5 = vsub.s32 4294967266, %v2292_v50  ;;  %v2307_v6 = vsub.s32 4, %v5446_v49 }
 0x146   : > { %v5493_v1 = vmul.u32.u64.low %v917_v11, %v916_v32  ;;  %v5494_v63 = vmul.u32.u64.high %v917_v11, %v916_v32, %v5493_v1  ;;  %v2533_v20 = vand.u32 2147483647, %v5444_v23  ;;  %v4374_v13 = vadd.s32 4294967169, %v2537_v39  ;;  %v408_v39 = vpop.f32.mrf.mxu0 }
 0x147   : > { %v2294_v44 = vshll.u32 %v5457_v7, %v2292_v50  ;;  %v2295_v40 = vshrl.u32 %v2277_v54, %v2293_v61  ;;  %v2298_v27 = vadd.s32 127, %v2297_v5  ;;  %v908_v21 = vsel %vm902_vm14, %v905_v56, %v907_v62 }
 0x148   : > { %vm652_vm4 = vcmp.lt.s32.totalorder %v5452_v60, 2  ;;  %vm653_vm5 = vcmp.eq.s32.totalorder %v5452_v60, 0  ;;  %v927_v4 = vadd.s32 1, %v5487_v52  ;;  %v2543_v57 = vadd.s32 1, %v4374_v13 }
 0x149   : > { %vm656_vm6 = vcmp.eq.s32.totalorder %v5452_v60, 2  ;;  %v2296_v24 = vor.u32 %v2295_v40, %v2294_v44  ;;  %v2299_v10 = vshll.u32 %v2298_v27, 23  ;;  %v2308_v7 = vsel %vm2223_vm13, %v2307_v6, %v5446_v49 }
 0x14a   : > { %v4777_v3 = vpop.eup %4776  ;;  %v924_v19 = vmul.u32 %v917_v11, %v908_v21  ;;  %vm926_vm7 = vc.u32 %v5494_v63, %v5486_v51  ;;  %vm2544_vm8 = vcmp.gt.s32.totalorder %v2543_v57, 0  ;;  %v2540_v31 = vand.u32 8388607, %v2533_v20 }
 0x14b   : > { %v4779_v26 = vpop.eup %4778  ;;  %v657_v28 = vxor.u32 2147483648, %v4777_v3  ;;  %v2300_v29 = vor.u32 4788187, %v2299_v10  ;;  %v928_v0 = vsel %vm926_vm7, %v927_v4, %v5487_v52  ;;  %v2310_v33 = vsel %vm5480_vm2, 0, %v2308_v7 }
 0x14c   : > { %v654_v42 = vxor.u32 2147483648, %v4779_v26  ;;  %v929_v49 = vadd.s32 %v928_v0, %v924_v19  ;;  %v2545_v55 = vsel %vm2544_vm8, %v2543_v57, 0  ;;  %v2303_v22 = vcvt.s32.f32 %v2296_v24 }
 0x14d   : > { %v658_v9 = vsel %vm656_vm6, %v657_v28, %v4779_v26  ;;  %v2301_v11 = vand.u32 2147483647, %v2300_v29  ;;  %v2547_v30 = vand.u32 31, %v2545_v55  ;;  %vm649_vm9 = vweird.f32 %v5148_v48 }
 0x14e   : > { %v655_v59 = vsel %vm653_vm5, %v4777_v3, %v654_v42  ;;  %v930_v17 = vadd.s32 536870912, %v929_v49  ;;  %v2314_v41 = vadd.s32 3, %v2310_v33  ;;  %v2541_v45 = vor.u32 8388608, %v2540_v31 }
 0x14f   : > { %v659_v34 = vsel %vm652_vm4, %v655_v59, %v658_v9  ;;  %v2304_v35 = vmul.f32 %v2303_v22, %v2301_v11  ;;  %v2548_v56 = vsub.s32 32, %v2547_v30  ;;  %v2550_v15 = vshll.u32 %v4989_v8, %v2547_v30 }
 0x150   : > { %v660_v38 = vsel %vm649_vm9, nan, %v659_v34  ;;  %v5520_v43 = vshrl.u32 %v930_v17, 30  ;;  %v5524_v62 = vadd.f32 %v5133_v36, %v408_v39  ;;  %v2553_v60 = vshll.u32 %v4990_v12, %v2547_v30 }
 0x151   : > { %3886 = vst.msk [vmem:[%s5437_s12] sm:$0xff] %vm3885_vm0, %v660_v38  ;;  %v2305_v47 = vxor.u32 2147483648, %v2304_v35  ;;  %v2551_v48 = vshrl.u32 %v4990_v12, %v2548_v56  ;;  %v2554_v58 = vshrl.u32 %v4991_v14, %v2548_v56  ;;  %v2556_v32 = vshll.u32 %v4991_v14, %v2547_v30 }
 0x152   : > { %v932_v50 = vshll.u32 %v5520_v43, 30  ;;  %v2557_v52 = vshrl.u32 %v4992_v16, %v2548_v56  ;;  %v2560_v54 = vshrl.u32 %v4993_v18, %v2548_v56  ;;  %v2546_v36 = vshrl.u32 %v2545_v55, 5 }
 0x153   : > { %v2306_v61 = vsel %vm2223_vm13, %v2305_v47, %v2304_v35  ;;  %v2552_v5 = vor.u32 %v2551_v48, %v2550_v15  ;;  %v2559_v6 = vshll.u32 %v4992_v16, %v2547_v30  ;;  %v2555_v44 = vor.u32 %v2554_v58, %v2553_v60 }
 0x154   : > { %v2309_v1 = vsel %vm5480_vm2, %v5155_v2, %v2306_v61  ;;  %v5539_v13 = vsub.s32 %v929_v49, %v932_v50  ;;  %v2558_v40 = vor.u32 %v2557_v52, %v2556_v32  ;;  %v2562_v21 = vshll.u32 %v4993_v18, %v2547_v30 }
 0x155   : > { %4780 = vcosq.f32 %v2309_v1  ;;  %v2561_v27 = vor.u32 %v2560_v54, %v2559_v6  ;;  %v2563_v4 = vshrl.u32 %v4994_v25, %v2548_v56  ;;  %v5543_v57 = vand.u32 3, %v2314_v41 }
 0x156   : > { %4782 = vsinq.f32 %v2309_v1  ;;  %v935_v3 = vsub.s32 0, %v5539_v13  ;;  %vm871_vm11 = vcmp.lt.s32.totalorder %v5339_v53, 0  ;;  %vm2568_vm12 = vcmp.lt.s32.totalorder %v2546_v36, 4 }
 0x157   : > { %v2564_v24 = vor.u32 %v2563_v4, %v2562_v21  ;;  %v2581_v46 = vshll.u32 %v2541_v45, 8  ;;  %v768_v10 = vand.u32 2139095040, %v5524_v62  ;;  %v2549_v26 = vshrl.u32 %v4989_v8, %v2548_v56 }
 0x158   : > { %v4311_v7 = vmin.u32 %v935_v3, %v5539_v13  ;;  %vm2565_vm10 = vcmp.lt.s32.totalorder %v2546_v36, 1  ;;  %v2570_v28 = vsel %vm2568_vm12, %v2558_v40, 2102212464  ;;  %vm2566_vm13 = vcmp.lt.s32.totalorder %v2546_v36, 2 }
 0x159   : > { %v2573_v19 = vsel %vm2565_vm10, %v2552_v5, %v2555_v44  ;;  %v2574_v42 = vsel %vm2568_vm12, %v2561_v27, 920167782  ;;  %v765_v29 = vand.u32 2147483647, %v5524_v62  ;;  %vm2567_vm14 = vcmp.lt.s32.totalorder %v2546_v36, 3 }
 0x15a   : > { %v937_v0 = vclz %v4311_v7  ;;  %v2569_v31 = vsel %vm2565_vm10, %v2549_v26, %v2552_v5  ;;  %v2577_v9 = vsel %vm2565_vm10, %v2555_v44, %v2558_v40  ;;  %v2571_v33 = vsel %vm2567_vm14, %v2555_v44, %v2570_v28 }
 0x15b   : > { %v2575_v49 = vsel %vm2567_vm14, %v2558_v40, %v2574_v42  ;;  %v2578_v55 = vsel %vm2568_vm12, %v2564_v24, 1326507024  ;;  %v769_v59 = vshrl.u32 %v768_v10, 23  ;;  %v955_v22 = vsub.s32 4, %v5520_v43 }
 0x15c   : > { %v4312_v11 = vadd.s32 4294967294, %v937_v0  ;;  %v2576_v30 = vsel %vm2566_vm13, %v2573_v19, %v2575_v49  ;;  %v2579_v39 = vsel %vm2567_vm14, %v2561_v27, %v2578_v55  ;;  %v2572_v41 = vsel %vm2566_vm13, %v2569_v31, %v2571_v33 }
 0x15d   : > { %v2580_v34 = vsel %vm2566_vm13, %v2577_v9, %v2579_v39  ;;  %v5557_v17 = vmul.u32.u64.low %v2581_v46, %v2576_v30  ;;  %v5558_v38 = vmul.u32.u64.high %v2581_v46, %v2576_v30, %v5557_v17  ;;  %v4306_v35 = vadd.s32 4294967169, %v769_v59 }
 0x15e   : > { %vm4313_vm15 = vcmp.lt.s32.totalorder %v4312_v11, 0  ;;  %v5562_v56 = vmul.u32.u64.low %v2581_v46, %v2580_v34  ;;  %v5563_v45 = vmul.u32.u64.high %v2581_v46, %v2580_v34, %v5562_v56  ;;  %vm2313_vm1 = vweird.f32 %v5155_v2 }
 0x15f   : > { %vm2320_vm2 = vcmp.eq.s32.totalorder %v5543_v57, 2  ;;  %vm5569_vm3 = vcmp.le.f32.partialorder %v869_v37, 0.7853982  ;;  %v940_v47 = vsel %vm4313_vm15, 0, %v4312_v11  ;;  %v775_v48 = vadd.s32 1, %v4306_v35 }
 0x160   : > { %v925_v60 = vadd.s32 %v5486_v51, %v5494_v63  ;;  %v941_v58 = vsub.s32 32, %v940_v47  ;;  %v945_v50 = vsub.s32 4294967266, %v940_v47  ;;  %v956_v32 = vsel %vm871_vm11, %v955_v22, %v5520_v43  ;;  %v488_v51 = vpop.f32.mrf.mxu1 }
 0x161   : > { %v2588_v52 = vmul.u32 %v2581_v46, %v2572_v41  ;;  %v2591_v54 = vadd.s32 1, %v5558_v38  ;;  %v772_v37 = vand.u32 8388607, %v765_v29  ;;  %vm776_vm4 = vcmp.gt.s32.totalorder %v775_v48, 0  ;;  %v5593_v46 = vld [vmem:[%s7692_s2] ss:$0 sm:$0xff] }
 0x162   : > { %v4781_v61 = vpop.eup %4780  ;;  %v942_v36 = vshll.u32 %v5539_v13, %v940_v47  ;;  %v943_v5 = vshrl.u32 %v925_v60, %v941_v58  ;;  %v946_v6 = vadd.s32 127, %v945_v50  ;;  %vm2590_vm5 = vc.u32 %v5563_v45, %v5557_v17 }
 0x163   : > { %v4783_v63 = vpop.eup %4782  ;;  %v2321_v1 = vxor.u32 2147483648, %v4781_v61  ;;  %v958_v43 = vsel %vm5569_vm3, 0, %v956_v32  ;;  %v2592_v44 = vsel %vm2590_vm5, %v2591_v54, %v5558_v38  ;;  %v777_v40 = vsel %vm776_vm4, %v775_v48, 0 }
 0x164   : > { %v2318_v27 = vxor.u32 2147483648, %v4783_v63  ;;  %v944_v21 = vor.u32 %v943_v5, %v942_v36  ;;  %v947_v4 = vshll.u32 %v946_v6, 23  ;;  %v2593_v3 = vadd.s32 %v2592_v44, %v2588_v52 }
 0x165   : > { %vm2317_vm6 = vcmp.eq.s32.totalorder %v5543_v57, 0  ;;  %v2322_v13 = vsel %vm2320_vm2, %v2321_v1, %v4783_v63  ;;  %v779_v24 = vand.u32 31, %v777_v40  ;;  %v5596_v10 = vadd.f32 %v5593_v46, %v488_v51 }
 0x166   : > { %vm2316_vm7 = vcmp.lt.s32.totalorder %v5543_v57, 2  ;;  %v2319_v7 = vsel %vm2317_vm6, %v4781_v61, %v2318_v27  ;;  %v948_v26 = vor.u32 4788187, %v947_v4  ;;  %v2594_v28 = vadd.s32 536870912, %v2593_v3 }
 0x167   : > { %v2323_v19 = vsel %vm2316_vm7, %v2319_v7, %v2322_v13  ;;  %v5599_v42 = vadd.s32 3, %v958_v43  ;;  %v773_v0 = vor.u32 8388608, %v772_v37  ;;  %v780_v31 = vsub.s32 32, %v779_v24 }
 0x168   : > { %v2324_v9 = vsel %vm2313_vm1, nan, %v2323_v19  ;;  %v949_v33 = vand.u32 2147483647, %v948_v26  ;;  %v951_v49 = vcvt.s32.f32 %v944_v21  ;;  %v5603_v55 = vshrl.u32 %v2594_v28, 30 }
 0x169   : > { %3902 = vst.msk [vmem:[%s5437_s12 + $0x80] sm:$0xff] %vm3885_vm0, %v2324_v9  ;;  %v783_v59 = vshrl.u32 %v4990_v12, %v780_v31  ;;  %v786_v57 = vshrl.u32 %v4991_v14, %v780_v31  ;;  %v789_v11 = vshrl.u32 %v4992_v16, %v780_v31  ;;  %v2432_v22 = vand.u32 2139095040, %v5596_v10 }
 0x16a   : > { %v952_v30 = vmul.f32 %v951_v49, %v949_v33  ;;  %v2596_v39 = vshll.u32 %v5603_v55, 30  ;;  %v782_v2 = vshll.u32 %v4989_v8, %v779_v24  ;;  %v785_v34 = vshll.u32 %v4990_v12, %v779_v24 }
 0x16b   : > { %v778_v38 = vshrl.u32 %v777_v40, 5  ;;  %v788_v35 = vshll.u32 %v4991_v14, %v779_v24  ;;  %v791_v41 = vshll.u32 %v4992_v16, %v779_v24  ;;  %v792_v56 = vshrl.u32 %v4993_v18, %v780_v31 }
 0x16c   : > { %v953_v47 = vxor.u32 2147483648, %v952_v30  ;;  %v5617_v48 = vsub.s32 %v2593_v3, %v2596_v39  ;;  %v784_v60 = vor.u32 %v783_v59, %v782_v2  ;;  %v787_v58 = vor.u32 %v786_v57, %v785_v34 }
 0x16d   : > { %v790_v50 = vor.u32 %v789_v11, %v788_v35  ;;  %v793_v32 = vor.u32 %v792_v56, %v791_v41  ;;  %v794_v52 = vshll.u32 %v4993_v18, %v779_v24  ;;  %v795_v54 = vshrl.u32 %v4994_v25, %v780_v31 }
 0x16e   : > { %v954_v37 = vsel %vm871_vm11, %v953_v47, %v952_v30  ;;  %v2599_v61 = vsub.s32 0, %v5617_v48  ;;  %v813_v36 = vshll.u32 %v773_v0, 8  ;;  %v2429_v5 = vand.u32 2147483647, %v5596_v10 }
 0x16f   : > { %v957_v6 = vsel %vm5569_vm3, %v5339_v53, %v954_v37  ;;  %v781_v51 = vshrl.u32 %v4989_v8, %v780_v31  ;;  %v796_v63 = vor.u32 %v795_v54, %v794_v52  ;;  %v2433_v1 = vshrl.u32 %v2432_v22, 23 }
 0x170   : > { %4784 = vcosq.f32 %v957_v6  ;;  %v4375_v43 = vmin.u32 %v2599_v61, %v5617_v48  ;;  %vm797_vm8 = vcmp.lt.s32.totalorder %v778_v38, 1  ;;  %vm800_vm9 = vcmp.lt.s32.totalorder %v778_v38, 4 }
 0x171   : > { %4786 = vsinq.f32 %v957_v6  ;;  %v802_v44 = vsel %vm800_vm9, %v790_v50, 2102212464  ;;  %v805_v40 = vsel %vm797_vm8, %v784_v60, %v787_v58  ;;  %v806_v27 = vsel %vm800_vm9, %v793_v32, 920167782 }
 0x172   : > { %v2601_v21 = vclz %v4375_v43  ;;  %vm798_vm11 = vcmp.lt.s32.totalorder %v778_v38, 2  ;;  %vm799_vm12 = vcmp.lt.s32.totalorder %v778_v38, 3  ;;  %v801_v4 = vsel %vm797_vm8, %v781_v51, %v784_v60  ;;  %v4498_v51 = vpop.f32.mrf.mxu0 }
 0x173   : > { %v803_v3 = vsel %vm799_vm12, %v787_v58, %v802_v44  ;;  %v807_v15 = vsel %vm799_vm12, %v790_v50, %v806_v27  ;;  %v809_v13 = vsel %vm797_vm8, %v787_v58, %v790_v50  ;;  %v810_v24 = vsel %vm800_vm9, %v796_v63, 1326507024 }
 0x174   : > { %v4376_v7 = vadd.s32 4294967294, %v2601_v21  ;;  %v2619_v26 = vsub.s32 4, %v5603_v55  ;;  %v808_v28 = vsel %vm798_vm11, %v805_v40, %v807_v15  ;;  %v811_v19 = vsel %vm799_vm12, %v793_v32, %v810_v24 }
 0x175   : > { %v804_v0 = vsel %vm798_vm11, %v801_v4, %v803_v3  ;;  %v812_v31 = vsel %vm798_vm11, %v809_v13, %v811_v19  ;;  %v5631_v9 = vmul.u32.u64.low %v813_v36, %v808_v28  ;;  %v5632_v33 = vmul.u32.u64.high %v813_v36, %v808_v28, %v5631_v9 }
 0x176   : > { %vm4377_vm10 = vcmp.lt.s32.totalorder %v4376_v7, 0  ;;  %v5634_v49 = vmul.u32.u64.low %v813_v36, %v812_v31  ;;  %v5635_v59 = vmul.u32.u64.high %v813_v36, %v812_v31, %v5634_v49  ;;  %v4370_v57 = vadd.s32 4294967169, %v2433_v1 }
 0x177   : > { %vm5639_vm13 = vcmp.le.f32.partialorder %v2533_v20, 0.7853982  ;;  %vm2535_vm14 = vcmp.lt.s32.totalorder %v5444_v23, 0  ;;  %v2589_v22 = vadd.s32 %v5557_v17, %v5563_v45  ;;  %v2604_v30 = vsel %vm4377_vm10, 0, %v4376_v7 }
 0x178   : > { %v2605_v39 = vsub.s32 32, %v2604_v30  ;;  %v2609_v2 = vsub.s32 4294967266, %v2604_v30  ;;  %v2620_v34 = vsel %vm2535_vm14, %v2619_v26, %v5603_v55  ;;  %v2439_v38 = vadd.s32 1, %v4370_v57 }
 0x179   : > { %v963_v35 = vand.u32 3, %v5599_v42  ;;  %v820_v41 = vmul.u32 %v813_v36, %v804_v0  ;;  %v823_v20 = vadd.s32 1, %v5632_v33  ;;  %v2436_v56 = vand.u32 8388607, %v2429_v5 }
 0x17a   : > { %v2606_v47 = vshll.u32 %v5617_v48, %v2604_v30  ;;  %v2607_v60 = vshrl.u32 %v2589_v22, %v2605_v39  ;;  %v2610_v17 = vadd.s32 127, %v2609_v2  ;;  %vm822_vm15 = vc.u32 %v5635_v59, %v5631_v9 }
 0x17b   : > { %v2622_v45 = vsel %vm5639_vm13, 0, %v2620_v34  ;;  %v824_v55 = vsel %vm822_vm15, %v823_v20, %v5632_v33  ;;  %vm2440_vm1 = vcmp.gt.s32.totalorder %v2439_v38, 0  ;;  %vm961_vm2 = vweird.f32 %v5339_v53 }
 0x17c   : > { %v2608_v58 = vor.u32 %v2607_v60, %v2606_v47  ;;  %v2611_v42 = vshll.u32 %v2610_v17, 23  ;;  %v825_v50 = vadd.s32 %v824_v55, %v820_v41  ;;  %v2441_v32 = vsel %vm2440_vm1, %v2439_v38, 0 }
 0x17d   : > { %v4785_v52 = vpop.eup %4784  ;;  %vm964_vm3 = vcmp.lt.s32.totalorder %v963_v35, 2  ;;  %vm965_vm4 = vcmp.eq.s32.totalorder %v963_v35, 0  ;;  %v2443_v48 = vand.u32 31, %v2441_v32  ;;  %v2437_v6 = vor.u32 8388608, %v2436_v56 }
 0x17e   : > { %v4787_v54 = vpop.eup %4786  ;;  %v969_v37 = vxor.u32 2147483648, %v4785_v52  ;;  %v2612_v61 = vor.u32 4788187, %v2611_v42  ;;  %v826_v36 = vadd.s32 536870912, %v825_v50  ;;  %vm968_vm5 = vcmp.eq.s32.totalorder %v963_v35, 2 }
 0x17f   : > { %v966_v63 = vxor.u32 2147483648, %v4787_v54  ;;  %v5659_v1 = vadd.s32 3, %v2622_v45  ;;  %v2444_v43 = vsub.s32 32, %v2443_v48  ;;  %v2615_v27 = vcvt.s32.f32 %v2608_v58 }
 0x180   : > { %v970_v44 = vsel %vm968_vm5, %v969_v37, %v4787_v54  ;;  %v2613_v40 = vand.u32 2147483647, %v2612_v61  ;;  %v827_v21 = vshrl.u32 %v826_v36, 30  ;;  %v5663_v3 = vadd.s32 %v5631_v9, %v5635_v59 }
 0x181   : > { %v967_v4 = vsel %vm965_vm4, %v4785_v52, %v966_v63  ;;  %v2447_v15 = vshrl.u32 %v4990_v12, %v2444_v43  ;;  %v5667_v13 = vadd.f32 %v5593_v46, %v4498_v51  ;;  %v5670_v28 = vshll.u32 %v2437_v6, 8 }
 0x182   : > { %v971_v24 = vsel %vm964_vm3, %v967_v4, %v970_v44  ;;  %v2616_v7 = vmul.f32 %v2615_v27, %v2613_v40  ;;  %v828_v26 = vshll.u32 %v827_v21, 30  ;;  %v2446_v0 = vshll.u32 %v4989_v8, %v2443_v48 }
 0x183   : > { %v972_v19 = vsel %vm961_vm2, nan, %v971_v24  ;;  %v2450_v31 = vshrl.u32 %v4991_v14, %v2444_v43  ;;  %v2453_v9 = vshrl.u32 %v4992_v16, %v2444_v43  ;;  %v2442_v59 = vshrl.u32 %v2441_v32, 5 }
 0x184   : > { %3889 = vst.msk [vmem:[%s5437_s12 + $0x18] sm:$0xff] %vm3885_vm0, %v972_v19  ;;  %v2617_v33 = vxor.u32 2147483648, %v2616_v7  ;;  %v5679_v49 = vsub.s32 %v825_v50, %v828_v26  ;;  %v2449_v57 = vshll.u32 %v4990_v12, %v2443_v48  ;;  %v2448_v22 = vor.u32 %v2447_v15, %v2446_v0 }
 0x185   : > { %v2452_v30 = vshll.u32 %v4991_v14, %v2443_v48  ;;  %v2455_v53 = vshll.u32 %v4992_v16, %v2443_v48  ;;  %v2456_v39 = vshrl.u32 %v4993_v18, %v2444_v43  ;;  %vm767_vm6 = vcmp.lt.s32.totalorder %v5524_v62, 0 }
 0x186   : > { %v2618_v2 = vsel %vm2535_vm14, %v2617_v33, %v2616_v7  ;;  %v831_v34 = vsub.s32 0, %v5679_v49  ;;  %v2458_v38 = vshll.u32 %v4993_v18, %v2443_v48  ;;  %v2459_v35 = vshrl.u32 %v4994_v25, %v2444_v43 }
 0x187   : > { %v2621_v41 = vsel %vm5639_vm13, %v5444_v23, %v2618_v2  ;;  %v2451_v20 = vor.u32 %v2450_v31, %v2449_v57  ;;  %v2454_v56 = vor.u32 %v2453_v9, %v2452_v30  ;;  %v2457_v47 = vor.u32 %v2456_v39, %v2455_v53 }
 0x188   : > { %4788 = vcosq.f32 %v2621_v41  ;;  %v4307_v60 = vmin.u32 %v831_v34, %v5679_v49  ;;  %v2460_v17 = vor.u32 %v2459_v35, %v2458_v38  ;;  %v1080_v45 = vand.u32 2139095040, %v5667_v13 }
 0x189   : > { %4790 = vsinq.f32 %v2621_v41  ;;  %v851_v55 = vsub.s32 4, %v827_v21  ;;  %v2445_v58 = vshrl.u32 %v4989_v8, %v2444_v43  ;;  %vm2461_vm7 = vcmp.lt.s32.totalorder %v2442_v59, 1 }
 0x18a   : > { %v833_v42 = vclz %v4307_v60  ;;  %vm2462_vm8 = vcmp.lt.s32.totalorder %v2442_v59, 2  ;;  %vm2463_vm9 = vcmp.lt.s32.totalorder %v2442_v59, 3  ;;  %vm2464_vm11 = vcmp.lt.s32.totalorder %v2442_v59, 4 }
 0x18b   : > { %v2466_v11 = vsel %vm2464_vm11, %v2454_v56, 2102212464  ;;  %v2469_v50 = vsel %vm2461_vm7, %v2448_v22, %v2451_v20  ;;  %v2470_v32 = vsel %vm2464_vm11, %v2457_v47, 920167782  ;;  %v2473_v52 = vsel %vm2461_vm7, %v2451_v20, %v2454_v56 }
 0x18c   : > { %v4308_v48 = vadd.s32 4294967294, %v833_v42  ;;  %v2465_v54 = vsel %vm2461_vm7, %v2445_v58, %v2448_v22  ;;  %v2471_v37 = vsel %vm2463_vm9, %v2454_v56, %v2470_v32  ;;  %v2474_v61 = vsel %vm2464_vm11, %v2460_v17, 1326507024  ;;  %v4522_v58 = vpop.f32.mrf.mxu1 }
 0x18d   : > { %v2467_v36 = vsel %vm2463_vm9, %v2451_v20, %v2466_v11  ;;  %v2472_v6 = vsel %vm2462_vm8, %v2469_v50, %v2471_v37  ;;  %v2475_v51 = vsel %vm2463_vm9, %v2457_v47, %v2474_v61  ;;  %v1081_v63 = vshrl.u32 %v1080_v45, 23 }
 0x18e   : > { %vm4309_vm12 = vcmp.lt.s32.totalorder %v4308_v48, 0  ;;  %v2476_v43 = vsel %vm2462_vm8, %v2473_v52, %v2475_v51  ;;  %v5700_v44 = vmul.u32.u64.low %v5670_v28, %v2472_v6  ;;  %v5701_v40 = vmul.u32.u64.high %v5670_v28, %v2472_v6, %v5700_v44 }
 0x18f   : > { %v836_v27 = vsel %vm4309_vm12, 0, %v4308_v48  ;;  %v852_v4 = vsel %vm767_vm6, %v851_v55, %v827_v21  ;;  %v5707_v15 = vmul.u32.u64.low %v5670_v28, %v2476_v43  ;;  %v5708_v24 = vmul.u32.u64.high %v5670_v28, %v2476_v43, %v5707_v15 }
 0x190   : > { %v837_v7 = vsub.s32 32, %v836_v27  ;;  %v841_v26 = vsub.s32 4294967266, %v836_v27  ;;  %v2468_v19 = vsel %vm2462_vm8, %v2465_v54, %v2467_v36  ;;  %v4318_v0 = vadd.s32 4294967169, %v1081_v63 }
 0x191   : > { %vm5713_vm10 = vcmp.le.f32.partialorder %v765_v29, 0.7853982  ;;  %v838_v9 = vshll.u32 %v5679_v49, %v836_v27  ;;  %v1077_v33 = vand.u32 2147483647, %v5667_v13  ;;  %v2487_v22 = vadd.s32 1, %v5701_v40 }
 0x192   : > { %v839_v21 = vshrl.u32 %v5663_v3, %v837_v7  ;;  %v842_v57 = vadd.s32 127, %v841_v26  ;;  %v1087_v30 = vadd.s32 1, %v4318_v0  ;;  %v2627_v59 = vand.u32 3, %v5659_v1 }
 0x193   : > { %v854_v53 = vsel %vm5713_vm10, 0, %v852_v4  ;;  %v2484_v29 = vmul.u32 %v5670_v28, %v2468_v19  ;;  %vm2486_vm13 = vc.u32 %v5708_v24, %v5700_v44  ;;  %vm2625_vm15 = vweird.f32 %v5444_v23 }
 0x194   : > { %v840_v39 = vor.u32 %v839_v21, %v838_v9  ;;  %v843_v49 = vshll.u32 %v842_v57, 23  ;;  %v2488_v2 = vsel %vm2486_vm13, %v2487_v22, %v5701_v40  ;;  %vm1088_vm14 = vcmp.gt.s32.totalorder %v1087_v30, 0 }
 0x195   : > { %v4789_v3 = vpop.eup %4788  ;;  %v2489_v34 = vadd.s32 %v2488_v2, %v2484_v29  ;;  %v1089_v38 = vsel %vm1088_vm14, %v1087_v30, 0  ;;  %v858_v20 = vadd.s32 3, %v854_v53  ;;  %v1084_v28 = vand.u32 8388607, %v1077_v33 }
 0x196   : > { %v4791_v35 = vpop.eup %4790  ;;  %v2633_v1 = vxor.u32 2147483648, %v4789_v3  ;;  %v844_v41 = vor.u32 4788187, %v843_v49  ;;  %vm2632_vm1 = vcmp.eq.s32.totalorder %v2627_v59, 2  ;;  %v1091_v60 = vand.u32 31, %v1089_v38 }
 0x197   : > { %v2630_v56 = vxor.u32 2147483648, %v4791_v35  ;;  %v2490_v47 = vadd.s32 536870912, %v2489_v34  ;;  %vm2629_vm2 = vcmp.eq.s32.totalorder %v2627_v59, 0  ;;  %v847_v55 = vcvt.s32.f32 %v840_v39 }
 0x198   : > { %v2634_v17 = vsel %vm2632_vm1, %v2633_v1, %v4791_v35  ;;  %v845_v45 = vand.u32 2147483647, %v844_v41  ;;  %vm2628_vm3 = vcmp.lt.s32.totalorder %v2627_v59, 2  ;;  %v1092_v50 = vsub.s32 32, %v1091_v60 }
 0x199   : > { %v2631_v42 = vsel %vm2629_vm2, %v4789_v3, %v2630_v56  ;;  %v5731_v11 = vshrl.u32 %v2490_v47, 30  ;;  %v5733_v48 = vand.u32 3, %v858_v20  ;;  %v1085_v54 = vor.u32 8388608, %v1084_v28 }
 0x19a   : > { %v2635_v32 = vsel %vm2628_vm3, %v2631_v42, %v2634_v17  ;;  %v848_v52 = vmul.f32 %v847_v55, %v845_v45  ;;  %v1094_v36 = vshll.u32 %v4989_v8, %v1091_v60  ;;  %v5740_v6 = vadd.f32 %v5593_v46, %v4522_v58 }
 0x19b   : > { %v2636_v37 = vsel %vm2625_vm15, nan, %v2635_v32  ;;  %v2492_v61 = vshll.u32 %v5731_v11, 30  ;;  %v1095_v63 = vshrl.u32 %v4990_v12, %v1092_v50  ;;  %v1098_v43 = vshrl.u32 %v4991_v14, %v1092_v50 }
 0x19c   : > { %3905 = vst.msk [vmem:[%s5437_s12 + $0x98] sm:$0xff] %vm3885_vm0, %v2636_v37  ;;  %v849_v51 = vxor.u32 2147483648, %v848_v52  ;;  %v1101_v40 = vshrl.u32 %v4992_v16, %v1092_v50  ;;  %v1097_v23 = vshll.u32 %v4990_v12, %v1091_v60  ;;  %v1100_v4 = vshll.u32 %v4991_v14, %v1091_v60 }
 0x19d   : > { %v5747_v27 = vsub.s32 %v2489_v34, %v2492_v61  ;;  %v1104_v15 = vshrl.u32 %v4993_v18, %v1092_v50  ;;  %v1090_v26 = vshrl.u32 %v1089_v38, 5  ;;  %v1096_v19 = vor.u32 %v1095_v63, %v1094_v36 }
 0x19e   : > { %v850_v7 = vsel %vm767_vm6, %v849_v51, %v848_v52  ;;  %v1103_v0 = vshll.u32 %v4992_v16, %v1091_v60  ;;  %v1099_v57 = vor.u32 %v1098_v43, %v1097_v23  ;;  %v1102_v22 = vor.u32 %v1101_v40, %v1100_v4 }
 0x19f   : > { %v853_v9 = vsel %vm5713_vm10, %v5524_v62, %v850_v7  ;;  %v2495_v21 = vsub.s32 0, %v5747_v27  ;;  %v1106_v59 = vshll.u32 %v4993_v18, %v1091_v60  ;;  %v1107_v53 = vshrl.u32 %v4994_v25, %v1092_v50 }
 0x1a0   : > { %4792 = vcosq.f32 %v853_v9  ;;  %v1105_v30 = vor.u32 %v1104_v15, %v1103_v0  ;;  %v1125_v39 = vshll.u32 %v1085_v54, 8  ;;  %v2744_v49 = vand.u32 2139095040, %v5740_v6 }
 0x1a1   : > { %4794 = vsinq.f32 %v853_v9  ;;  %v4371_v29 = vmin.u32 %v2495_v21, %v5747_v27  ;;  %v1093_v2 = vshrl.u32 %v4989_v8, %v1092_v50  ;;  %v1108_v31 = vor.u32 %v1107_v53, %v1106_v59 }
 0x1a2   : > { %vm1109_vm4 = vcmp.lt.s32.totalorder %v1090_v26, 1  ;;  %vm1110_vm5 = vcmp.lt.s32.totalorder %v1090_v26, 2  ;;  %vm1111_vm6 = vcmp.lt.s32.totalorder %v1090_v26, 3  ;;  %vm1112_vm7 = vcmp.lt.s32.totalorder %v1090_v26, 4 }
 0x1a3   : > { %v2497_v3 = vclz %v4371_v29  ;;  %v1117_v34 = vsel %vm1109_vm4, %v1096_v19, %v1099_v57  ;;  %v1114_v38 = vsel %vm1112_vm7, %v1102_v22, 2102212464  ;;  %v1118_v35 = vsel %vm1112_vm7, %v1105_v30, 920167782 }
 0x1a4   : > { %v1121_v1 = vsel %vm1109_vm4, %v1099_v57, %v1102_v22  ;;  %v1122_v41 = vsel %vm1112_vm7, %v1108_v31, 1326507024  ;;  %v2515_v28 = vsub.s32 4, %v5731_v11  ;;  %v1119_v56 = vsel %vm1111_vm6, %v1102_v22, %v1118_v35 }
 0x1a5   : > { %v4372_v20 = vadd.s32 4294967294, %v2497_v3  ;;  %v1123_v47 = vsel %vm1111_vm6, %v1105_v30, %v1122_v41  ;;  %v1113_v60 = vsel %vm1109_vm4, %v1093_v2, %v1096_v19  ;;  %v1120_v17 = vsel %vm1110_vm5, %v1117_v34, %v1119_v56 }
 0x1a6   : > { %v1124_v45 = vsel %vm1110_vm5, %v1121_v1, %v1123_v47  ;;  %v2745_v55 = vshrl.u32 %v2744_v49, 23  ;;  %v1115_v58 = vsel %vm1111_vm6, %v1099_v57, %v1114_v38  ;;  %vm5779_vm9 = vcmp.le.f32.partialorder %v2429_v5, 0.7853982 }
 0x1a7   : > { %vm4373_vm8 = vcmp.lt.s32.totalorder %v4372_v20, 0  ;;  %v5770_v42 = vmul.u32.u64.low %v1125_v39, %v1124_v45  ;;  %v5771_v50 = vmul.u32.u64.high %v1125_v39, %v1124_v45, %v5770_v42  ;;  %v2485_v36 = vadd.s32 %v5700_v44, %v5708_v24 }
 0x1a8   : > { %v2500_v32 = vsel %vm4373_vm8, 0, %v4372_v20  ;;  %v5773_v52 = vmul.u32.u64.low %v1125_v39, %v1120_v17  ;;  %v5774_v54 = vmul.u32.u64.high %v1125_v39, %v1120_v17, %v5773_v52  ;;  %v4382_v37 = vadd.s32 4294967169, %v2745_v55 }
 0x1a9   : > { %v2501_v51 = vsub.s32 32, %v2500_v32  ;;  %v2505_v63 = vsub.s32 4294967266, %v2500_v32  ;;  %vm857_vm11 = vweird.f32 %v5524_v62  ;;  %vm860_vm12 = vcmp.lt.s32.totalorder %v5733_v48, 2 }
 0x1aa   : > { %vm2431_vm10 = vcmp.lt.s32.totalorder %v5596_v10, 0  ;;  %v1116_v43 = vsel %vm1110_vm5, %v1113_v60, %v1115_v58  ;;  %v2751_v40 = vadd.s32 1, %v4382_v37  ;;  %v2502_v23 = vshll.u32 %v5747_v27, %v2500_v32  ;;  %v418_v27 = vpop.f32.mrf.mxu0 }
 0x1ab   : > { %v2503_v5 = vshrl.u32 %v2485_v36, %v2501_v51  ;;  %v2506_v4 = vadd.s32 127, %v2505_v63  ;;  %vm1134_vm13 = vc.u32 %v5771_v50, %v5773_v52  ;;  %vm861_vm14 = vcmp.eq.s32.totalorder %v5733_v48, 0 }
 0x1ac   : > { %v2516_v44 = vsel %vm2431_vm10, %v2515_v28, %v5731_v11  ;;  %v1135_v24 = vadd.s32 1, %v5774_v54  ;;  %vm2752_vm15 = vcmp.gt.s32.totalorder %v2751_v40, 0  ;;  %v1132_v19 = vmul.u32 %v1125_v39, %v1116_v43 }
 0x1ad   : > { %v4793_v15 = vpop.eup %4792  ;;  %v2504_v7 = vor.u32 %v2503_v5, %v2502_v23  ;;  %v2507_v26 = vshll.u32 %v2506_v4, 23  ;;  %v2753_v0 = vsel %vm2752_vm15, %v2751_v40, 0  ;;  %v2741_v22 = vand.u32 2147483647, %v5740_v6 }
 0x1ae   : > { %v4795_v9 = vpop.eup %4794  ;;  %v865_v21 = vxor.u32 2147483648, %v4793_v15  ;;  %v1136_v57 = vsel %vm1134_vm13, %v1135_v24, %v5774_v54  ;;  %v2755_v30 = vand.u32 31, %v2753_v0  ;;  %vm864_vm1 = vcmp.eq.s32.totalorder %v5733_v48, 2 }
 0x1af   : > { %v862_v59 = vxor.u32 2147483648, %v4795_v9  ;;  %v2508_v11 = vor.u32 4788187, %v2507_v26  ;;  %v1137_v53 = vadd.s32 %v1136_v57, %v1132_v19  ;;  %v2518_v49 = vsel %vm5779_vm9, 0, %v2516_v44 }
 0x1b0   : > { %v866_v29 = vsel %vm864_vm1, %v865_v21, %v4795_v9  ;;  %v2756_v39 = vsub.s32 32, %v2755_v30  ;;  %v5803_v2 = vadd.f32 %v5593_v46, %v418_v27  ;;  %v2511_v34 = vcvt.s32.f32 %v2504_v7 }
 0x1b1   : > { %v863_v31 = vsel %vm861_vm14, %v4793_v15, %v862_v59  ;;  %v2509_v3 = vand.u32 2147483647, %v2508_v11  ;;  %v1138_v38 = vadd.s32 536870912, %v1137_v53  ;;  %v2748_v1 = vand.u32 8388607, %v2741_v22 }
 0x1b2   : > { %v867_v35 = vsel %vm860_vm12, %v863_v31, %v866_v29  ;;  %v2759_v41 = vshrl.u32 %v4990_v12, %v2756_v39  ;;  %v2762_v20 = vshrl.u32 %v4991_v14, %v2756_v39  ;;  %v2765_v60 = vshrl.u32 %v4992_v16, %v2756_v39 }
 0x1b3   : > { %v868_v28 = vsel %vm857_vm11, nan, %v867_v35  ;;  %v2512_v56 = vmul.f32 %v2511_v34, %v2509_v3  ;;  %v1139_v47 = vshrl.u32 %v1138_v38, 30  ;;  %v2754_v17 = vshrl.u32 %v2753_v0, 5 }
 0x1b4   : > { %3888 = vst.msk [vmem:[%s5437_s12 + $0x10] sm:$0xff] %vm3885_vm0, %v868_v28  ;;  %v2758_v48 = vshll.u32 %v4989_v8, %v2755_v30  ;;  %v2764_v45 = vshll.u32 %v4991_v14, %v2755_v30  ;;  %v2768_v55 = vshrl.u32 %v4993_v18, %v2756_v39  ;;  %v2761_v32 = vshll.u32 %v4990_v12, %v2755_v30 }
 0x1b5   : > { %v2513_v58 = vxor.u32 2147483648, %v2512_v56  ;;  %v1140_v42 = vshll.u32 %v1139_v47, 30  ;;  %v2767_v62 = vshll.u32 %v4992_v16, %v2755_v30  ;;  %v2770_v36 = vshll.u32 %v4993_v18, %v2755_v30 }
 0x1b6   : > { %v2760_v54 = vor.u32 %v2759_v41, %v2758_v48  ;;  %v2766_v37 = vor.u32 %v2765_v60, %v2764_v45  ;;  %v2771_v51 = vshrl.u32 %v4994_v25, %v2756_v39  ;;  %v2763_v40 = vor.u32 %v2762_v20, %v2761_v32 }
 0x1b7   : > { %v2514_v63 = vsel %vm2431_vm10, %v2513_v58, %v2512_v56  ;;  %v5827_v43 = vsub.s32 %v1137_v53, %v1140_v42  ;;  %v2769_v23 = vor.u32 %v2768_v55, %v2767_v62  ;;  %v2522_v4 = vadd.s32 3, %v2518_v49 }
 0x1b8   : > { %v2517_v5 = vsel %vm5779_vm9, %v5596_v10, %v2514_v63  ;;  %v2749_v44 = vor.u32 8388608, %v2748_v1  ;;  %v2772_v24 = vor.u32 %v2771_v51, %v2770_v36  ;;  %vm2776_vm2 = vcmp.lt.s32.totalorder %v2754_v17, 4 }
 0x1b9   : > { %4796 = vcosq.f32 %v2517_v5  ;;  %v1143_v15 = vsub.s32 0, %v5827_v43  ;;  %v976_v7 = vand.u32 2139095040, %v5803_v2  ;;  %v2757_v26 = vshrl.u32 %v4989_v8, %v2756_v39 }
 0x1ba   : > { %4798 = vsinq.f32 %v2517_v5  ;;  %vm2773_vm3 = vcmp.lt.s32.totalorder %v2754_v17, 1  ;;  %v2778_v19 = vsel %vm2776_vm2, %v2766_v37, 2102212464  ;;  %vm2775_vm4 = vcmp.lt.s32.totalorder %v2754_v17, 3 }
 0x1bb   : > { %v4319_v0 = vmin.u32 %v1143_v15, %v5827_v43  ;;  %v2781_v27 = vsel %vm2773_vm3, %v2760_v54, %v2763_v40  ;;  %v2782_v61 = vsel %vm2776_vm2, %v2769_v23, 920167782  ;;  %v1163_v9 = vsub.s32 4, %v1139_v47 }
 0x1bc   : > { %v2783_v21 = vsel %vm2775_vm4, %v2766_v37, %v2782_v61  ;;  %v2785_v57 = vsel %vm2773_vm3, %v2763_v40, %v2766_v37  ;;  %v2786_v30 = vsel %vm2776_vm2, %v2772_v24, 1326507024  ;;  %vm2774_vm5 = vcmp.lt.s32.totalorder %v2754_v17, 2 }
 0x1bd   : > { %v1145_v59 = vclz %v4319_v0  ;;  %v2777_v11 = vsel %vm2773_vm3, %v2757_v26, %v2760_v54  ;;  %v2779_v53 = vsel %vm2775_vm4, %v2763_v40, %v2778_v19  ;;  %v2784_v29 = vsel %vm2774_vm5, %v2781_v27, %v2783_v21 }
 0x1be   : > { %v2787_v49 = vsel %vm2775_vm4, %v2769_v23, %v2786_v30  ;;  %v2789_v31 = vshll.u32 %v2749_v44, 8  ;;  %v977_v3 = vshrl.u32 %v976_v7, 23  ;;  %vm1079_vm6 = vcmp.lt.s32.totalorder %v5667_v13, 0  ;;  %v498_v30 = vpop.f32.mrf.mxu1 }
 0x1bf   : > { %v4320_v39 = vadd.s32 4294967294, %v1145_v59  ;;  %v2788_v34 = vsel %vm2774_vm5, %v2785_v57, %v2787_v49  ;;  %v1164_v20 = vsel %vm1079_vm6, %v1163_v9, %v1139_v47  ;;  %v2780_v28 = vsel %vm2774_vm5, %v2777_v11, %v2779_v53 }
 0x1c0   : > { %v5837_v38 = vmul.u32.u64.low %v2789_v31, %v2788_v34  ;;  %v5838_v35 = vmul.u32.u64.high %v2789_v31, %v2788_v34, %v5837_v38  ;;  %v5840_v1 = vmul.u32.u64.low %v2789_v31, %v2784_v29  ;;  %v5841_v41 = vmul.u32.u64.high %v2789_v31, %v2784_v29, %v5840_v1 }
 0x1c1   : > { %vm4321_vm7 = vcmp.lt.s32.totalorder %v4320_v39, 0  ;;  %v4314_v56 = vadd.s32 4294967169, %v977_v3  ;;  %v2523_v60 = vand.u32 3, %v2522_v4  ;;  %vm5848_vm8 = vcmp.le.f32.partialorder %v1077_v33, 0.7853982 }
 0x1c2   : > { %v1148_v48 = vsel %vm4321_vm7, 0, %v4320_v39  ;;  %v973_v45 = vand.u32 2147483647, %v5803_v2  ;;  %v1133_v55 = vadd.s32 %v5773_v52, %v5771_v50  ;;  %v1166_v47 = vsel %vm5848_vm8, 0, %v1164_v20 }
 0x1c3   : > { %v1149_v58 = vsub.s32 32, %v1148_v48  ;;  %v1153_v42 = vsub.s32 4294967266, %v1148_v48  ;;  %v983_v32 = vadd.s32 1, %v4314_v56  ;;  %v2796_v62 = vmul.u32 %v2789_v31, %v2780_v28 }
 0x1c4   : > { %vm2798_vm9 = vc.u32 %v5838_v35, %v5840_v1  ;;  %v2799_v33 = vadd.s32 1, %v5841_v41  ;;  %v1150_v54 = vshll.u32 %v5827_v43, %v1148_v48  ;;  %vm2528_vm12 = vcmp.eq.s32.totalorder %v2523_v60, 2 }
 0x1c5   : > { %v1151_v37 = vshrl.u32 %v1133_v55, %v1149_v58  ;;  %v1154_v36 = vadd.s32 127, %v1153_v42  ;;  %vm984_vm11 = vcmp.gt.s32.totalorder %v983_v32, 0  ;;  %v1170_v24 = vadd.s32 3, %v1166_v47 }
 0x1c6   : > { %v4797_v51 = vpop.eup %4796  ;;  %v2800_v50 = vsel %vm2798_vm9, %v2799_v33, %v5841_v41  ;;  %v985_v52 = vsel %vm984_vm11, %v983_v32, 0  ;;  %v980_v15 = vand.u32 8388607, %v973_v45  ;;  %vm2525_vm10 = vcmp.eq.s32.totalorder %v2523_v60, 0 }
 0x1c7   : > { %v4799_v63 = vpop.eup %4798  ;;  %v2529_v40 = vxor.u32 2147483648, %v4797_v51  ;;  %v1152_v23 = vor.u32 %v1151_v37, %v1150_v54  ;;  %v1155_v5 = vshll.u32 %v1154_v36, 23  ;;  %v2801_v4 = vadd.s32 %v2800_v50, %v2796_v62 }
 0x1c8   : > { %v2526_v44 = vxor.u32 2147483648, %v4799_v63  ;;  %v987_v7 = vand.u32 31, %v985_v52  ;;  %vm2521_vm13 = vweird.f32 %v5596_v10  ;;  %vm2524_vm14 = vcmp.lt.s32.totalorder %v2523_v60, 2 }
 0x1c9   : > { %v2530_v43 = vsel %vm2528_vm12, %v2529_v40, %v4799_v63  ;;  %v1156_v26 = vor.u32 4788187, %v1155_v5  ;;  %v2802_v19 = vadd.s32 536870912, %v2801_v4  ;;  %v1159_v21 = vcvt.s32.f32 %v1152_v23 }
 0x1ca   : > { %v2527_v0 = vsel %vm2525_vm10, %v4797_v51, %v2526_v44  ;;  %v988_v27 = vsub.s32 32, %v987_v7  ;;  %v5867_v11 = vand.u32 3, %v1170_v24  ;;  %v981_v53 = vor.u32 8388608, %v980_v15 }
 0x1cb   : > { %v2531_v61 = vsel %vm2524_vm14, %v2527_v0, %v2530_v43  ;;  %v1157_v9 = vand.u32 2147483647, %v1156_v26  ;;  %v5865_v57 = vshrl.u32 %v2802_v19, 30  ;;  %v986_v3 = vshrl.u32 %v985_v52, 5 }
 0x1cc   : > { %v2532_v59 = vsel %vm2521_vm13, nan, %v2531_v61  ;;  %v991_v10 = vshrl.u32 %v4990_v12, %v988_v27  ;;  %v994_v31 = vshrl.u32 %v4991_v14, %v988_v27  ;;  %v997_v39 = vshrl.u32 %v4992_v16, %v988_v27 }
 0x1cd   : > { %3904 = vst.msk [vmem:[%s5437_s12 + $0x90] sm:$0xff] %vm3885_vm0, %v2532_v59  ;;  %v1160_v29 = vmul.f32 %v1159_v21, %v1157_v9  ;;  %v2804_v49 = vshll.u32 %v5865_v57, 30  ;;  %v1000_v34 = vshrl.u32 %v4993_v18, %v988_v27  ;;  %v5877_v38 = vadd.f32 %v5593_v46, %v498_v30 }
 0x1ce   : > { %v990_v28 = vshll.u32 %v4989_v8, %v987_v7  ;;  %v993_v56 = vshll.u32 %v4990_v12, %v987_v7  ;;  %v996_v60 = vshll.u32 %v4991_v14, %v987_v7  ;;  %v999_v48 = vshll.u32 %v4992_v16, %v987_v7 }
 0x1cf   : > { %v1161_v41 = vxor.u32 2147483648, %v1160_v29  ;;  %v5879_v20 = vsub.s32 %v2801_v4, %v2804_v49  ;;  %v1002_v55 = vshll.u32 %v4993_v18, %v987_v7  ;;  %v1003_v58 = vshrl.u32 %v4994_v25, %v988_v27 }
 0x1d0   : > { %v992_v32 = vor.u32 %v991_v10, %v990_v28  ;;  %v995_v47 = vor.u32 %v994_v31, %v993_v56  ;;  %vm2743_vm15 = vcmp.lt.s32.totalorder %v5740_v6, 0  ;;  %v998_v33 = vor.u32 %v997_v39, %v996_v60 }
 0x1d1   : > { %v1162_v42 = vsel %vm1079_vm6, %v1161_v41, %v1160_v29  ;;  %v2807_v46 = vsub.s32 0, %v5879_v20  ;;  %v1001_v54 = vor.u32 %v1000_v34, %v999_v48  ;;  %v1004_v37 = vor.u32 %v1003_v58, %v1002_v55 }
 0x1d2   : > { %v1165_v62 = vsel %vm5848_vm8, %v5667_v13, %v1162_v42  ;;  %v1021_v51 = vshll.u32 %v981_v53, 8  ;;  %v2640_v50 = vand.u32 2139095040, %v5877_v38  ;;  %v2827_v52 = vsub.s32 4, %v5865_v57 }
 0x1d3   : > { %4800 = vcosq.f32 %v1165_v62  ;;  %v4383_v36 = vmin.u32 %v2807_v46, %v5879_v20  ;;  %v989_v63 = vshrl.u32 %v4989_v8, %v988_v27  ;;  %vm1005_vm1 = vcmp.lt.s32.totalorder %v986_v3, 1 }
 0x1d4   : > { %4802 = vsinq.f32 %v1165_v62  ;;  %vm1007_vm2 = vcmp.lt.s32.totalorder %v986_v3, 3  ;;  %vm1008_vm3 = vcmp.lt.s32.totalorder %v986_v3, 4  ;;  %v1013_v17 = vsel %vm1005_vm1, %v992_v32, %v995_v47 }
 0x1d5   : > { %v2809_v40 = vclz %v4383_v36  ;;  %v1010_v23 = vsel %vm1008_vm3, %v998_v33, 2102212464  ;;  %v1014_v5 = vsel %vm1008_vm3, %v1001_v54, 920167782  ;;  %v1017_v4 = vsel %vm1005_vm1, %v995_v47, %v998_v33 }
 0x1d6   : > { %v1018_v44 = vsel %vm1008_vm3, %v1004_v37, 1326507024  ;;  %vm1006_vm4 = vcmp.lt.s32.totalorder %v986_v3, 2  ;;  %v1015_v15 = vsel %vm1007_vm2, %v998_v33, %v1014_v5  ;;  %v1009_v43 = vsel %vm1005_vm1, %v989_v63, %v992_v32  ;;  %v4501_v3 = vpop.f32.mrf.mxu0 }
 0x1d7   : > { %v4384_v24 = vadd.s32 4294967294, %v2809_v40  ;;  %v1019_v7 = vsel %vm1007_vm2, %v1001_v54, %v1018_v44  ;;  %v1016_v26 = vsel %vm1006_vm4, %v1013_v17, %v1015_v15  ;;  %v2641_v0 = vshrl.u32 %v2640_v50, 23  ;;  %v5937_v54 = vld [vmem:[%s7692_s2] ss:$0 sm:$0xff] }
 0x1d8   : > { %v1020_v19 = vsel %vm1006_vm4, %v1017_v4, %v1019_v7  ;;  %v1011_v27 = vsel %vm1007_vm2, %v995_v47, %v1010_v23  ;;  %v5906_v30 = vmul.u32.u64.low %v1021_v51, %v1016_v26  ;;  %v5907_v59 = vmul.u32.u64.high %v1021_v51, %v1016_v26, %v5906_v30 }
 0x1d9   : > { %vm4385_vm5 = vcmp.lt.s32.totalorder %v4384_v24, 0  ;;  %v5903_v61 = vmul.u32.u64.low %v1021_v51, %v1020_v19  ;;  %v5904_v9 = vmul.u32.u64.high %v1021_v51, %v1020_v19, %v5903_v61  ;;  %v4378_v53 = vadd.s32 4294967169, %v2641_v0 }
 0x1da   : > { %v2812_v21 = vsel %vm4385_vm5, 0, %v4384_v24  ;;  %v2797_v29 = vadd.s32 %v5840_v1, %v5838_v35  ;;  %v2828_v31 = vsel %vm2743_vm15, %v2827_v52, %v5865_v57  ;;  %vm1172_vm6 = vcmp.lt.s32.totalorder %v5867_v11, 2 }
 0x1db   : > { %v2813_v49 = vsub.s32 32, %v2812_v21  ;;  %v2817_v10 = vsub.s32 4294967266, %v2812_v21  ;;  %vm5918_vm7 = vcmp.le.f32.partialorder %v2741_v22, 0.7853982  ;;  %v1012_v34 = vsel %vm1006_vm4, %v1009_v43, %v1011_v27 }
 0x1dc   : > { %v2647_v41 = vadd.s32 1, %v4378_v53  ;;  %vm1169_vm8 = vweird.f32 %v5667_v13  ;;  %v2814_v35 = vshll.u32 %v5879_v20, %v2812_v21  ;;  %vm1030_vm9 = vc.u32 %v5904_v9, %v5906_v30 }
 0x1dd   : > { %v2815_v1 = vshrl.u32 %v2797_v29, %v2813_v49  ;;  %v2818_v28 = vadd.s32 127, %v2817_v10  ;;  %v2830_v57 = vsel %vm5918_vm7, 0, %v2828_v31  ;;  %v1031_v22 = vadd.s32 1, %v5907_v59 }
 0x1de   : > { %v2637_v56 = vand.u32 2147483647, %v5877_v38  ;;  %vm2648_vm11 = vcmp.gt.s32.totalorder %v2647_v41, 0  ;;  %v1028_v55 = vmul.u32 %v1021_v51, %v1012_v34  ;;  %vm1173_vm12 = vcmp.eq.s32.totalorder %v5867_v11, 0 }
 0x1df   : > { %v2816_v60 = vor.u32 %v2815_v1, %v2814_v35  ;;  %v2819_v48 = vshll.u32 %v2818_v28, 23  ;;  %v2649_v58 = vsel %vm2648_vm11, %v2647_v41, 0  ;;  %vm1176_vm10 = vcmp.eq.s32.totalorder %v5867_v11, 2 }
 0x1e0   : > { %v4801_v42 = vpop.eup %4800  ;;  %v1032_v20 = vsel %vm1030_vm9, %v1031_v22, %v5907_v59  ;;  %v2651_v46 = vand.u32 31, %v2649_v58  ;;  %v5940_v37 = vadd.f32 %v5937_v54, %v4501_v3  ;;  %v5942_v51 = vadd.s32 3, %v2830_v57 }
 0x1e1   : > { %v4803_v32 = vpop.eup %4802  ;;  %v1177_v47 = vxor.u32 2147483648, %v4801_v42  ;;  %v2820_v62 = vor.u32 4788187, %v2819_v48  ;;  %v1033_v33 = vadd.s32 %v1032_v20, %v1028_v55  ;;  %v2644_v50 = vand.u32 8388607, %v2637_v56 }
 0x1e2   : > { %v1174_v36 = vxor.u32 2147483648, %v4803_v32  ;;  %v2652_v52 = vsub.s32 32, %v2651_v46  ;;  %v2823_v17 = vcvt.s32.f32 %v2816_v60  ;;  %v2654_v4 = vshll.u32 %v4989_v8, %v2651_v46 }
 0x1e3   : > { %v1178_v63 = vsel %vm1176_vm10, %v1177_v47, %v4803_v32  ;;  %v2821_v40 = vand.u32 2147483647, %v2820_v62  ;;  %v1034_v23 = vadd.s32 536870912, %v1033_v33  ;;  %v2645_v0 = vor.u32 8388608, %v2644_v50 }
 0x1e4   : > { %v1175_v5 = vsel %vm1173_vm12, %v4801_v42, %v1174_v36  ;;  %v2655_v44 = vshrl.u32 %v4990_v12, %v2652_v52  ;;  %v2658_v24 = vshrl.u32 %v4991_v14, %v2652_v52  ;;  %v2661_v26 = vshrl.u32 %v4992_v16, %v2652_v52 }
 0x1e5   : > { %v1179_v15 = vsel %vm1172_vm6, %v1175_v5, %v1178_v63  ;;  %v2824_v7 = vmul.f32 %v2823_v17, %v2821_v40  ;;  %v5953_v43 = vshrl.u32 %v1034_v23, 30  ;;  %v2650_v27 = vshrl.u32 %v2649_v58, 5  ;;  %v4525_v17 = vpop.f32.mrf.mxu1 }
 0x1e6   : > { %v1180_v19 = vsel %vm1169_vm8, nan, %v1179_v15  ;;  %v2657_v61 = vshll.u32 %v4990_v12, %v2651_v46  ;;  %v2656_v53 = vor.u32 %v2655_v44, %v2654_v4  ;;  %v2660_v11 = vshll.u32 %v4991_v14, %v2651_v46 }
 0x1e7   : > { %3891 = vst.msk [vmem:[%s5437_s12 + $0x28] sm:$0xff] %vm3885_vm0, %v1180_v19  ;;  %v2825_v21 = vxor.u32 2147483648, %v2824_v7  ;;  %v1036_v59 = vshll.u32 %v5953_v43, 30  ;;  %v2663_v29 = vshll.u32 %v4992_v16, %v2651_v46  ;;  %v2664_v49 = vshrl.u32 %v4993_v18, %v2652_v52 }
 0x1e8   : > { %v2666_v10 = vshll.u32 %v4993_v18, %v2651_v46  ;;  %v2667_v13 = vshrl.u32 %v4994_v25, %v2652_v52  ;;  %v2659_v41 = vor.u32 %v2658_v24, %v2657_v61  ;;  %v2662_v35 = vor.u32 %v2661_v26, %v2660_v11 }
 0x1e9   : > { %v2826_v31 = vsel %vm2743_vm15, %v2825_v21, %v2824_v7  ;;  %v5969_v34 = vsub.s32 %v1033_v33, %v1036_v59  ;;  %v2665_v28 = vor.u32 %v2664_v49, %v2663_v29  ;;  %v1285_v22 = vand.u32 2147483647, %v5940_v37 }
 0x1ea   : > { %v2829_v1 = vsel %vm5918_vm7, %v5740_v6, %v2826_v31  ;;  %v2668_v57 = vor.u32 %v2667_v13, %v2666_v10  ;;  %v2653_v60 = vshrl.u32 %v4989_v8, %v2652_v52  ;;  %v1288_v48 = vand.u32 2139095040, %v5940_v37 }
 0x1eb   : > { %4804 = vcosq.f32 %v2829_v1  ;;  %v1039_v3 = vsub.s32 0, %v5969_v34  ;;  %vm975_vm13 = vcmp.lt.s32.totalorder %v5803_v2, 0  ;;  %vm2669_vm14 = vcmp.lt.s32.totalorder %v2650_v27, 1 }
 0x1ec   : > { %4806 = vsinq.f32 %v2829_v1  ;;  %vm2671_vm15 = vcmp.lt.s32.totalorder %v2650_v27, 3  ;;  %vm2672_vm1 = vcmp.lt.s32.totalorder %v2650_v27, 4  ;;  %v2677_v58 = vsel %vm2669_vm14, %v2656_v53, %v2659_v41 }
 0x1ed   : > { %v4315_v39 = vmin.u32 %v1039_v3, %v5969_v34  ;;  %v2674_v55 = vsel %vm2672_vm1, %v2662_v35, 2102212464  ;;  %v2678_v42 = vsel %vm2672_vm1, %v2665_v28, 920167782  ;;  %v2681_v46 = vsel %vm2669_vm14, %v2659_v41, %v2662_v35 }
 0x1ee   : > { %v2679_v20 = vsel %vm2671_vm15, %v2662_v35, %v2678_v42  ;;  %v2682_v32 = vsel %vm2672_vm1, %v2668_v57, 1326507024  ;;  %v2685_v47 = vshll.u32 %v2645_v0, 8  ;;  %v1059_v33 = vsub.s32 4, %v5953_v43 }
 0x1ef   : > { %v1041_v62 = vclz %v4315_v39  ;;  %vm2670_vm2 = vcmp.lt.s32.totalorder %v2650_v27, 2  ;;  %v2673_v36 = vsel %vm2669_vm14, %v2653_v60, %v2656_v53  ;;  %v2675_v50 = vsel %vm2671_vm15, %v2659_v41, %v2674_v55 }
 0x1f0   : > { %v2680_v52 = vsel %vm2670_vm2, %v2677_v58, %v2679_v20  ;;  %v2683_v63 = vsel %vm2671_vm15, %v2665_v28, %v2682_v32  ;;  %v1289_v40 = vshrl.u32 %v1288_v48, 23  ;;  %vm5989_vm3 = vcmp.le.f32.partialorder %v973_v45, 0.7853982 }
 0x1f1   : > { %v4316_v23 = vadd.s32 4294967294, %v1041_v62  ;;  %v2684_v5 = vsel %vm2670_vm2, %v2681_v46, %v2683_v63  ;;  %v5984_v4 = vmul.u32.u64.low %v2685_v47, %v2680_v52  ;;  %v5985_v44 = vmul.u32.u64.high %v2685_v47, %v2680_v52, %v5984_v4 }
 0x1f2   : > { %v5993_v15 = vmul.u32.u64.low %v2685_v47, %v2684_v5  ;;  %v5994_v7 = vmul.u32.u64.high %v2685_v47, %v2684_v5, %v5993_v15  ;;  %v4326_v26 = vadd.s32 4294967169, %v1289_v40  ;;  %v2835_v19 = vand.u32 3, %v5942_v51 }
 0x1f3   : > { %vm4317_vm4 = vcmp.lt.s32.totalorder %v4316_v23, 0  ;;  %v2676_v0 = vsel %vm2670_vm2, %v2673_v36, %v2675_v50  ;;  %v5998_v27 = vadd.f32 %v5937_v54, %v4525_v17  ;;  %v1029_v61 = vadd.s32 %v5906_v30, %v5904_v9 }
 0x1f4   : > { %v1044_v21 = vsel %vm4317_vm4, 0, %v4316_v23  ;;  %v6004_v45 = vand.u32 8388607, %v1285_v22  ;;  %v1295_v59 = vadd.s32 1, %v4326_v26  ;;  %vm2833_vm5 = vweird.f32 %v5740_v6 }
 0x1f5   : > { %v1045_v53 = vsub.s32 32, %v1044_v21  ;;  %v1049_v11 = vsub.s32 4294967266, %v1044_v21  ;;  %v1060_v51 = vsel %vm975_vm13, %v1059_v33, %v5953_v43  ;;  %v2695_v29 = vadd.s32 1, %v5985_v44 }
 0x1f6   : > { %v1046_v49 = vshll.u32 %v5969_v34, %v1044_v21  ;;  %v2692_v10 = vmul.u32 %v2685_v47, %v2676_v0  ;;  %vm2694_vm6 = vc.u32 %v5994_v7, %v5984_v4  ;;  %vm1296_vm7 = vcmp.gt.s32.totalorder %v1295_v59, 0 }
 0x1f7   : > { %v1047_v9 = vshrl.u32 %v1029_v61, %v1045_v53  ;;  %v1050_v30 = vadd.s32 127, %v1049_v11  ;;  %v2696_v13 = vsel %vm2694_vm6, %v2695_v29, %v5985_v44  ;;  %v1297_v31 = vsel %vm1296_vm7, %v1295_v59, 0 }
 0x1f8   : > { %v4805_v41 = vpop.eup %4804  ;;  %vm2836_vm8 = vcmp.lt.s32.totalorder %v2835_v19, 2  ;;  %v1062_v35 = vsel %vm5989_vm3, 0, %v1060_v51  ;;  %v2697_v1 = vadd.s32 %v2696_v13, %v2692_v10  ;;  %v1299_v43 = vand.u32 31, %v1297_v31 }
 0x1f9   : > { %v4807_v28 = vpop.eup %4806  ;;  %vm2837_vm9 = vcmp.eq.s32.totalorder %v2835_v19, 0  ;;  %v2841_v57 = vxor.u32 2147483648, %v4805_v41  ;;  %v1048_v34 = vor.u32 %v1047_v9, %v1046_v49  ;;  %v1051_v3 = vshll.u32 %v1050_v30, 23 }
 0x1fa   : > { %v2838_v60 = vxor.u32 2147483648, %v4807_v28  ;;  %vm2840_vm11 = vcmp.eq.s32.totalorder %v2835_v19, 2  ;;  %v2698_v48 = vadd.s32 536870912, %v2697_v1  ;;  %v1300_v39 = vsub.s32 32, %v1299_v43 }
 0x1fb   : > { %v2842_v55 = vsel %vm2840_vm11, %v2841_v57, %v4807_v28  ;;  %v1052_v58 = vor.u32 4788187, %v1051_v3  ;;  %v6016_v42 = vadd.s32 3, %v1062_v35  ;;  %v1293_v20 = vor.u32 8388608, %v6004_v45 }
 0x1fc   : > { %v2839_v46 = vsel %vm2837_vm9, %v4805_v41, %v2838_v60  ;;  %v2699_v32 = vshrl.u32 %v2698_v48, 30  ;;  %v2949_v47 = vand.u32 2147483647, %v5998_v27  ;;  %v2952_v62 = vand.u32 2139095040, %v5998_v27 }
 0x1fd   : > { %v2843_v33 = vsel %vm2836_vm8, %v2839_v46, %v2842_v55  ;;  %v1053_v36 = vand.u32 2147483647, %v1052_v58  ;;  %v1055_v50 = vcvt.s32.f32 %v1048_v34  ;;  %v1303_v52 = vshrl.u32 %v4990_v12, %v1300_v39 }
 0x1fe   : > { %v2844_v63 = vsel %vm2833_vm5, nan, %v2843_v33  ;;  %v6026_v40 = vadd.s32 %v5984_v4, %v5994_v7  ;;  %v2700_v17 = vshll.u32 %v2699_v32, 30  ;;  %v1306_v23 = vshrl.u32 %v4991_v14, %v1300_v39 }
 0x1ff   : > { %3907 = vst.msk [vmem:[%s5437_s12 + $0xa8] sm:$0xff] %vm3885_vm0, %v2844_v63  ;;  %v1056_v5 = vmul.f32 %v1055_v50, %v1053_v36  ;;  %v1298_v44 = vshrl.u32 %v1297_v31, 5  ;;  %v1302_v15 = vshll.u32 %v4989_v8, %v1299_v43  ;;  %v1309_v26 = vshrl.u32 %v4992_v16, %v1300_v39 }
 0x200   : > { %v6033_v19 = vsub.s32 %v2697_v1, %v2700_v17  ;;  %v1305_v0 = vshll.u32 %v4990_v12, %v1299_v43  ;;  %v1308_v6 = vshll.u32 %v4991_v14, %v1299_v43  ;;  %v1312_v4 = vshrl.u32 %v4993_v18, %v1300_v39 }
 0x201   : > { %v1057_v7 = vxor.u32 2147483648, %v1056_v5  ;;  %v1304_v61 = vor.u32 %v1303_v52, %v1302_v15  ;;  %v1311_v21 = vshll.u32 %v4992_v16, %v1299_v43  ;;  %v1315_v45 = vshrl.u32 %v4994_v25, %v1300_v39 }
 0x202   : > { %vm2639_vm12 = vcmp.lt.s32.totalorder %v5877_v38, 0  ;;  %v2703_v59 = vsub.s32 0, %v6033_v19  ;;  %v1307_v53 = vor.u32 %v1306_v23, %v1305_v0  ;;  %v1310_v11 = vor.u32 %v1309_v26, %v1308_v6 }
 0x203   : > { %v1314_v51 = vshll.u32 %v4993_v18, %v1299_v43  ;;  %v1058_v29 = vsel %vm975_vm13, %v1057_v7, %v1056_v5  ;;  %v1313_v49 = vor.u32 %v1312_v4, %v1311_v21  ;;  %v1333_v10 = vshll.u32 %v1293_v20, 8 }
 0x204   : > { %v2953_v9 = vshrl.u32 %v2952_v62, 23  ;;  %v1061_v30 = vsel %vm5989_vm3, %v5803_v2, %v1058_v29  ;;  %v4379_v13 = vmin.u32 %v2703_v59, %v6033_v19  ;;  %v1301_v31 = vshrl.u32 %v4989_v8, %v1300_v39 }
 0x205   : > { %v1316_v41 = vor.u32 %v1315_v45, %v1314_v51  ;;  %4808 = vcosq.f32 %v1061_v30  ;;  %v2723_v35 = vsub.s32 4, %v2699_v32  ;;  %vm1317_vm10 = vcmp.lt.s32.totalorder %v1298_v44, 1 }
 0x206   : > { %vm1320_vm14 = vcmp.lt.s32.totalorder %v1298_v44, 4  ;;  %4810 = vsinq.f32 %v1061_v30  ;;  %v2705_v1 = vclz %v4379_v13  ;;  %v1325_v28 = vsel %vm1317_vm10, %v1304_v61, %v1307_v53 }
 0x207   : > { %v1322_v43 = vsel %vm1320_vm14, %v1310_v11, 2102212464  ;;  %vm1318_vm13 = vcmp.lt.s32.totalorder %v1298_v44, 2  ;;  %vm1319_vm15 = vcmp.lt.s32.totalorder %v1298_v44, 3  ;;  %v1326_v57 = vsel %vm1320_vm14, %v1313_v49, 920167782 }
 0x208   : > { %v1329_v34 = vsel %vm1317_vm10, %v1307_v53, %v1310_v11  ;;  %v4380_v3 = vadd.s32 4294967294, %v2705_v1  ;;  %v1321_v24 = vsel %vm1317_vm10, %v1301_v31, %v1304_v61  ;;  %v1327_v60 = vsel %vm1319_vm15, %v1310_v11, %v1326_v57 }
 0x209   : > { %v1330_v48 = vsel %vm1320_vm14, %v1316_v41, 1326507024  ;;  %v1323_v55 = vsel %vm1319_vm15, %v1307_v53, %v1322_v43  ;;  %v1328_v39 = vsel %vm1318_vm13, %v1325_v28, %v1327_v60  ;;  %v4390_v20 = vadd.s32 4294967169, %v2953_v9 }
 0x20a   : > { %v1331_v58 = vsel %vm1319_vm15, %v1313_v49, %v1330_v48  ;;  %vm4381_vm1 = vcmp.lt.s32.totalorder %v4380_v3, 0  ;;  %v6052_v62 = vmul.u32.u64.low %v1333_v10, %v1328_v39  ;;  %v6053_v33 = vmul.u32.u64.high %v1333_v10, %v1328_v39, %v6052_v62 }
 0x20b   : > { %v1332_v46 = vsel %vm1318_vm13, %v1329_v34, %v1331_v58  ;;  %v2708_v36 = vsel %vm4381_vm1, 0, %v4380_v3  ;;  %v2724_v50 = vsel %vm2639_vm12, %v2723_v35, %v2699_v32  ;;  %v1324_v5 = vsel %vm1318_vm13, %v1321_v24, %v1323_v55 }
 0x20c   : > { %v6058_v52 = vmul.u32.u64.low %v1333_v10, %v1332_v46  ;;  %v6059_v63 = vmul.u32.u64.high %v1333_v10, %v1332_v46, %v6058_v52  ;;  %v2709_v17 = vsub.s32 32, %v2708_v36  ;;  %v2713_v23 = vsub.s32 4294967266, %v2708_v36 }
 0x20d   : > { %v2959_v15 = vadd.s32 1, %v4390_v20  ;;  %v1067_v26 = vand.u32 3, %v6016_v42  ;;  %vm6065_vm2 = vcmp.le.f32.partialorder %v2637_v56, 0.7853982  ;;  %v2710_v6 = vshll.u32 %v6033_v19, %v2708_v36  ;;  %v428_v36 = vpop.f32.mrf.mxu0 }
 0x20e   : > { %v2711_v32 = vshrl.u32 %v6026_v40, %v2709_v17  ;;  %v2714_v4 = vadd.s32 127, %v2713_v23  ;;  %v1343_v7 = vadd.s32 1, %v6053_v33  ;;  %v2726_v44 = vsel %vm6065_vm2, 0, %v2724_v50 }
 0x20f   : > { %vm2960_vm3 = vcmp.gt.s32.totalorder %v2959_v15, 0  ;;  %v1340_v61 = vmul.u32 %v1333_v10, %v1324_v5  ;;  %vm1342_vm4 = vc.u32 %v6059_v63, %v6052_v62  ;;  %v2956_v19 = vand.u32 8388607, %v2949_v47 }
 0x210   : > { %v2961_v42 = vsel %vm2960_vm3, %v2959_v15, 0  ;;  %v2712_v56 = vor.u32 %v2711_v32, %v2710_v6  ;;  %v2715_v21 = vshll.u32 %v2714_v4, 23  ;;  %v1344_v45 = vsel %vm1342_vm4, %v1343_v7, %v6053_v33 }
 0x211   : > { %vm1065_vm5 = vweird.f32 %v5803_v2  ;;  %v1345_v40 = vadd.s32 %v1344_v45, %v1340_v61  ;;  %v2963_v59 = vand.u32 31, %v2961_v42  ;;  %vm1068_vm6 = vcmp.lt.s32.totalorder %v1067_v26, 2 }
 0x212   : > { %v4809_v53 = vpop.eup %4808  ;;  %vm1069_vm7 = vcmp.eq.s32.totalorder %v1067_v26, 0  ;;  %vm1072_vm8 = vcmp.eq.s32.totalorder %v1067_v26, 2  ;;  %v2716_v11 = vor.u32 4788187, %v2715_v21  ;;  %v6080_v49 = vadd.s32 3, %v2726_v44 }
 0x213   : > { %v4811_v51 = vpop.eup %4810  ;;  %v1073_v29 = vxor.u32 2147483648, %v4809_v53  ;;  %v1346_v10 = vadd.s32 536870912, %v1345_v40  ;;  %v2964_v9 = vsub.s32 32, %v2963_v59  ;;  %v2719_v31 = vcvt.s32.f32 %v2712_v56 }
 0x214   : > { %v1070_v30 = vxor.u32 2147483648, %v4811_v51  ;;  %v2717_v13 = vand.u32 2147483647, %v2716_v11  ;;  %v2957_v41 = vor.u32 8388608, %v2956_v19  ;;  %v2966_v43 = vshll.u32 %v4989_v8, %v2963_v59 }
 0x215   : > { %v1074_v35 = vsel %vm1072_vm8, %v1073_v29, %v4811_v51  ;;  %v1347_v1 = vshrl.u32 %v1346_v10, 30  ;;  %v2967_v28 = vshrl.u32 %v4990_v12, %v2964_v9  ;;  %v2970_v3 = vshrl.u32 %v4991_v14, %v2964_v9 }
 0x216   : > { %v1071_v57 = vsel %vm1069_vm7, %v4809_v53, %v1070_v30  ;;  %v2720_v34 = vmul.f32 %v2719_v31, %v2717_v13  ;;  %v2973_v24 = vshrl.u32 %v4992_v16, %v2964_v9  ;;  %v2962_v55 = vshrl.u32 %v2961_v42, 5  ;;  %v508_v31 = vpop.f32.mrf.mxu1 }
 0x217   : > { %v1075_v60 = vsel %vm1068_vm6, %v1071_v57, %v1074_v35  ;;  %v1348_v48 = vshll.u32 %v1347_v1, 30  ;;  %v2969_v39 = vshll.u32 %v4990_v12, %v2963_v59  ;;  %vm1287_vm9 = vcmp.lt.s32.totalorder %v5940_v37, 0 }
 0x218   : > { %v1076_v58 = vsel %vm1065_vm5, nan, %v1075_v60  ;;  %v2721_v20 = vxor.u32 2147483648, %v2720_v34  ;;  %v2968_v46 = vor.u32 %v2967_v28, %v2966_v43  ;;  %v2972_v33 = vshll.u32 %v4991_v14, %v2963_v59 }
 0x219   : > { %3890 = vst.msk [vmem:[%s5437_s12 + $0x20] sm:$0xff] %vm3885_vm0, %v1076_v58  ;;  %v6095_v50 = vsub.s32 %v1345_v40, %v1348_v48  ;;  %v2971_v52 = vor.u32 %v2970_v3, %v2969_v39  ;;  %v2975_v17 = vshll.u32 %v4992_v16, %v2963_v59  ;;  %v2976_v23 = vshrl.u32 %v4993_v18, %v2964_v9 }
 0x21a   : > { %v2722_v2 = vsel %vm2639_vm12, %v2721_v20, %v2720_v34  ;;  %v2974_v5 = vor.u32 %v2973_v24, %v2972_v33  ;;  %v2978_v15 = vshll.u32 %v4993_v18, %v2963_v59  ;;  %v2979_v26 = vshrl.u32 %v4994_v25, %v2964_v9 }
 0x21b   : > { %v2725_v6 = vsel %vm6065_vm2, %v5877_v38, %v2722_v2  ;;  %v1351_v32 = vsub.s32 0, %v6095_v50  ;;  %v2977_v4 = vor.u32 %v2976_v23, %v2975_v17  ;;  %v6108_v7 = vadd.f32 %v5937_v54, %v428_v36 }
 0x21c   : > { %4812 = vcosq.f32 %v2725_v6  ;;  %v2965_v44 = vshrl.u32 %v4989_v8, %v2964_v9  ;;  %v2980_v61 = vor.u32 %v2979_v26, %v2978_v15  ;;  %vm2981_vm11 = vcmp.lt.s32.totalorder %v2962_v55, 1 }
 0x21d   : > { %4814 = vsinq.f32 %v2725_v6  ;;  %v4327_v42 = vmin.u32 %v1351_v32, %v6095_v50  ;;  %v1371_v56 = vsub.s32 4, %v1347_v1  ;;  %vm2984_vm12 = vcmp.lt.s32.totalorder %v2962_v55, 4 }
 0x21e   : > { %v2986_v21 = vsel %vm2984_vm12, %v2974_v5, 2102212464  ;;  %v2989_v45 = vsel %vm2981_vm11, %v2968_v46, %v2971_v52  ;;  %v2990_v0 = vsel %vm2984_vm12, %v2977_v4, 920167782  ;;  %v2997_v19 = vshll.u32 %v2957_v41, 8 }
 0x21f   : > { %v1353_v40 = vclz %v4327_v42  ;;  %vm2983_vm10 = vcmp.lt.s32.totalorder %v2962_v55, 3  ;;  %v2985_v59 = vsel %vm2981_vm11, %v2965_v44, %v2968_v46  ;;  %v2993_v53 = vsel %vm2981_vm11, %v2971_v52, %v2974_v5 }
 0x220   : > { %vm2982_vm14 = vcmp.lt.s32.totalorder %v2962_v55, 2  ;;  %v2987_v11 = vsel %vm2983_vm10, %v2971_v52, %v2986_v21  ;;  %v2991_v51 = vsel %vm2983_vm10, %v2974_v5, %v2990_v0  ;;  %v2994_v29 = vsel %vm2984_vm12, %v2980_v61, 1326507024 }
 0x221   : > { %v4328_v10 = vadd.s32 4294967294, %v1353_v40  ;;  %v1372_v9 = vsel %vm1287_vm9, %v1371_v56, %v1347_v1  ;;  %v2992_v30 = vsel %vm2982_vm14, %v2989_v45, %v2991_v51  ;;  %v2995_v13 = vsel %vm2983_vm10, %v2977_v4, %v2994_v29 }
 0x222   : > { %v2988_v35 = vsel %vm2982_vm14, %v2985_v59, %v2987_v11  ;;  %v2996_v43 = vsel %vm2982_vm14, %v2993_v53, %v2995_v13  ;;  %v6114_v28 = vmul.u32.u64.low %v2997_v19, %v2992_v30  ;;  %v6115_v57 = vmul.u32.u64.high %v2997_v19, %v2992_v30, %v6114_v28 }
 0x223   : > { %vm4329_vm13 = vcmp.lt.s32.totalorder %v4328_v10, 0  ;;  %v6118_v41 = vmul.u32.u64.low %v2997_v19, %v2996_v43  ;;  %v6119_v34 = vmul.u32.u64.high %v2997_v19, %v2996_v43, %v6118_v41  ;;  %v1184_v3 = vand.u32 2139095040, %v6108_v7 }
 0x224   : > { %v2731_v24 = vand.u32 3, %v6080_v49  ;;  %vm6125_vm15 = vcmp.le.f32.partialorder %v1285_v22, 0.7853982  ;;  %v1356_v60 = vsel %vm4329_vm13, 0, %v4328_v10  ;;  %v6130_v48 = vadd.f32 %v5937_v54, %v508_v31 }
 0x225   : > { %v1341_v55 = vadd.s32 %v6052_v62, %v6059_v63  ;;  %v1357_v39 = vsub.s32 32, %v1356_v60  ;;  %v1361_v58 = vsub.s32 4294967266, %v1356_v60  ;;  %v1185_v20 = vshrl.u32 %v1184_v3, 23 }
 0x226   : > { %v1374_v46 = vsel %vm6125_vm15, 0, %v1372_v9  ;;  %v3004_v49 = vmul.u32 %v2997_v19, %v2988_v35  ;;  %v3007_v33 = vadd.s32 1, %v6115_v57  ;;  %v1181_v22 = vand.u32 2147483647, %v6108_v7 }
 0x227   : > { %v1358_v36 = vshll.u32 %v6095_v50, %v1356_v60  ;;  %v1359_v52 = vshrl.u32 %v1341_v55, %v1357_v39  ;;  %v1362_v17 = vadd.s32 127, %v1361_v58  ;;  %vm3006_vm1 = vc.u32 %v6119_v34, %v6114_v28 }
 0x228   : > { %vm2732_vm2 = vcmp.lt.s32.totalorder %v2731_v24, 2  ;;  %v3008_v62 = vsel %vm3006_vm1, %v3007_v33, %v6115_v57  ;;  %v4322_v63 = vadd.s32 4294967169, %v1185_v20  ;;  %v2848_v23 = vand.u32 2139095040, %v6130_v48 }
 0x229   : > { %v4813_v2 = vpop.eup %4812  ;;  %vm2733_vm3 = vcmp.eq.s32.totalorder %v2731_v24, 0  ;;  %v1360_v5 = vor.u32 %v1359_v52, %v1358_v36  ;;  %v1363_v15 = vshll.u32 %v1362_v17, 23  ;;  %v3009_v26 = vadd.s32 %v3008_v62, %v3004_v49 }
 0x22a   : > { %v4815_v6 = vpop.eup %4814  ;;  %vm2736_vm4 = vcmp.eq.s32.totalorder %v2731_v24, 2  ;;  %v2737_v32 = vxor.u32 2147483648, %v4813_v2  ;;  %v1378_v50 = vadd.s32 3, %v1374_v46  ;;  %v1191_v4 = vadd.s32 1, %v4322_v63 }
 0x22b   : > { %v2734_v44 = vxor.u32 2147483648, %v4815_v6  ;;  %v1364_v61 = vor.u32 4788187, %v1363_v15  ;;  %v3010_v42 = vadd.s32 536870912, %v3009_v26  ;;  %v1188_v56 = vand.u32 8388607, %v1181_v22 }
 0x22c   : > { %v2738_v21 = vsel %vm2736_vm4, %v2737_v32, %v4815_v6  ;;  %v1367_v45 = vcvt.s32.f32 %v1360_v5  ;;  %vm1192_vm5 = vcmp.gt.s32.totalorder %v1191_v4, 0  ;;  %v2849_v0 = vshrl.u32 %v2848_v23, 23 }
 0x22d   : > { %v2735_v19 = vsel %vm2733_vm3, %v4813_v2, %v2734_v44  ;;  %v1365_v40 = vand.u32 2147483647, %v1364_v61  ;;  %v3011_v59 = vshrl.u32 %v3010_v42, 30  ;;  %v1193_v53 = vsel %vm1192_vm5, %v1191_v4, 0 }
 0x22e   : > { %vm2729_vm6 = vweird.f32 %v5877_v38  ;;  %v2739_v11 = vsel %vm2732_vm2, %v2735_v19, %v2738_v21  ;;  %v1195_v51 = vand.u32 31, %v1193_v53  ;;  %v6148_v9 = vand.u32 3, %v1378_v50 }
 0x22f   : > { %v2740_v29 = vsel %vm2729_vm6, nan, %v2739_v11  ;;  %v1368_v10 = vmul.f32 %v1367_v45, %v1365_v40  ;;  %vm2951_vm7 = vcmp.lt.s32.totalorder %v5998_v27, 0  ;;  %v3012_v30 = vshll.u32 %v3011_v59, 30 }
 0x230   : > { %3906 = vst.msk [vmem:[%s5437_s12 + $0xa0] sm:$0xff] %vm3885_vm0, %v2740_v29  ;;  %v1189_v13 = vor.u32 8388608, %v1188_v56  ;;  %v1196_v31 = vsub.s32 32, %v1195_v51  ;;  %v2845_v35 = vand.u32 2147483647, %v6130_v48  ;;  %v4386_v43 = vadd.s32 4294967169, %v2849_v0 }
 0x231   : > { %v1369_v57 = vxor.u32 2147483648, %v1368_v10  ;;  %v6154_v41 = vsub.s32 %v3009_v26, %v3012_v30  ;;  %v3035_v38 = vsub.s32 4, %v3011_v59  ;;  %v1194_v3 = vshrl.u32 %v1193_v53, 5 }
 0x232   : > { %v1198_v24 = vshll.u32 %v4989_v8, %v1195_v51  ;;  %v1199_v60 = vshrl.u32 %v4990_v12, %v1196_v31  ;;  %v1201_v55 = vshll.u32 %v4990_v12, %v1195_v51  ;;  %v1202_v39 = vshrl.u32 %v4991_v14, %v1196_v31 }
 0x233   : > { %v1370_v58 = vsel %vm1287_vm9, %v1369_v57, %v1368_v10  ;;  %vm6164_vm8 = vcmp.le.f32.partialorder %v2949_v47, 0.7853982  ;;  %v3015_v46 = vsub.s32 0, %v6154_v41  ;;  %v1204_v49 = vshll.u32 %v4991_v14, %v1195_v51 }
 0x234   : > { %v1205_v33 = vshrl.u32 %v4992_v16, %v1196_v31  ;;  %v1373_v36 = vsel %vm6125_vm15, %v5940_v37, %v1370_v58  ;;  %v1200_v52 = vor.u32 %v1199_v60, %v1198_v24  ;;  %v1207_v17 = vshll.u32 %v4992_v16, %v1195_v51 }
 0x235   : > { %v1208_v62 = vshrl.u32 %v4993_v18, %v1196_v31  ;;  %4816 = vcosq.f32 %v1373_v36  ;;  %v4391_v47 = vmin.u32 %v3015_v46, %v6154_v41  ;;  %v1203_v63 = vor.u32 %v1202_v39, %v1201_v55 }
 0x236   : > { %v1206_v23 = vor.u32 %v1205_v33, %v1204_v49  ;;  %4818 = vsinq.f32 %v1373_v36  ;;  %v1210_v5 = vshll.u32 %v4993_v18, %v1195_v51  ;;  %v1211_v15 = vshrl.u32 %v4994_v25, %v1196_v31 }
 0x237   : > { %v1209_v2 = vor.u32 %v1208_v62, %v1207_v17  ;;  %v3005_v1 = vadd.s32 %v6114_v28, %v6119_v34  ;;  %v3017_v26 = vclz %v4391_v47  ;;  %v1229_v6 = vshll.u32 %v1189_v13, 8 }
 0x238   : > { %v2855_v32 = vadd.s32 1, %v4386_v43  ;;  %v3036_v50 = vsel %vm2951_vm7, %v3035_v38, %v3011_v59  ;;  %v1197_v4 = vshrl.u32 %v4989_v8, %v1196_v31  ;;  %v1212_v44 = vor.u32 %v1211_v15, %v1210_v5 }
 0x239   : > { %vm1213_vm9 = vcmp.lt.s32.totalorder %v1194_v3, 1  ;;  %v4392_v61 = vadd.s32 4294967294, %v3017_v26  ;;  %vm1215_vm11 = vcmp.lt.s32.totalorder %v1194_v3, 3  ;;  %vm1216_vm12 = vcmp.lt.s32.totalorder %v1194_v3, 4 }
 0x23a   : > { %v1221_v42 = vsel %vm1213_vm9, %v1200_v52, %v1203_v63  ;;  %v1218_v56 = vsel %vm1216_vm12, %v1206_v23, 2102212464  ;;  %v1222_v21 = vsel %vm1216_vm12, %v1209_v2, 920167782  ;;  %v1225_v45 = vsel %vm1213_vm9, %v1203_v63, %v1206_v23 }
 0x23b   : > { %v1226_v28 = vsel %vm1216_vm12, %v1212_v44, 1326507024  ;;  %vm4393_vm10 = vcmp.lt.s32.totalorder %v4392_v61, 0  ;;  %vm1214_vm14 = vcmp.lt.s32.totalorder %v1194_v3, 2  ;;  %v1223_v34 = vsel %vm1215_vm11, %v1206_v23, %v1222_v21 }
 0x23c   : > { %v1227_v0 = vsel %vm1215_vm11, %v1209_v2, %v1226_v28  ;;  %v3020_v19 = vsel %vm4393_vm10, 0, %v4392_v61  ;;  %v3038_v40 = vsel %vm6164_vm8, 0, %v3036_v50  ;;  %v1224_v59 = vsel %vm1214_vm14, %v1221_v42, %v1223_v34 }
 0x23d   : > { %v1228_v53 = vsel %vm1214_vm14, %v1225_v45, %v1227_v0  ;;  %v3021_v11 = vsub.s32 32, %v3020_v19  ;;  %v3025_v51 = vsub.s32 4294967266, %v3020_v19  ;;  %v1217_v29 = vsel %vm1213_vm9, %v1197_v4, %v1200_v52 }
 0x23e   : > { %v1219_v10 = vsel %vm1215_vm11, %v1203_v63, %v1218_v56  ;;  %v6194_v30 = vmul.u32.u64.low %v1229_v6, %v1228_v53  ;;  %v6195_v13 = vmul.u32.u64.high %v1229_v6, %v1228_v53, %v6194_v30  ;;  %vm1377_vm13 = vweird.f32 %v5940_v37  ;;  %v4504_v53 = vpop.f32.mrf.mxu0 }
 0x23f   : > { %v6197_v31 = vmul.u32.u64.low %v1229_v6, %v1224_v59  ;;  %v6198_v43 = vmul.u32.u64.high %v1229_v6, %v1224_v59, %v6197_v31  ;;  %v3022_v57 = vshll.u32 %v6154_v41, %v3020_v19  ;;  %v3023_v38 = vshrl.u32 %v3005_v1, %v3021_v11 }
 0x240   : > { %v3026_v24 = vadd.s32 127, %v3025_v51  ;;  %vm2856_vm15 = vcmp.gt.s32.totalorder %v2855_v32, 0  ;;  %v3042_v60 = vadd.s32 3, %v3038_v40  ;;  %v1220_v55 = vsel %vm1214_vm14, %v1217_v29, %v1219_v10 }
 0x241   : > { %v2852_v39 = vand.u32 8388607, %v2845_v35  ;;  %v2857_v58 = vsel %vm2856_vm15, %v2855_v32, 0  ;;  %vm1380_vm1 = vcmp.lt.s32.totalorder %v6148_v9, 2  ;;  %v3024_v46 = vor.u32 %v3023_v38, %v3022_v57 }
 0x242   : > { %v3027_v49 = vshll.u32 %v3026_v24, 23  ;;  %v2859_v33 = vand.u32 31, %v2857_v58  ;;  %v4817_v36 = vpop.eup %4816  ;;  %vm1381_vm2 = vcmp.eq.s32.totalorder %v6148_v9, 0  ;;  %vm1384_vm3 = vcmp.eq.s32.totalorder %v6148_v9, 2 }
 0x243   : > { %vm1238_vm4 = vc.u32 %v6195_v13, %v6197_v31  ;;  %v1239_v41 = vadd.s32 1, %v6198_v43  ;;  %v4819_v3 = vpop.eup %4818  ;;  %v1385_v52 = vxor.u32 2147483648, %v4817_v36  ;;  %v1236_v62 = vmul.u32 %v1229_v6, %v1220_v55 }
 0x244   : > { %v3028_v17 = vor.u32 4788187, %v3027_v49  ;;  %v2860_v47 = vsub.s32 32, %v2859_v33  ;;  %v1382_v63 = vxor.u32 2147483648, %v4819_v3  ;;  %v6212_v23 = vand.u32 3, %v3042_v60 }
 0x245   : > { %v1240_v2 = vsel %vm1238_vm4, %v1239_v41, %v6198_v43  ;;  %v2853_v5 = vor.u32 8388608, %v2852_v39  ;;  %v1386_v15 = vsel %vm1384_vm3, %v1385_v52, %v4819_v3  ;;  %v3031_v26 = vcvt.s32.f32 %v3024_v46 }
 0x246   : > { %v3029_v1 = vand.u32 2147483647, %v3028_v17  ;;  %v1241_v32 = vadd.s32 %v1240_v2, %v1236_v62  ;;  %v1383_v50 = vsel %vm1381_vm2, %v4817_v36, %v1382_v63  ;;  %v2858_v4 = vshrl.u32 %v2857_v58, 5  ;;  %v4528_v2 = vpop.f32.mrf.mxu1 }
 0x247   : > { %v2863_v44 = vshrl.u32 %v4990_v12, %v2860_v47  ;;  %v2866_v6 = vshrl.u32 %v4991_v14, %v2860_v47  ;;  %v1387_v61 = vsel %vm1380_vm1, %v1383_v50, %v1386_v15  ;;  %v2869_v21 = vshrl.u32 %v4992_v16, %v2860_v47 }
 0x248   : > { %v3032_v42 = vmul.f32 %v3031_v26, %v3029_v1  ;;  %v1242_v56 = vadd.s32 536870912, %v1241_v32  ;;  %v1388_v45 = vsel %vm1377_vm13, nan, %v1387_v61  ;;  %v2862_v28 = vshll.u32 %v4989_v8, %v2859_v33 }
 0x249   : > { %v2865_v34 = vshll.u32 %v4990_v12, %v2859_v33  ;;  %v2868_v0 = vshll.u32 %v4991_v14, %v2859_v33  ;;  %3893 = vst.msk [vmem:[%s5437_s12 + $0x38] sm:$0xff] %vm3885_vm0, %v1388_v45  ;;  %v2871_v9 = vshll.u32 %v4992_v16, %v2859_v33  ;;  %v2872_v59 = vshrl.u32 %v4993_v18, %v2860_v47 }
 0x24a   : > { %v3033_v19 = vxor.u32 2147483648, %v3032_v42  ;;  %v1243_v40 = vshrl.u32 %v1242_v56, 30  ;;  %v2864_v11 = vor.u32 %v2863_v44, %v2862_v28  ;;  %v2874_v37 = vshll.u32 %v4993_v18, %v2859_v33 }
 0x24b   : > { %v2867_v51 = vor.u32 %v2866_v6, %v2865_v34  ;;  %v2875_v29 = vshrl.u32 %v4994_v25, %v2860_v47  ;;  %v2870_v43 = vor.u32 %v2869_v21, %v2868_v0  ;;  %v2873_v57 = vor.u32 %v2872_v59, %v2871_v9 }
 0x24c   : > { %v3034_v10 = vsel %vm2951_vm7, %v3033_v19, %v3032_v42  ;;  %v1244_v30 = vshll.u32 %v1243_v40, 30  ;;  %v2893_v60 = vshll.u32 %v2853_v5, 8  ;;  %v6239_v55 = vadd.f32 %v5937_v54, %v4504_v53 }
 0x24d   : > { %v3037_v38 = vsel %vm6164_vm8, %v5998_v27, %v3034_v10  ;;  %v2876_v24 = vor.u32 %v2875_v29, %v2874_v37  ;;  %v2861_v58 = vshrl.u32 %v4989_v8, %v2860_v47  ;;  %vm2877_vm5 = vcmp.lt.s32.totalorder %v2858_v4, 1 }
 0x24e   : > { %4820 = vcosq.f32 %v3037_v38  ;;  %v6241_v39 = vsub.s32 %v1241_v32, %v1244_v30  ;;  %vm2878_vm6 = vcmp.lt.s32.totalorder %v2858_v4, 2  ;;  %vm2880_vm7 = vcmp.lt.s32.totalorder %v2858_v4, 4 }
 0x24f   : > { %4822 = vsinq.f32 %v3037_v38  ;;  %v2885_v46 = vsel %vm2877_vm5, %v2864_v11, %v2867_v51  ;;  %vm2879_vm9 = vcmp.lt.s32.totalorder %v2858_v4, 3  ;;  %v2882_v20 = vsel %vm2880_vm7, %v2870_v43, 2102212464 }
 0x250   : > { %v1247_v49 = vsub.s32 0, %v6241_v39  ;;  %v2886_v33 = vsel %vm2880_vm7, %v2873_v57, 920167782  ;;  %v1267_v36 = vsub.s32 4, %v1243_v40  ;;  %v2889_v3 = vsel %vm2877_vm5, %v2867_v51, %v2870_v43 }
 0x251   : > { %v2887_v41 = vsel %vm2879_vm9, %v2870_v43, %v2886_v33  ;;  %v2890_v52 = vsel %vm2880_vm7, %v2876_v24, 1326507024  ;;  %v2881_v62 = vsel %vm2877_vm5, %v2861_v58, %v2864_v11  ;;  %v2883_v5 = vsel %vm2879_vm9, %v2867_v51, %v2882_v20 }
 0x252   : > { %v4323_v17 = vmin.u32 %v1247_v49, %v6241_v39  ;;  %v2888_v63 = vsel %vm2878_vm6, %v2885_v46, %v2887_v41  ;;  %v2891_v47 = vsel %vm2879_vm9, %v2873_v57, %v2890_v52  ;;  %vm1183_vm8 = vcmp.lt.s32.totalorder %v6108_v7, 0 }
 0x253   : > { %v2892_v15 = vsel %vm2878_vm6, %v2889_v3, %v2891_v47  ;;  %v6248_v1 = vmul.u32.u64.low %v2893_v60, %v2888_v63  ;;  %v6249_v26 = vmul.u32.u64.high %v2893_v60, %v2888_v63, %v6248_v1  ;;  %v6257_v6 = vadd.f32 %v5937_v54, %v4528_v2  ;;  %v438_v63 = vpop.f32.mrf.mxu0 }
 0x254   : > { %v1249_v32 = vclz %v4323_v17  ;;  %v6253_v50 = vmul.u32.u64.low %v2893_v60, %v2892_v15  ;;  %v6254_v44 = vmul.u32.u64.high %v2893_v60, %v2892_v15, %v6253_v50  ;;  %vm6261_vm11 = vcmp.le.f32.partialorder %v1181_v22, 0.7853982 }
 0x255   : > { %v2884_v56 = vsel %vm2878_vm6, %v2881_v62, %v2883_v5  ;;  %v1496_v21 = vand.u32 2139095040, %v6239_v55  ;;  %vm3044_vm12 = vcmp.lt.s32.totalorder %v6212_v23, 2  ;;  %vm3045_vm10 = vcmp.eq.s32.totalorder %v6212_v23, 0 }
 0x256   : > { %v4324_v42 = vadd.s32 4294967294, %v1249_v32  ;;  %v1268_v45 = vsel %vm1183_vm8, %v1267_v36, %v1243_v40  ;;  %v2903_v54 = vadd.s32 1, %v6249_v26  ;;  %v1493_v28 = vand.u32 2147483647, %v6239_v55 }
 0x257   : > { %vm3041_vm14 = vweird.f32 %v5998_v27  ;;  %vm3048_vm13 = vcmp.eq.s32.totalorder %v6212_v23, 2  ;;  %v1237_v22 = vadd.s32 %v6197_v31, %v6195_v13  ;;  %v1497_v4 = vshrl.u32 %v1496_v21, 23  ;;  %v6313_v27 = vld [vmem:[%s7692_s2] ss:$0 sm:$0xff] }
 0x258   : > { %vm4325_vm15 = vcmp.lt.s32.totalorder %v4324_v42, 0  ;;  %v2900_v0 = vmul.u32 %v2893_v60, %v2884_v56  ;;  %vm2902_vm1 = vc.u32 %v6254_v44, %v6248_v1  ;;  %v3160_v19 = vand.u32 2139095040, %v6257_v6 }
 0x259   : > { %v1252_v34 = vsel %vm4325_vm15, 0, %v4324_v42  ;;  %v1270_v59 = vsel %vm6261_vm11, 0, %v1268_v45  ;;  %v2904_v53 = vsel %vm2902_vm1, %v2903_v54, %v6249_v26  ;;  %v4334_v37 = vadd.s32 4294967169, %v1497_v4 }
 0x25a   : > { %v1253_v40 = vsub.s32 32, %v1252_v34  ;;  %v1257_v9 = vsub.s32 4294967266, %v1252_v34  ;;  %v2905_v51 = vadd.s32 %v2904_v53, %v2900_v0  ;;  %v1500_v13 = vand.u32 8388607, %v1493_v28 }
 0x25b   : > { %v4821_v11 = vpop.eup %4820  ;;  %v3157_v31 = vand.u32 2147483647, %v6257_v6  ;;  %v1254_v30 = vshll.u32 %v6241_v39, %v1252_v34  ;;  %v1503_v60 = vadd.s32 1, %v4334_v37  ;;  %v3161_v58 = vshrl.u32 %v3160_v19, 23 }
 0x25c   : > { %v4823_v29 = vpop.eup %4822  ;;  %v3049_v10 = vxor.u32 2147483648, %v4821_v11  ;;  %v1255_v43 = vshrl.u32 %v1237_v22, %v1253_v40  ;;  %v1258_v57 = vadd.s32 127, %v1257_v9  ;;  %v2906_v24 = vadd.s32 536870912, %v2905_v51 }
 0x25d   : > { %v3046_v38 = vxor.u32 2147483648, %v4823_v29  ;;  %v1274_v33 = vadd.s32 3, %v1270_v59  ;;  %v1501_v3 = vor.u32 8388608, %v1500_v13  ;;  %vm1504_vm2 = vcmp.gt.s32.totalorder %v1503_v60, 0 }
 0x25e   : > { %v3050_v46 = vsel %vm3048_vm13, %v3049_v10, %v4823_v29  ;;  %v1256_v49 = vor.u32 %v1255_v43, %v1254_v30  ;;  %v1259_v20 = vshll.u32 %v1258_v57, 23  ;;  %v6291_v41 = vshrl.u32 %v2906_v24, 30 }
 0x25f   : > { %v3047_v36 = vsel %vm3045_vm10, %v4821_v11, %v3046_v38  ;;  %v1505_v17 = vsel %vm1504_vm2, %v1503_v60, 0  ;;  %v6297_v62 = vand.u32 8388607, %v3157_v31  ;;  %v4398_v5 = vadd.s32 4294967169, %v3161_v58 }
 0x260   : > { %v3051_v39 = vsel %vm3044_vm12, %v3047_v36, %v3050_v46  ;;  %v1260_v52 = vor.u32 4788187, %v1259_v20  ;;  %v2908_v2 = vshll.u32 %v6291_v41, 30  ;;  %v1263_v26 = vcvt.s32.f32 %v1256_v49 }
 0x261   : > { %v3052_v47 = vsel %vm3041_vm14, nan, %v3051_v39  ;;  %v1507_v32 = vand.u32 31, %v1505_v17  ;;  %v6304_v23 = vand.u32 3, %v1274_v33  ;;  %v2901_v50 = vadd.s32 %v6248_v1, %v6254_v44 }
 0x262   : > { %3909 = vst.msk [vmem:[%s5437_s12 + $0xb8] sm:$0xff] %vm3885_vm0, %v3052_v47  ;;  %v1261_v15 = vand.u32 2147483647, %v1260_v52  ;;  %v6308_v42 = vsub.s32 %v2905_v51, %v2908_v2  ;;  %v6316_v56 = vadd.f32 %v6313_v27, %v438_v63  ;;  %v6318_v54 = vshll.u32 %v1501_v3, 8 }
 0x263   : > { %v1508_v45 = vsub.s32 32, %v1507_v32  ;;  %v3165_v22 = vor.u32 8388608, %v6297_v62  ;;  %v1506_v34 = vshrl.u32 %v1505_v17, 5  ;;  %v1510_v1 = vshll.u32 %v4989_v8, %v1507_v32 }
 0x264   : > { %v1264_v21 = vmul.f32 %v1263_v26, %v1261_v15  ;;  %v2911_v4 = vsub.s32 0, %v6308_v42  ;;  %v3167_v44 = vadd.s32 1, %v4398_v5  ;;  %v1513_v40 = vshll.u32 %v4990_v12, %v1507_v32 }
 0x265   : > { %v1511_v19 = vshrl.u32 %v4990_v12, %v1508_v45  ;;  %v1514_v9 = vshrl.u32 %v4991_v14, %v1508_v45  ;;  %v1516_v53 = vshll.u32 %v4991_v14, %v1507_v32  ;;  %v1517_v11 = vshrl.u32 %v4992_v16, %v1508_v45 }
 0x266   : > { %v1265_v0 = vxor.u32 2147483648, %v1264_v21  ;;  %v4387_v59 = vmin.u32 %v2911_v4, %v6308_v42  ;;  %v1519_v51 = vshll.u32 %v4992_v16, %v1507_v32  ;;  %v1520_v10 = vshrl.u32 %v4993_v18, %v1508_v45 }
 0x267   : > { %v1512_v13 = vor.u32 %v1511_v19, %v1510_v1  ;;  %v1515_v29 = vor.u32 %v1514_v9, %v1513_v40  ;;  %v2931_v57 = vsub.s32 4, %v6291_v41  ;;  %vm3168_vm3 = vcmp.gt.s32.totalorder %v3167_v44, 0 }
 0x268   : > { %v1266_v37 = vsel %vm1183_vm8, %v1265_v0, %v1264_v21  ;;  %v2913_v43 = vclz %v4387_v59  ;;  %v1518_v38 = vor.u32 %v1517_v11, %v1516_v53  ;;  %v1521_v24 = vor.u32 %v1520_v10, %v1519_v51 }
 0x269   : > { %v1269_v30 = vsel %vm6261_vm11, %v6108_v7, %v1266_v37  ;;  %vm1525_vm4 = vcmp.lt.s32.totalorder %v1506_v34, 1  ;;  %vm2847_vm5 = vcmp.lt.s32.totalorder %v6130_v48, 0  ;;  %v1522_v58 = vshll.u32 %v4993_v18, %v1507_v32 }
 0x26a   : > { %4824 = vcosq.f32 %v1269_v30  ;;  %v4388_v60 = vadd.s32 4294967294, %v2913_v43  ;;  %v1523_v46 = vshrl.u32 %v4994_v25, %v1508_v45  ;;  %v1509_v49 = vshrl.u32 %v4989_v8, %v1508_v45 }
 0x26b   : > { %4826 = vsinq.f32 %v1269_v30  ;;  %vm1527_vm6 = vcmp.lt.s32.totalorder %v1506_v34, 3  ;;  %vm1528_vm7 = vcmp.lt.s32.totalorder %v1506_v34, 4  ;;  %v1533_v61 = vsel %vm1525_vm4, %v1512_v13, %v1515_v29 }
 0x26c   : > { %vm4389_vm9 = vcmp.lt.s32.totalorder %v4388_v60, 0  ;;  %v1524_v20 = vor.u32 %v1523_v46, %v1522_v58  ;;  %v1530_v33 = vsel %vm1528_vm7, %v1518_v38, 2102212464  ;;  %v1534_v36 = vsel %vm1528_vm7, %v1521_v24, 920167782 }
 0x26d   : > { %v2916_v3 = vsel %vm4389_vm9, 0, %v4388_v60  ;;  %v1529_v39 = vsel %vm1525_vm4, %v1509_v49, %v1512_v13  ;;  %v1531_v52 = vsel %vm1527_vm6, %v1515_v29, %v1530_v33  ;;  %v1535_v17 = vsel %vm1527_vm6, %v1518_v38, %v1534_v36 }
 0x26e   : > { %v2917_v63 = vsub.s32 32, %v2916_v3  ;;  %v2921_v47 = vsub.s32 4294967266, %v2916_v3  ;;  %vm1526_vm8 = vcmp.lt.s32.totalorder %v1506_v34, 2  ;;  %v1537_v2 = vsel %vm1525_vm4, %v1515_v29, %v1518_v38 }
 0x26f   : > { %v2918_v5 = vshll.u32 %v6308_v42, %v2916_v3  ;;  %v1536_v15 = vsel %vm1526_vm8, %v1533_v61, %v1535_v17  ;;  %v1538_v26 = vsel %vm1528_vm7, %v1524_v20, 1326507024  ;;  %v3169_v32 = vsel %vm3168_vm3, %v3167_v44, 0 }
 0x270   : > { %v2919_v21 = vshrl.u32 %v2901_v50, %v2917_v63  ;;  %v2922_v45 = vadd.s32 127, %v2921_v47  ;;  %v1532_v4 = vsel %vm1526_vm8, %v1529_v39, %v1531_v52  ;;  %v1539_v1 = vsel %vm1527_vm6, %v1521_v24, %v1538_v26 }
 0x271   : > { %vm1277_vm11 = vcmp.eq.s32.totalorder %v6304_v23, 0  ;;  %v1540_v0 = vsel %vm1526_vm8, %v1537_v2, %v1539_v1  ;;  %v6354_v19 = vmul.u32.u64.low %v6318_v54, %v1536_v15  ;;  %v6355_v40 = vmul.u32.u64.high %v6318_v54, %v1536_v15, %v6354_v19 }
 0x272   : > { %v3171_v9 = vand.u32 31, %v3169_v32  ;;  %vm1276_vm12 = vcmp.lt.s32.totalorder %v6304_v23, 2  ;;  %vm6361_vm10 = vcmp.le.f32.partialorder %v2845_v35, 0.7853982  ;;  %v2920_v50 = vor.u32 %v2919_v21, %v2918_v5 }
 0x273   : > { %v2923_v34 = vshll.u32 %v2922_v45, 23  ;;  %v6366_v44 = vmul.u32.u64.low %v6318_v54, %v1540_v0  ;;  %v6367_v59 = vmul.u32.u64.high %v6318_v54, %v1540_v0, %v6366_v44  ;;  %vm1273_vm14 = vweird.f32 %v6108_v7 }
 0x274   : > { %vm1280_vm13 = vcmp.eq.s32.totalorder %v6304_v23, 2  ;;  %v2932_v53 = vsel %vm2847_vm5, %v2931_v57, %v6291_v41  ;;  %v3172_v11 = vsub.s32 32, %v3171_v9  ;;  %v6376_v35 = vshll.u32 %v3165_v22, 8 }
 0x275   : > { %v2924_v51 = vor.u32 4788187, %v2923_v34  ;;  %v1548_v37 = vmul.u32 %v6318_v54, %v1532_v4  ;;  %v6379_v13 = vshrl.u32 %v3169_v32, 5  ;;  %v3174_v29 = vshll.u32 %v4989_v8, %v3171_v9 }
 0x276   : > { %v1551_v10 = vadd.s32 1, %v6355_v40  ;;  %v3175_v30 = vshrl.u32 %v4990_v12, %v3172_v11  ;;  %v3177_v43 = vshll.u32 %v4990_v12, %v3171_v9  ;;  %v3180_v41 = vshll.u32 %v4991_v14, %v3171_v9 }
 0x277   : > { %v4825_v57 = vpop.eup %4824  ;;  %v2925_v38 = vand.u32 2147483647, %v2924_v51  ;;  %v2927_v62 = vcvt.s32.f32 %v2920_v50  ;;  %vm1550_vm15 = vc.u32 %v6367_v59, %v6354_v19  ;;  %v3178_v54 = vshrl.u32 %v4991_v14, %v3172_v11 }
 0x278   : > { %v4827_v22 = vpop.eup %4826  ;;  %v1281_v24 = vxor.u32 2147483648, %v4825_v57  ;;  %v1552_v60 = vsel %vm1550_vm15, %v1551_v10, %v6355_v40  ;;  %v3181_v58 = vshrl.u32 %v4992_v16, %v3172_v11  ;;  %v3183_v46 = vshll.u32 %v4992_v16, %v3171_v9 }
 0x279   : > { %v1278_v49 = vxor.u32 2147483648, %v4827_v22  ;;  %v2928_v61 = vmul.f32 %v2927_v62, %v2925_v38  ;;  %v1553_v20 = vadd.s32 %v1552_v60, %v1548_v37  ;;  %v3186_v33 = vshll.u32 %v4993_v18, %v3171_v9 }
 0x27a   : > { %v1282_v36 = vsel %vm1280_vm13, %v1281_v24, %v4827_v22  ;;  %v3176_v3 = vor.u32 %v3175_v30, %v3174_v29  ;;  %v3184_v39 = vshrl.u32 %v4993_v18, %v3172_v11  ;;  %v3187_v52 = vshrl.u32 %v4994_v25, %v3172_v11 }
 0x27b   : > { %v1279_v17 = vsel %vm1277_vm11, %v4825_v57, %v1278_v49  ;;  %v2929_v63 = vxor.u32 2147483648, %v2928_v61  ;;  %v1554_v47 = vadd.s32 536870912, %v1553_v20  ;;  %v3179_v2 = vor.u32 %v3178_v54, %v3177_v43 }
 0x27c   : > { %v1283_v5 = vsel %vm1276_vm12, %v1279_v17, %v1282_v36  ;;  %v2934_v15 = vsel %vm6361_vm10, 0, %v2932_v53  ;;  %v3182_v26 = vor.u32 %v3181_v58, %v3180_v41  ;;  %v3185_v32 = vor.u32 %v3184_v39, %v3183_v46 }
 0x27d   : > { %v1284_v21 = vsel %vm1273_vm14, nan, %v1283_v5  ;;  %v2930_v45 = vsel %vm2847_vm5, %v2929_v63, %v2928_v61  ;;  %v1555_v4 = vshrl.u32 %v1554_v47, 30  ;;  %v3188_v1 = vor.u32 %v3187_v52, %v3186_v33  ;;  %v518_v52 = vpop.f32.mrf.mxu1 }
 0x27e   : > { %3892 = vst.msk [vmem:[%s5437_s12 + $0x30] sm:$0xff] %vm3885_vm0, %v1284_v21  ;;  %v2933_v23 = vsel %vm6361_vm10, %v6130_v48, %v2930_v45  ;;  %v3173_v0 = vshrl.u32 %v4989_v8, %v3172_v11  ;;  %vm3189_vm1 = vcmp.lt.s32.totalorder %v6379_v13, 1  ;;  %vm3191_vm2 = vcmp.lt.s32.totalorder %v6379_v13, 3 }
 0x27f   : > { %4828 = vcosq.f32 %v2933_v23  ;;  %v1556_v7 = vshll.u32 %v1555_v4, 30  ;;  %vm3192_vm3 = vcmp.lt.s32.totalorder %v6379_v13, 4  ;;  %v3197_v40 = vsel %vm3189_vm1, %v3176_v3, %v3179_v2 }
 0x280   : > { %4830 = vsinq.f32 %v2933_v23  ;;  %v3194_v9 = vsel %vm3192_vm3, %v3182_v26, 2102212464  ;;  %v3198_v50 = vsel %vm3192_vm3, %v3185_v32, 920167782  ;;  %v3201_v42 = vsel %vm3189_vm1, %v3179_v2, %v3182_v26 }
 0x281   : > { %v6420_v34 = vsub.s32 %v1553_v20, %v1556_v7  ;;  %vm3190_vm4 = vcmp.lt.s32.totalorder %v6379_v13, 2  ;;  %v3199_v44 = vsel %vm3191_vm2, %v3182_v26, %v3198_v50  ;;  %v3202_v53 = vsel %vm3192_vm3, %v3188_v1, 1326507024 }
 0x282   : > { %v2938_v11 = vadd.s32 3, %v2934_v15  ;;  %v1579_v51 = vsub.s32 4, %v1555_v4  ;;  %v3200_v37 = vsel %vm3190_vm4, %v3197_v40, %v3199_v44  ;;  %v3203_v29 = vsel %vm3191_vm2, %v3185_v32, %v3202_v53 }
 0x283   : > { %v1559_v10 = vsub.s32 0, %v6420_v34  ;;  %v3193_v30 = vsel %vm3189_vm1, %v3173_v0, %v3176_v3  ;;  %v3195_v43 = vsel %vm3191_vm2, %v3179_v2, %v3194_v9  ;;  %v3204_v41 = vsel %vm3190_vm4, %v3201_v42, %v3203_v29 }
 0x284   : > { %v6437_v57 = vmul.u32.u64.low %v6376_v35, %v3204_v41  ;;  %v6438_v38 = vmul.u32.u64.high %v6376_v35, %v3204_v41, %v6437_v57  ;;  %v6441_v62 = vmul.u32.u64.low %v6376_v35, %v3200_v37  ;;  %v6442_v54 = vmul.u32.u64.high %v6376_v35, %v3200_v37, %v6441_v62 }
 0x285   : > { %vm1495_vm5 = vcmp.lt.s32.totalorder %v6239_v55, 0  ;;  %v4335_v22 = vmin.u32 %v1559_v10, %v6420_v34  ;;  %v2939_v24 = vand.u32 3, %v2938_v11  ;;  %v3196_v58 = vsel %vm3190_vm4, %v3193_v30, %v3195_v43 }
 0x286   : > { %v1580_v60 = vsel %vm1495_vm5, %v1579_v51, %v1555_v4  ;;  %v1392_v46 = vand.u32 2139095040, %v6316_v56  ;;  %vm6453_vm6 = vcmp.le.f32.partialorder %v1493_v28, 0.7853982  ;;  %vm3214_vm7 = vc.u32 %v6438_v38, %v6441_v62 }
 0x287   : > { %v1561_v49 = vclz %v4335_v22  ;;  %v3215_v20 = vadd.s32 1, %v6442_v54  ;;  %v1582_v3 = vsel %vm6453_vm6, 0, %v1580_v60  ;;  %v3212_v13 = vmul.u32 %v6376_v35, %v3196_v58 }
 0x288   : > { %v1393_v33 = vshrl.u32 %v1392_v46, 23  ;;  %v1389_v39 = vand.u32 2147483647, %v6316_v56  ;;  %vm2940_vm9 = vcmp.lt.s32.totalorder %v2939_v24, 2  ;;  %vm2941_vm8 = vcmp.eq.s32.totalorder %v2939_v24, 0 }
 0x289   : > { %v4336_v36 = vadd.s32 4294967294, %v1561_v49  ;;  %v3216_v28 = vsel %vm3214_vm7, %v3215_v20, %v6442_v54  ;;  %vm2944_vm11 = vcmp.eq.s32.totalorder %v2939_v24, 2  ;;  %v1549_v63 = vadd.s32 %v6354_v19, %v6367_v59 }
 0x28a   : > { %v4330_v17 = vadd.s32 4294967169, %v1393_v33  ;;  %v3217_v47 = vadd.s32 %v3216_v28, %v3212_v13  ;;  %v1586_v15 = vadd.s32 3, %v1582_v3  ;;  %v6467_v35 = vadd.f32 %v6313_v27, %v518_v52 }
 0x28b   : > { %vm4337_vm12 = vcmp.lt.s32.totalorder %v4336_v36, 0  ;;  %v1396_v1 = vand.u32 8388607, %v1389_v39  ;;  %vm2937_vm14 = vweird.f32 %v6130_v48  ;;  %vm3159_vm13 = vcmp.lt.s32.totalorder %v6257_v6, 0 }
 0x28c   : > { %v4829_v2 = vpop.eup %4828  ;;  %v1564_v5 = vsel %vm4337_vm12, 0, %v4336_v36  ;;  %v1399_v26 = vadd.s32 1, %v4330_v17  ;;  %v3218_v19 = vadd.s32 536870912, %v3217_v47  ;;  %v3056_v53 = vand.u32 2139095040, %v6467_v35 }
 0x28d   : > { %v4831_v32 = vpop.eup %4830  ;;  %v2945_v21 = vxor.u32 2147483648, %v4829_v2  ;;  %v1565_v45 = vsub.s32 32, %v1564_v5  ;;  %v1569_v4 = vsub.s32 4294967266, %v1564_v5  ;;  %v1566_v0 = vshll.u32 %v6420_v34, %v1564_v5 }
 0x28e   : > { %v2942_v23 = vxor.u32 2147483648, %v4831_v32  ;;  %vm1400_vm10 = vcmp.gt.s32.totalorder %v1399_v26, 0  ;;  %v3219_v42 = vshrl.u32 %v3218_v19, 30  ;;  %v6480_v43 = vand.u32 3, %v1586_v15 }
 0x28f   : > { %v2946_v59 = vsel %vm2944_vm11, %v2945_v21, %v4831_v32  ;;  %v1567_v7 = vshrl.u32 %v1549_v63, %v1565_v45  ;;  %v1570_v40 = vadd.s32 127, %v1569_v4  ;;  %v1401_v9 = vsel %vm1400_vm10, %v1399_v26, 0 }
 0x290   : > { %v2943_v50 = vsel %vm2941_vm8, %v4829_v2, %v2942_v23  ;;  %v1403_v44 = vand.u32 31, %v1401_v9  ;;  %v3220_v29 = vshll.u32 %v3219_v42, 30  ;;  %v3213_v41 = vadd.s32 %v6441_v62, %v6438_v38 }
 0x291   : > { %v2947_v11 = vsel %vm2940_vm9, %v2943_v50, %v2946_v59  ;;  %v1568_v51 = vor.u32 %v1567_v7, %v1566_v0  ;;  %v1571_v34 = vshll.u32 %v1570_v40, 23  ;;  %v1397_v57 = vor.u32 8388608, %v1396_v1 }
 0x292   : > { %v2948_v37 = vsel %vm2937_vm14, nan, %v2947_v11  ;;  %v1404_v10 = vsub.s32 32, %v1403_v44  ;;  %v6483_v54 = vsub.s32 %v3217_v47, %v3220_v29  ;;  %v3243_v48 = vsub.s32 4, %v3219_v42 }
 0x293   : > { %3908 = vst.msk [vmem:[%s5437_s12 + $0xb0] sm:$0xff] %vm3885_vm0, %v2948_v37  ;;  %v1572_v30 = vor.u32 4788187, %v1571_v34  ;;  %v3057_v24 = vshrl.u32 %v3056_v53, 23  ;;  %v1575_v58 = vcvt.s32.f32 %v1568_v51  ;;  %v1406_v46 = vshll.u32 %v4989_v8, %v1403_v44 }
 0x294   : > { %v1407_v22 = vshrl.u32 %v4990_v12, %v1404_v10  ;;  %v1410_v49 = vshrl.u32 %v4991_v14, %v1404_v10  ;;  %v3223_v20 = vsub.s32 0, %v6483_v54  ;;  %v1409_v33 = vshll.u32 %v4990_v12, %v1403_v44 }
 0x295   : > { %v1573_v60 = vand.u32 2147483647, %v1572_v30  ;;  %v1412_v36 = vshll.u32 %v4991_v14, %v1403_v44  ;;  %v1413_v38 = vshrl.u32 %v4992_v16, %v1404_v10  ;;  %v1402_v3 = vshrl.u32 %v1401_v9, 5 }
 0x296   : > { %v1415_v13 = vshll.u32 %v4992_v16, %v1403_v44  ;;  %v1416_v52 = vshrl.u32 %v4993_v18, %v1404_v10  ;;  %v4399_v28 = vmin.u32 %v3223_v20, %v6483_v54  ;;  %v1408_v17 = vor.u32 %v1407_v22, %v1406_v46 }
 0x297   : > { %v1576_v62 = vmul.f32 %v1575_v58, %v1573_v60  ;;  %v1411_v63 = vor.u32 %v1410_v49, %v1409_v33  ;;  %v1414_v47 = vor.u32 %v1413_v38, %v1412_v36  ;;  %v1418_v15 = vshll.u32 %v4993_v18, %v1403_v44 }
 0x298   : > { %v1417_v5 = vor.u32 %v1416_v52, %v1415_v13  ;;  %v1419_v26 = vshrl.u32 %v4994_v25, %v1404_v10  ;;  %vm6499_vm15 = vcmp.le.f32.partialorder %v3157_v31, 0.7853982  ;;  %v3225_v21 = vclz %v4399_v28  ;;  %v4507_v52 = vpop.f32.mrf.mxu0 }
 0x299   : > { %v1577_v2 = vxor.u32 2147483648, %v1576_v62  ;;  %v3244_v45 = vsel %vm3159_vm13, %v3243_v48, %v3219_v42  ;;  %v1437_v4 = vshll.u32 %v1397_v57, 8  ;;  %v4394_v1 = vadd.s32 4294967169, %v3057_v24 }
 0x29a   : > { %v1405_v0 = vshrl.u32 %v4989_v8, %v1404_v10  ;;  %v1420_v19 = vor.u32 %v1419_v26, %v1418_v15  ;;  %vm1421_vm1 = vcmp.lt.s32.totalorder %v1402_v3, 1  ;;  %v4400_v59 = vadd.s32 4294967294, %v3225_v21 }
 0x29b   : > { %v1578_v23 = vsel %vm1495_vm5, %v1577_v2, %v1576_v62  ;;  %vm1423_vm2 = vcmp.lt.s32.totalorder %v1402_v3, 3  ;;  %vm1424_vm3 = vcmp.lt.s32.totalorder %v1402_v3, 4  ;;  %v1429_v40 = vsel %vm1421_vm1, %v1408_v17, %v1411_v63 }
 0x29c   : > { %v1581_v31 = vsel %vm6453_vm6, %v6239_v55, %v1578_v23  ;;  %v1426_v7 = vsel %vm1424_vm3, %v1414_v47, 2102212464  ;;  %v1430_v9 = vsel %vm1424_vm3, %v1417_v5, 920167782  ;;  %vm4401_vm4 = vcmp.lt.s32.totalorder %v4400_v59, 0 }
 0x29d   : > { %4832 = vcosq.f32 %v1581_v31  ;;  %vm1422_vm5 = vcmp.lt.s32.totalorder %v1402_v3, 2  ;;  %v1431_v50 = vsel %vm1423_vm2, %v1414_v47, %v1430_v9  ;;  %v3228_v42 = vsel %vm4401_vm4, 0, %v4400_v59 }
 0x29e   : > { %4834 = vsinq.f32 %v1581_v31  ;;  %v1425_v44 = vsel %vm1421_vm1, %v1405_v0, %v1408_v17  ;;  %v1432_v61 = vsel %vm1422_vm5, %v1429_v40, %v1431_v50  ;;  %v1433_v53 = vsel %vm1421_vm1, %v1411_v63, %v1414_v47 }
 0x29f   : > { %v3229_v11 = vsub.s32 32, %v3228_v42  ;;  %v3233_v51 = vsub.s32 4294967266, %v3228_v42  ;;  %v1427_v34 = vsel %vm1423_vm2, %v1411_v63, %v1426_v7  ;;  %v1434_v37 = vsel %vm1424_vm3, %v1420_v19, 1326507024 }
 0x2a0   : > { %v3230_v29 = vshll.u32 %v6483_v54, %v3228_v42  ;;  %v1435_v10 = vsel %vm1423_vm2, %v1417_v5, %v1434_v37  ;;  %v6522_v30 = vmul.u32.u64.low %v1437_v4, %v1432_v61  ;;  %v6523_v57 = vmul.u32.u64.high %v1437_v4, %v1432_v61, %v6522_v30 }
 0x2a1   : > { %v3231_v48 = vshrl.u32 %v3213_v41, %v3229_v11  ;;  %v3234_v22 = vadd.s32 127, %v3233_v51  ;;  %v1436_v24 = vsel %vm1422_vm5, %v1433_v53, %v1435_v10  ;;  %v3063_v60 = vadd.s32 1, %v4394_v1 }
 0x2a2   : > { %v3246_v58 = vsel %vm6499_vm15, 0, %v3244_v45  ;;  %v6529_v46 = vmul.u32.u64.low %v1437_v4, %v1436_v24  ;;  %v6530_v49 = vmul.u32.u64.high %v1437_v4, %v1436_v24, %v6529_v46  ;;  %v3053_v20 = vand.u32 2147483647, %v6467_v35 }
 0x2a3   : > { %v3232_v54 = vor.u32 %v3231_v48, %v3230_v29  ;;  %v3235_v33 = vshll.u32 %v3234_v22, 23  ;;  %v1428_v36 = vsel %vm1422_vm5, %v1425_v44, %v1427_v34  ;;  %vm3064_vm6 = vcmp.gt.s32.totalorder %v3063_v60, 0 }
 0x2a4   : > { %v1447_v38 = vadd.s32 1, %v6523_v57  ;;  %v3065_v41 = vsel %vm3064_vm6, %v3063_v60, 0  ;;  %vm1588_vm7 = vcmp.lt.s32.totalorder %v6480_v43, 2  ;;  %vm1589_vm9 = vcmp.eq.s32.totalorder %v6480_v43, 0 }
 0x2a5   : > { %vm1592_vm8 = vcmp.eq.s32.totalorder %v6480_v43, 2  ;;  %v3236_v62 = vor.u32 4788187, %v3235_v33  ;;  %v3067_v13 = vand.u32 31, %v3065_v41  ;;  %vm1585_vm11 = vweird.f32 %v6239_v55 }
 0x2a6   : > { %v3250_v28 = vadd.s32 3, %v3246_v58  ;;  %v1444_v17 = vmul.u32 %v1437_v4, %v1428_v36  ;;  %vm1446_vm12 = vc.u32 %v6530_v49, %v6522_v30  ;;  %v3060_v3 = vand.u32 8388607, %v3053_v20 }
 0x2a7   : > { %v3237_v63 = vand.u32 2147483647, %v3236_v62  ;;  %v3239_v47 = vcvt.s32.f32 %v3232_v54  ;;  %v1448_v2 = vsel %vm1446_vm12, %v1447_v38, %v6523_v57  ;;  %v3068_v5 = vsub.s32 32, %v3067_v13 }
 0x2a8   : > { %v1449_v15 = vadd.s32 %v1448_v2, %v1444_v17  ;;  %v6544_v26 = vshrl.u32 %v3065_v41, 5  ;;  %v3070_v21 = vshll.u32 %v4989_v8, %v3067_v13  ;;  %v6548_v45 = vadd.f32 %v6313_v27, %v4507_v52 }
 0x2a9   : > { %v3240_v1 = vmul.f32 %v3239_v47, %v3237_v63  ;;  %v3071_v23 = vshrl.u32 %v4990_v12, %v3068_v5  ;;  %v3073_v0 = vshll.u32 %v4990_v12, %v3067_v13  ;;  %v3074_v19 = vshrl.u32 %v4991_v14, %v3068_v5 }
 0x2aa   : > { %v4833_v4 = vpop.eup %4832  ;;  %v1450_v7 = vadd.s32 536870912, %v1449_v15  ;;  %v3076_v40 = vshll.u32 %v4991_v14, %v3067_v13  ;;  %v3077_v9 = vshrl.u32 %v4992_v16, %v3068_v5  ;;  %v3079_v44 = vshll.u32 %v4992_v16, %v3067_v13 }
 0x2ab   : > { %v4835_v31 = vpop.eup %4834  ;;  %v1593_v59 = vxor.u32 2147483648, %v4833_v4  ;;  %v3241_v42 = vxor.u32 2147483648, %v3240_v1  ;;  %v3080_v61 = vshrl.u32 %v4993_v18, %v3068_v5  ;;  %v3072_v51 = vor.u32 %v3071_v23, %v3070_v21 }
 0x2ac   : > { %v1590_v50 = vxor.u32 2147483648, %v4835_v31  ;;  %v6559_v11 = vshrl.u32 %v1450_v7, 30  ;;  %v3075_v34 = vor.u32 %v3074_v19, %v3073_v0  ;;  %v3082_v10 = vshll.u32 %v4993_v18, %v3067_v13 }
 0x2ad   : > { %v1594_v53 = vsel %vm1592_vm8, %v1593_v59, %v4835_v31  ;;  %v3242_v29 = vsel %vm3159_vm13, %v3241_v42, %v3240_v1  ;;  %v3083_v57 = vshrl.u32 %v4994_v25, %v3068_v5  ;;  %v3078_v60 = vor.u32 %v3077_v9, %v3076_v40  ;;  %v4531_v31 = vpop.f32.mrf.mxu1 }
 0x2ae   : > { %v1591_v37 = vsel %vm1589_vm9, %v4833_v4, %v1590_v50  ;;  %v3245_v22 = vsel %vm6499_vm15, %v6257_v6, %v3242_v29  ;;  %v1452_v24 = vshll.u32 %v6559_v11, 30  ;;  %v3081_v46 = vor.u32 %v3080_v61, %v3079_v44 }
 0x2af   : > { %v1595_v48 = vsel %vm1588_vm7, %v1591_v37, %v1594_v53  ;;  %4836 = vcosq.f32 %v3245_v22  ;;  %v3084_v54 = vor.u32 %v3083_v57, %v3082_v10  ;;  %v6579_v43 = vand.u32 3, %v3250_v28 }
 0x2b0   : > { %v1596_v58 = vsel %vm1585_vm11, nan, %v1595_v48  ;;  %4838 = vsinq.f32 %v3245_v22  ;;  %v6577_v33 = vsub.s32 %v1449_v15, %v1452_v24  ;;  %v3061_v36 = vor.u32 8388608, %v3060_v3 }
 0x2b1   : > { %3895 = vst.msk [vmem:[%s5437_s12 + $0x48] sm:$0xff] %vm3885_vm0, %v1596_v58  ;;  %vm3085_vm10 = vcmp.lt.s32.totalorder %v6544_v26, 1  ;;  %v1704_v32 = vand.u32 2139095040, %v6548_v45  ;;  %vm3087_vm14 = vcmp.lt.s32.totalorder %v6544_v26, 3  ;;  %vm3088_vm13 = vcmp.lt.s32.totalorder %v6544_v26, 4 }
 0x2b2   : > { %v1455_v38 = vsub.s32 0, %v6577_v33  ;;  %v3093_v55 = vsel %vm3085_vm10, %v3072_v51, %v3075_v34  ;;  %v3069_v41 = vshrl.u32 %v4989_v8, %v3068_v5  ;;  %v3090_v62 = vsel %vm3088_vm13, %v3078_v60, 2102212464 }
 0x2b3   : > { %v3094_v13 = vsel %vm3088_vm13, %v3081_v46, 920167782  ;;  %v3098_v52 = vsel %vm3088_vm13, %v3084_v54, 1326507024  ;;  %vm3086_vm15 = vcmp.lt.s32.totalorder %v6544_v26, 2  ;;  %v3097_v3 = vsel %vm3085_vm10, %v3075_v34, %v3078_v60 }
 0x2b4   : > { %v4331_v28 = vmin.u32 %v1455_v38, %v6577_v33  ;;  %v3095_v17 = vsel %vm3087_vm14, %v3078_v60, %v3094_v13  ;;  %v3099_v47 = vsel %vm3087_vm14, %v3081_v46, %v3098_v52  ;;  %v3101_v2 = vshll.u32 %v3061_v36, 8 }
 0x2b5   : > { %v3096_v63 = vsel %vm3086_vm15, %v3093_v55, %v3095_v17  ;;  %v1705_v5 = vshrl.u32 %v1704_v32, 23  ;;  %v3089_v21 = vsel %vm3085_vm10, %v3069_v41, %v3072_v51  ;;  %v3091_v4 = vsel %vm3087_vm14, %v3075_v34, %v3090_v62 }
 0x2b6   : > { %v1457_v15 = vclz %v4331_v28  ;;  %v3100_v1 = vsel %vm3086_vm15, %v3097_v3, %v3099_v47  ;;  %v6605_v23 = vmul.u32.u64.low %v3101_v2, %v3096_v63  ;;  %v6606_v0 = vmul.u32.u64.high %v3101_v2, %v3096_v63, %v6605_v23 }
 0x2b7   : > { %v4342_v19 = vadd.s32 4294967169, %v1705_v5  ;;  %v1475_v7 = vsub.s32 4, %v6559_v11  ;;  %v6610_v40 = vmul.u32.u64.low %v3101_v2, %v3100_v1  ;;  %v6611_v9 = vmul.u32.u64.high %v3101_v2, %v3100_v1, %v6610_v40 }
 0x2b8   : > { %v4332_v59 = vadd.s32 4294967294, %v1457_v15  ;;  %vm3249_vm1 = vweird.f32 %v6257_v6  ;;  %vm3253_vm2 = vcmp.eq.s32.totalorder %v6579_v43, 0  ;;  %vm1391_vm3 = vcmp.lt.s32.totalorder %v6316_v56, 0 }
 0x2b9   : > { %v3092_v50 = vsel %vm3086_vm15, %v3089_v21, %v3091_v4  ;;  %v1711_v42 = vadd.s32 1, %v4342_v19  ;;  %vm3256_vm4 = vcmp.eq.s32.totalorder %v6579_v43, 2  ;;  %v1701_v44 = vand.u32 2147483647, %v6548_v45 }
 0x2ba   : > { %vm4333_vm5 = vcmp.lt.s32.totalorder %v4332_v59, 0  ;;  %v6621_v61 = vadd.f32 %v6313_v27, %v4531_v31  ;;  %v1445_v53 = vadd.s32 %v6522_v30, %v6530_v49  ;;  %v3111_v34 = vadd.s32 1, %v6606_v0 }
 0x2bb   : > { %v1460_v51 = vsel %vm4333_vm5, 0, %v4332_v59  ;;  %vm1712_vm6 = vcmp.gt.s32.totalorder %v1711_v42, 0  ;;  %v1476_v10 = vsel %vm1391_vm3, %v1475_v7, %v6559_v11  ;;  %v3108_v57 = vmul.u32 %v3101_v2, %v3092_v50 }
 0x2bc   : > { %v4837_v37 = vpop.eup %4836  ;;  %v1461_v29 = vsub.s32 32, %v1460_v51  ;;  %v1465_v26 = vsub.s32 4294967266, %v1460_v51  ;;  %v1462_v24 = vshll.u32 %v6577_v33, %v1460_v51  ;;  %vm3110_vm7 = vc.u32 %v6611_v9, %v6605_v23 }
 0x2bd   : > { %v4839_v48 = vpop.eup %4838  ;;  %v3257_v22 = vxor.u32 2147483648, %v4837_v37  ;;  %v1713_v30 = vsel %vm1712_vm6, %v1711_v42, 0  ;;  %v3112_v46 = vsel %vm3110_vm7, %v3111_v34, %v6606_v0  ;;  %v1708_v11 = vand.u32 8388607, %v1701_v44 }
 0x2be   : > { %v3254_v49 = vxor.u32 2147483648, %v4839_v48  ;;  %v1463_v60 = vshrl.u32 %v1445_v53, %v1461_v29  ;;  %v1466_v58 = vadd.s32 127, %v1465_v26  ;;  %v3113_v36 = vadd.s32 %v3112_v46, %v3108_v57 }
 0x2bf   : > { %v3258_v54 = vsel %vm3256_vm4, %v3257_v22, %v4839_v48  ;;  %v1715_v32 = vand.u32 31, %v1713_v30  ;;  %vm3252_vm9 = vcmp.lt.s32.totalorder %v6579_v43, 2  ;;  %vm6642_vm8 = vcmp.le.f32.partialorder %v1389_v39, 0.7853982 }
 0x2c0   : > { %v3255_v33 = vsel %vm3253_vm2, %v4837_v37, %v3254_v49  ;;  %v1464_v38 = vor.u32 %v1463_v60, %v1462_v24  ;;  %v1467_v55 = vshll.u32 %v1466_v58, 23  ;;  %v3114_v13 = vadd.s32 536870912, %v3113_v36 }
 0x2c1   : > { %v3259_v41 = vsel %vm3252_vm9, %v3255_v33, %v3258_v54  ;;  %v1716_v52 = vsub.s32 32, %v1715_v32  ;;  %v1478_v3 = vsel %vm6642_vm8, 0, %v1476_v10  ;;  %v1709_v63 = vor.u32 8388608, %v1708_v11 }
 0x2c2   : > { %v3260_v28 = vsel %vm3249_vm1, nan, %v3259_v41  ;;  %v1468_v17 = vor.u32 4788187, %v1467_v55  ;;  %v6652_v43 = vshrl.u32 %v3114_v13, 30  ;;  %v3368_v39 = vand.u32 2139095040, %v6621_v61 }
 0x2c3   : > { %3911 = vst.msk [vmem:[%s5437_s12 + $0xc8] sm:$0xff] %vm3885_vm0, %v3260_v28  ;;  %v1719_v47 = vshrl.u32 %v4990_v12, %v1716_v52  ;;  %v1471_v5 = vcvt.s32.f32 %v1464_v38  ;;  %v1722_v15 = vshrl.u32 %v4991_v14, %v1716_v52  ;;  %v1725_v6 = vshrl.u32 %v4992_v16, %v1716_v52 }
 0x2c4   : > { %v1469_v2 = vand.u32 2147483647, %v1468_v17  ;;  %v3116_v21 = vshll.u32 %v6652_v43, 30  ;;  %v1714_v4 = vshrl.u32 %v1713_v30, 5  ;;  %v1718_v1 = vshll.u32 %v4989_v8, %v1715_v32 }
 0x2c5   : > { %v1724_v0 = vshll.u32 %v4991_v14, %v1715_v32  ;;  %v1721_v31 = vshll.u32 %v4990_v12, %v1715_v32  ;;  %v1727_v59 = vshll.u32 %v4992_v16, %v1715_v32  ;;  %v1728_v7 = vshrl.u32 %v4993_v18, %v1716_v52 }
 0x2c6   : > { %v1472_v19 = vmul.f32 %v1471_v5, %v1469_v2  ;;  %v6664_v40 = vsub.s32 %v3113_v36, %v3116_v21  ;;  %v1720_v50 = vor.u32 %v1719_v47, %v1718_v1  ;;  %v1731_v53 = vshrl.u32 %v4994_v25, %v1716_v52 }
 0x2c7   : > { %v1726_v42 = vor.u32 %v1725_v6, %v1724_v0  ;;  %v1723_v34 = vor.u32 %v1722_v15, %v1721_v31  ;;  %v1729_v37 = vor.u32 %v1728_v7, %v1727_v59  ;;  %v1730_v29 = vshll.u32 %v4993_v18, %v1715_v32 }
 0x2c8   : > { %v1473_v51 = vxor.u32 2147483648, %v1472_v19  ;;  %v1482_v26 = vadd.s32 3, %v1478_v3  ;;  %v3119_v10 = vsub.s32 0, %v6664_v40  ;;  %v1749_v57 = vshll.u32 %v1709_v63, 8 }
 0x2c9   : > { %v3369_v48 = vshrl.u32 %v3368_v39, 23  ;;  %v1717_v24 = vshrl.u32 %v4989_v8, %v1716_v52  ;;  %v1732_v30 = vor.u32 %v1731_v53, %v1730_v29  ;;  %vm1736_vm11 = vcmp.lt.s32.totalorder %v1714_v4, 4 }
 0x2ca   : > { %v1474_v22 = vsel %vm1391_vm3, %v1473_v51, %v1472_v19  ;;  %v4395_v60 = vmin.u32 %v3119_v10, %v6664_v40  ;;  %vm1733_vm12 = vcmp.lt.s32.totalorder %v1714_v4, 1  ;;  %v1738_v58 = vsel %vm1736_vm11, %v1726_v42, 2102212464 }
 0x2cb   : > { %v1477_v49 = vsel %vm6642_vm8, %v6316_v56, %v1474_v22  ;;  %vm1734_vm10 = vcmp.lt.s32.totalorder %v1714_v4, 2  ;;  %v1741_v46 = vsel %vm1733_vm12, %v1720_v50, %v1723_v34  ;;  %v1742_v54 = vsel %vm1736_vm11, %v1729_v37, 920167782 }
 0x2cc   : > { %4840 = vcosq.f32 %v1477_v49  ;;  %v3121_v36 = vclz %v4395_v60  ;;  %vm1735_vm14 = vcmp.lt.s32.totalorder %v1714_v4, 3  ;;  %v1745_v11 = vsel %vm1733_vm12, %v1723_v34, %v1726_v42 }
 0x2cd   : > { %4842 = vsinq.f32 %v1477_v49  ;;  %v1737_v32 = vsel %vm1733_vm12, %v1717_v24, %v1720_v50  ;;  %v1739_v33 = vsel %vm1735_vm14, %v1723_v34, %v1738_v58  ;;  %v1743_v38 = vsel %vm1735_vm14, %v1726_v42, %v1742_v54 }
 0x2ce   : > { %v1746_v55 = vsel %vm1736_vm11, %v1732_v30, 1326507024  ;;  %v4396_v41 = vadd.s32 4294967294, %v3121_v36  ;;  %v3139_v62 = vsub.s32 4, %v6652_v43  ;;  %v1744_v13 = vsel %vm1734_vm10, %v1741_v46, %v1743_v38 }
 0x2cf   : > { %v1747_v52 = vsel %vm1735_vm14, %v1729_v37, %v1746_v55  ;;  %v6682_v17 = vmul.u32.u64.low %v1749_v57, %v1744_v13  ;;  %v6683_v3 = vmul.u32.u64.high %v1749_v57, %v1744_v13, %v6682_v17  ;;  %v4406_v63 = vadd.s32 4294967169, %v3369_v48 }
 0x2d0   : > { %v1748_v28 = vsel %vm1734_vm10, %v1745_v11, %v1747_v52  ;;  %vm4397_vm13 = vcmp.lt.s32.totalorder %v4396_v41, 0  ;;  %v1740_v47 = vsel %vm1734_vm10, %v1737_v32, %v1739_v33  ;;  %v1483_v5 = vand.u32 3, %v1482_v26 }
 0x2d1   : > { %v6687_v39 = vmul.u32.u64.low %v1749_v57, %v1748_v28  ;;  %v6688_v2 = vmul.u32.u64.high %v1749_v57, %v1748_v28, %v6687_v39  ;;  %vm3055_vm15 = vcmp.lt.s32.totalorder %v6467_v35, 0  ;;  %v3124_v15 = vsel %vm4397_vm13, 0, %v4396_v41 }
 0x2d2   : > { %v3375_v6 = vadd.s32 1, %v4406_v63  ;;  %v3109_v21 = vadd.s32 %v6605_v23, %v6611_v9  ;;  %v3125_v1 = vsub.s32 32, %v3124_v15  ;;  %v3129_v0 = vsub.s32 4294967266, %v3124_v15 }
 0x2d3   : > { %v3365_v19 = vand.u32 2147483647, %v6621_v61  ;;  %v3140_v4 = vsel %vm3055_vm15, %v3139_v62, %v6652_v43  ;;  %v1756_v31 = vmul.u32 %v1749_v57, %v1740_v47  ;;  %v1759_v59 = vadd.s32 1, %v6683_v3  ;;  %v448_v57 = vpop.f32.mrf.mxu0 }
 0x2d4   : > { %vm3376_vm1 = vcmp.gt.s32.totalorder %v3375_v6, 0  ;;  %v3126_v7 = vshll.u32 %v6664_v40, %v3124_v15  ;;  %v3127_v50 = vshrl.u32 %v3109_v21, %v3125_v1  ;;  %v3130_v42 = vadd.s32 127, %v3129_v0 }
 0x2d5   : > { %vm1758_vm2 = vc.u32 %v6688_v2, %v6682_v17  ;;  %vm6703_vm3 = vcmp.le.f32.partialorder %v3053_v20, 0.7853982  ;;  %v3377_v43 = vsel %vm3376_vm1, %v3375_v6, 0  ;;  %vm1481_vm4 = vweird.f32 %v6316_v56 }
 0x2d6   : > { %v1760_v9 = vsel %vm1758_vm2, %v1759_v59, %v6683_v3  ;;  %v3128_v53 = vor.u32 %v3127_v50, %v3126_v7  ;;  %v3131_v51 = vshll.u32 %v3130_v42, 23  ;;  %v3142_v34 = vsel %vm6703_vm3, 0, %v3140_v4 }
 0x2d7   : > { %v1761_v40 = vadd.s32 %v1760_v9, %v1756_v31  ;;  %v3372_v37 = vand.u32 8388607, %v3365_v19  ;;  %v3379_v29 = vand.u32 31, %v3377_v43  ;;  %vm1484_vm5 = vcmp.lt.s32.totalorder %v1483_v5, 2 }
 0x2d8   : > { %vm1485_vm6 = vcmp.eq.s32.totalorder %v1483_v5, 0  ;;  %v3132_v20 = vor.u32 4788187, %v3131_v51  ;;  %vm1488_vm7 = vcmp.eq.s32.totalorder %v1483_v5, 2  ;;  %v6713_v24 = vadd.s32 3, %v3142_v34 }
 0x2d9   : > { %v4841_v26 = vpop.eup %4840  ;;  %v1762_v10 = vadd.s32 536870912, %v1761_v40  ;;  %v3380_v30 = vsub.s32 32, %v3379_v29  ;;  %v3135_v58 = vcvt.s32.f32 %v3128_v53  ;;  %v3373_v36 = vor.u32 8388608, %v3372_v37 }
 0x2da   : > { %v4843_v48 = vpop.eup %4842  ;;  %v1489_v22 = vxor.u32 2147483648, %v4841_v26  ;;  %v3133_v60 = vand.u32 2147483647, %v3132_v20  ;;  %v6719_v32 = vadd.f32 %v6313_v27, %v448_v57  ;;  %v3382_v13 = vshll.u32 %v4989_v8, %v3379_v29 }
 0x2db   : > { %v1486_v49 = vxor.u32 2147483648, %v4843_v48  ;;  %v6715_v46 = vshrl.u32 %v1762_v10, 30  ;;  %v3383_v11 = vshrl.u32 %v4990_v12, %v3380_v30  ;;  %v3386_v41 = vshrl.u32 %v4991_v14, %v3380_v30 }
 0x2dc   : > { %v1490_v54 = vsel %vm1488_vm7, %v1489_v22, %v4843_v48  ;;  %v3136_v38 = vmul.f32 %v3135_v58, %v3133_v60  ;;  %v3385_v52 = vshll.u32 %v4990_v12, %v3379_v29  ;;  %v3389_v28 = vshrl.u32 %v4992_v16, %v3380_v30 }
 0x2dd   : > { %v1487_v33 = vsel %vm1485_vm6, %v4841_v26, %v1486_v49  ;;  %v1764_v55 = vshll.u32 %v6715_v46, 30  ;;  %v3388_v47 = vshll.u32 %v4991_v14, %v3379_v29  ;;  %v3378_v39 = vshrl.u32 %v3377_v43, 5 }
 0x2de   : > { %v1491_v62 = vsel %vm1484_vm5, %v1487_v33, %v1490_v54  ;;  %v3137_v27 = vxor.u32 2147483648, %v3136_v38  ;;  %v3384_v15 = vor.u32 %v3383_v11, %v3382_v13  ;;  %v3391_v5 = vshll.u32 %v4992_v16, %v3379_v29  ;;  %v528_v13 = vpop.f32.mrf.mxu1 }
 0x2df   : > { %v1492_v3 = vsel %vm1481_vm4, nan, %v1491_v62  ;;  %v6730_v63 = vsub.s32 %v1761_v40, %v1764_v55  ;;  %v3392_v6 = vshrl.u32 %v4993_v18, %v3380_v30  ;;  %v3387_v56 = vor.u32 %v3386_v41, %v3385_v52 }
 0x2e0   : > { %3894 = vst.msk [vmem:[%s5437_s12 + $0x40] sm:$0xff] %vm3885_vm0, %v1492_v3  ;;  %v3138_v21 = vsel %vm3055_vm15, %v3137_v27, %v3136_v38  ;;  %v3390_v0 = vor.u32 %v3389_v28, %v3388_v47  ;;  %v3394_v59 = vshll.u32 %v4993_v18, %v3379_v29  ;;  %v3395_v7 = vshrl.u32 %v4994_v25, %v3380_v30 }
 0x2e1   : > { %v1767_v1 = vsub.s32 0, %v6730_v63  ;;  %v3141_v4 = vsel %vm6703_vm3, %v6467_v35, %v3138_v21  ;;  %v3393_v31 = vor.u32 %v3392_v6, %v3391_v5  ;;  %v3413_v42 = vshll.u32 %v3373_v36, 8 }
 0x2e2   : > { %4844 = vcosq.f32 %v3141_v4  ;;  %v1600_v9 = vand.u32 2139095040, %v6719_v32  ;;  %v3381_v43 = vshrl.u32 %v4989_v8, %v3380_v30  ;;  %v3396_v53 = vor.u32 %v3395_v7, %v3394_v59 }
 0x2e3   : > { %v4343_v50 = vmin.u32 %v1767_v1, %v6730_v63  ;;  %4846 = vsinq.f32 %v3141_v4  ;;  %vm3397_vm9 = vcmp.lt.s32.totalorder %v3378_v39, 1  ;;  %vm3398_vm8 = vcmp.lt.s32.totalorder %v3378_v39, 2 }
 0x2e4   : > { %vm3399_vm11 = vcmp.lt.s32.totalorder %v3378_v39, 3  ;;  %vm3400_vm12 = vcmp.lt.s32.totalorder %v3378_v39, 4  ;;  %v3405_v34 = vsel %vm3397_vm9, %v3384_v15, %v3387_v56  ;;  %v3409_v37 = vsel %vm3397_vm9, %v3387_v56, %v3390_v0 }
 0x2e5   : > { %v1769_v51 = vclz %v4343_v50  ;;  %v3402_v23 = vsel %vm3400_vm12, %v3390_v0, 2102212464  ;;  %v3406_v40 = vsel %vm3400_vm12, %v3393_v31, 920167782  ;;  %v3401_v26 = vsel %vm3397_vm9, %v3381_v43, %v3384_v15 }
 0x2e6   : > { %v3407_v20 = vsel %vm3399_vm11, %v3390_v0, %v3406_v40  ;;  %v3410_v10 = vsel %vm3400_vm12, %v3396_v53, 1326507024  ;;  %v3403_v57 = vsel %vm3399_vm11, %v3387_v56, %v3402_v23  ;;  %v1601_v49 = vshrl.u32 %v1600_v9, 23 }
 0x2e7   : > { %v4344_v29 = vadd.s32 4294967294, %v1769_v51  ;;  %v3408_v48 = vsel %vm3398_vm8, %v3405_v34, %v3407_v20  ;;  %v3411_v22 = vsel %vm3399_vm11, %v3393_v31, %v3410_v10  ;;  %v1757_v54 = vadd.s32 %v6682_v17, %v6688_v2 }
 0x2e8   : > { %v3412_v30 = vsel %vm3398_vm8, %v3409_v37, %v3411_v22  ;;  %v6750_v60 = vmul.u32.u64.low %v3413_v42, %v3408_v48  ;;  %v6751_v58 = vmul.u32.u64.high %v3413_v42, %v3408_v48, %v6750_v60  ;;  %v3404_v41 = vsel %vm3398_vm8, %v3401_v26, %v3403_v57 }
 0x2e9   : > { %vm4345_vm10 = vcmp.lt.s32.totalorder %v4344_v29, 0  ;;  %v6756_v11 = vmul.u32.u64.low %v3413_v42, %v3412_v30  ;;  %v6757_v33 = vmul.u32.u64.high %v3413_v42, %v3412_v30, %v6756_v11  ;;  %v4338_v62 = vadd.s32 4294967169, %v1601_v49 }
 0x2ea   : > { %v1772_v36 = vsel %vm4345_vm10, 0, %v4344_v29  ;;  %v3147_v52 = vand.u32 3, %v6713_v24  ;;  %v1787_v3 = vsub.s32 4, %v6715_v46  ;;  %v1597_v27 = vand.u32 2147483647, %v6719_v32 }
 0x2eb   : > { %v1773_v38 = vsub.s32 32, %v1772_v36  ;;  %v1777_v55 = vsub.s32 4294967266, %v1772_v36  ;;  %v1774_v28 = vshll.u32 %v6730_v63, %v1772_v36  ;;  %vm3145_vm14 = vweird.f32 %v6467_v35  ;;  %v6772_v24 = vld [vmem:[%s7692_s2] ss:$0 sm:$0xff] }
 0x2ec   : > { %v3423_v47 = vadd.s32 1, %v6751_v58  ;;  %v1607_v15 = vadd.s32 1, %v4338_v62  ;;  %vm1703_vm13 = vcmp.lt.s32.totalorder %v6548_v45, 0  ;;  %v3420_v39 = vmul.u32 %v3413_v42, %v3404_v41 }
 0x2ed   : > { %v1775_v17 = vshrl.u32 %v1757_v54, %v1773_v38  ;;  %v1778_v2 = vadd.s32 127, %v1777_v55  ;;  %vm3422_vm15 = vc.u32 %v6757_v33, %v6750_v60  ;;  %v6775_v63 = vadd.f32 %v6772_v24, %v528_v13 }
 0x2ee   : > { %v3424_v21 = vsel %vm3422_vm15, %v3423_v47, %v6751_v58  ;;  %vm1608_vm1 = vcmp.gt.s32.totalorder %v1607_v15, 0  ;;  %vm3152_vm2 = vcmp.eq.s32.totalorder %v3147_v52, 2  ;;  %vm6780_vm3 = vcmp.le.f32.partialorder %v1701_v44, 0.7853982 }
 0x2ef   : > { %v1776_v5 = vor.u32 %v1775_v17, %v1774_v28  ;;  %v1779_v6 = vshll.u32 %v1778_v2, 23  ;;  %v4845_v1 = vpop.eup %4844  ;;  %v3425_v0 = vadd.s32 %v3424_v21, %v3420_v39  ;;  %v1609_v4 = vsel %vm1608_vm1, %v1607_v15, 0 }
 0x2f0   : > { %v4847_v31 = vpop.eup %4846  ;;  %v3153_v59 = vxor.u32 2147483648, %v4845_v1  ;;  %v6787_v50 = vsel %vm1703_vm13, %v1787_v3, %v6715_v46  ;;  %v1604_v42 = vand.u32 8388607, %v1597_v27  ;;  %v1611_v53 = vand.u32 31, %v1609_v4 }
 0x2f1   : > { %v1780_v7 = vor.u32 4788187, %v1779_v6  ;;  %v3150_v9 = vxor.u32 2147483648, %v4847_v31  ;;  %v3426_v43 = vadd.s32 536870912, %v3425_v0  ;;  %v3264_v44 = vand.u32 2139095040, %v6775_v63 }
 0x2f2   : > { %vm3149_vm4 = vcmp.eq.s32.totalorder %v3147_v52, 0  ;;  %v3154_v51 = vsel %vm3152_vm2, %v3153_v59, %v4847_v31  ;;  %v1783_v34 = vcvt.s32.f32 %v1776_v5  ;;  %vm3148_vm5 = vcmp.lt.s32.totalorder %v3147_v52, 2 }
 0x2f3   : > { %v1781_v23 = vand.u32 2147483647, %v1780_v7  ;;  %v3151_v40 = vsel %vm3149_vm4, %v4845_v1, %v3150_v9  ;;  %v6792_v37 = vshrl.u32 %v3426_v43, 30  ;;  %v1612_v29 = vsub.s32 32, %v1611_v53 }
 0x2f4   : > { %v3155_v46 = vsel %vm3148_vm5, %v3151_v40, %v3154_v51  ;;  %v1790_v20 = vsel %vm6780_vm3, 0, %v6787_v50  ;;  %v1605_v10 = vor.u32 8388608, %v1604_v42  ;;  %v1614_v22 = vshll.u32 %v4989_v8, %v1611_v53 }
 0x2f5   : > { %v1784_v26 = vmul.f32 %v1783_v34, %v1781_v23  ;;  %v3156_v57 = vsel %vm3145_vm14, nan, %v3155_v46  ;;  %v3428_v48 = vshll.u32 %v6792_v37, 30  ;;  %v3265_v49 = vshrl.u32 %v3264_v44, 23 }
 0x2f6   : > { %3910 = vst.msk [vmem:[%s5437_s12 + $0xc0] sm:$0xff] %vm3885_vm0, %v3156_v57  ;;  %v1615_v58 = vshrl.u32 %v4990_v12, %v1612_v29  ;;  %v1618_v54 = vshrl.u32 %v4991_v14, %v1612_v29  ;;  %v1621_v36 = vshrl.u32 %v4992_v16, %v1612_v29  ;;  %v1617_v38 = vshll.u32 %v4990_v12, %v1611_v53 }
 0x2f7   : > { %v1785_v30 = vxor.u32 2147483648, %v1784_v26  ;;  %v6806_v11 = vsub.s32 %v3425_v0, %v3428_v48  ;;  %v1620_v35 = vshll.u32 %v4991_v14, %v1611_v53  ;;  %v1624_v55 = vshrl.u32 %v4993_v18, %v1612_v29 }
 0x2f8   : > { %v1610_v62 = vshrl.u32 %v1609_v4, 5  ;;  %v1616_v13 = vor.u32 %v1615_v58, %v1614_v22  ;;  %v1623_v52 = vshll.u32 %v4992_v16, %v1611_v53  ;;  %v1619_v17 = vor.u32 %v1618_v54, %v1617_v38 }
 0x2f9   : > { %v1786_v41 = vsel %vm1703_vm13, %v1785_v30, %v1784_v26  ;;  %v3431_v3 = vsub.s32 0, %v6806_v11  ;;  %v1622_v2 = vor.u32 %v1621_v36, %v1620_v35  ;;  %vm3367_vm6 = vcmp.lt.s32.totalorder %v6621_v61, 0 }
 0x2fa   : > { %v1789_v28 = vsel %vm6780_vm3, %v6548_v45, %v1786_v41  ;;  %v1625_v47 = vor.u32 %v1624_v55, %v1623_v52  ;;  %v1626_v15 = vshll.u32 %v4993_v18, %v1611_v53  ;;  %v1627_v39 = vshrl.u32 %v4994_v25, %v1612_v29 }
 0x2fb   : > { %4848 = vcosq.f32 %v1789_v28  ;;  %v4407_v5 = vmin.u32 %v3431_v3, %v6806_v11  ;;  %v1645_v6 = vshll.u32 %v1605_v10, 8  ;;  %v4402_v21 = vadd.s32 4294967169, %v3265_v49 }
 0x2fc   : > { %4850 = vsinq.f32 %v1789_v28  ;;  %v1613_v1 = vshrl.u32 %v4989_v8, %v1612_v29  ;;  %v1628_v56 = vor.u32 %v1627_v39, %v1626_v15  ;;  %vm1629_vm7 = vcmp.lt.s32.totalorder %v1610_v62, 1  ;;  %v4510_v39 = vpop.f32.mrf.mxu0 }
 0x2fd   : > { %vm1630_vm9 = vcmp.lt.s32.totalorder %v1610_v62, 2  ;;  %v3433_v0 = vclz %v4407_v5  ;;  %vm1631_vm8 = vcmp.lt.s32.totalorder %v1610_v62, 3  ;;  %vm1632_vm11 = vcmp.lt.s32.totalorder %v1610_v62, 4 }
 0x2fe   : > { %v1637_v4 = vsel %vm1629_vm7, %v1616_v13, %v1619_v17  ;;  %v1634_v31 = vsel %vm1632_vm11, %v1622_v2, 2102212464  ;;  %v1638_v59 = vsel %vm1632_vm11, %v1625_v47, 920167782  ;;  %v1641_v7 = vsel %vm1629_vm7, %v1619_v17, %v1622_v2 }
 0x2ff   : > { %v1642_v50 = vsel %vm1632_vm11, %v1628_v56, 1326507024  ;;  %v4408_v42 = vadd.s32 4294967294, %v3433_v0  ;;  %v3451_v9 = vsub.s32 4, %v6792_v37  ;;  %v1639_v43 = vsel %vm1631_vm8, %v1622_v2, %v1638_v59 }
 0x300   : > { %v1643_v53 = vsel %vm1631_vm8, %v1625_v47, %v1642_v50  ;;  %v1794_v44 = vadd.s32 3, %v1790_v20  ;;  %v1633_v51 = vsel %vm1629_vm7, %v1613_v1, %v1616_v13  ;;  %v1640_v23 = vsel %vm1630_vm9, %v1637_v4, %v1639_v43 }
 0x301   : > { %v1644_v34 = vsel %vm1630_vm9, %v1641_v7, %v1643_v53  ;;  %vm4409_vm12 = vcmp.lt.s32.totalorder %v4408_v42, 0  ;;  %v1635_v40 = vsel %vm1631_vm8, %v1619_v17, %v1634_v31  ;;  %v3271_v48 = vadd.s32 1, %v4402_v21 }
 0x302   : > { %v6829_v29 = vmul.u32.u64.low %v1645_v6, %v1644_v34  ;;  %v6830_v46 = vmul.u32.u64.high %v1645_v6, %v1644_v34, %v6829_v29  ;;  %v3436_v26 = vsel %vm4409_vm12, 0, %v4408_v42  ;;  %v3421_v20 = vadd.s32 %v6750_v60, %v6757_v33 }
 0x303   : > { %v6832_v10 = vmul.u32.u64.low %v1645_v6, %v1640_v23  ;;  %v6833_v57 = vmul.u32.u64.high %v1645_v6, %v1640_v23, %v6832_v10  ;;  %v3437_v22 = vsub.s32 32, %v3436_v26  ;;  %v3441_v49 = vsub.s32 4294967266, %v3436_v26 }
 0x304   : > { %v3452_v30 = vsel %vm3367_vm6, %v3451_v9, %v6792_v37  ;;  %vm1793_vm10 = vweird.f32 %v6548_v45  ;;  %v1795_v58 = vand.u32 3, %v1794_v44  ;;  %vm6844_vm14 = vcmp.le.f32.partialorder %v3365_v19, 0.7853982 }
 0x305   : > { %v1636_v36 = vsel %vm1630_vm9, %v1633_v51, %v1635_v40  ;;  %vm3272_vm13 = vcmp.gt.s32.totalorder %v3271_v48, 0  ;;  %v3438_v60 = vshll.u32 %v6806_v11, %v3436_v26  ;;  %v3439_v33 = vshrl.u32 %v3421_v20, %v3437_v22 }
 0x306   : > { %v3442_v38 = vadd.s32 127, %v3441_v49  ;;  %vm1654_vm15 = vc.u32 %v6830_v46, %v6832_v10  ;;  %v3454_v37 = vsel %vm6844_vm14, 0, %v3452_v30  ;;  %v1655_v35 = vadd.s32 1, %v6833_v57 }
 0x307   : > { %v3261_v19 = vand.u32 2147483647, %v6775_v63  ;;  %v3273_v55 = vsel %vm3272_vm13, %v3271_v48, 0  ;;  %v3440_v13 = vor.u32 %v3439_v33, %v3438_v60  ;;  %v1652_v52 = vmul.u32 %v1645_v6, %v1636_v36 }
 0x308   : > { %v4849_v41 = vpop.eup %4848  ;;  %v3443_v62 = vshll.u32 %v3442_v38, 23  ;;  %v3275_v28 = vand.u32 31, %v3273_v55  ;;  %vm1796_vm1 = vcmp.lt.s32.totalorder %v1795_v58, 2  ;;  %vm1797_vm2 = vcmp.eq.s32.totalorder %v1795_v58, 0 }
 0x309   : > { %v4851_v3 = vpop.eup %4850  ;;  %v1801_v11 = vxor.u32 2147483648, %v4849_v41  ;;  %v1656_v17 = vsel %vm1654_vm15, %v1655_v35, %v6833_v57  ;;  %vm1800_vm3 = vcmp.eq.s32.totalorder %v1795_v58, 2  ;;  %v3458_v21 = vadd.s32 3, %v3454_v37 }
 0x30a   : > { %v1798_v2 = vxor.u32 2147483648, %v4851_v3  ;;  %v3444_v47 = vor.u32 4788187, %v3443_v62  ;;  %v1657_v15 = vadd.s32 %v1656_v17, %v1652_v52  ;;  %v3268_v1 = vand.u32 8388607, %v3261_v19 }
 0x30b   : > { %v1802_v5 = vsel %vm1800_vm3, %v1801_v11, %v4851_v3  ;;  %v3276_v56 = vsub.s32 32, %v3275_v28  ;;  %v3447_v4 = vcvt.s32.f32 %v3440_v13  ;;  %v6863_v42 = vadd.f32 %v6772_v24, %v4510_v39 }
 0x30c   : > { %v1799_v6 = vsel %vm1797_vm2, %v4849_v41, %v1798_v2  ;;  %v3445_v0 = vand.u32 2147483647, %v3444_v47  ;;  %v1658_v31 = vadd.s32 536870912, %v1657_v15  ;;  %v3274_v51 = vshrl.u32 %v3273_v55, 5 }
 0x30d   : > { %v1803_v59 = vsel %vm1796_vm1, %v1799_v6, %v1802_v5  ;;  %v3279_v7 = vshrl.u32 %v4990_v12, %v3276_v56  ;;  %v3282_v50 = vshrl.u32 %v4991_v14, %v3276_v56  ;;  %v3285_v44 = vshrl.u32 %v4992_v16, %v3276_v56  ;;  %v4534_v6 = vpop.f32.mrf.mxu1 }
 0x30e   : > { %v1804_v9 = vsel %vm1793_vm10, nan, %v1803_v59  ;;  %v3448_v43 = vmul.f32 %v3447_v4, %v3445_v0  ;;  %v6867_v53 = vshrl.u32 %v1658_v31, 30  ;;  %v3278_v23 = vshll.u32 %v4989_v8, %v3275_v28 }
 0x30f   : > { %3897 = vst.msk [vmem:[%s5437_s12 + $0x58] sm:$0xff] %vm3885_vm0, %v1804_v9  ;;  %v3281_v34 = vshll.u32 %v4990_v12, %v3275_v28  ;;  %v3288_v40 = vshrl.u32 %v4993_v18, %v3276_v56  ;;  %v3284_v45 = vshll.u32 %v4991_v14, %v3275_v28  ;;  %v3287_v57 = vshll.u32 %v4992_v16, %v3275_v28 }
 0x310   : > { %v3449_v29 = vxor.u32 2147483648, %v3448_v43  ;;  %v1660_v26 = vshll.u32 %v6867_v53, 30  ;;  %v3280_v48 = vor.u32 %v3279_v7, %v3278_v23  ;;  %v3290_v22 = vshll.u32 %v4993_v18, %v3275_v28 }
 0x311   : > { %v3283_v20 = vor.u32 %v3282_v50, %v3281_v34  ;;  %v3291_v49 = vshrl.u32 %v4994_v25, %v3276_v56  ;;  %v3286_v36 = vor.u32 %v3285_v44, %v3284_v45  ;;  %v3289_v60 = vor.u32 %v3288_v40, %v3287_v57 }
 0x312   : > { %v3450_v30 = vsel %vm3367_vm6, %v3449_v29, %v3448_v43  ;;  %v6882_v58 = vsub.s32 %v1657_v15, %v1660_v26  ;;  %v6887_v38 = vand.u32 3, %v3458_v21  ;;  %v3269_v37 = vor.u32 8388608, %v3268_v1 }
 0x313   : > { %v3453_v33 = vsel %vm6844_vm14, %v6621_v61, %v3450_v30  ;;  %v3292_v35 = vor.u32 %v3291_v49, %v3290_v22  ;;  %v3277_v41 = vshrl.u32 %v4989_v8, %v3276_v56  ;;  %v1912_v13 = vand.u32 2139095040, %v6863_v42 }
 0x314   : > { %4852 = vcosq.f32 %v3453_v33  ;;  %v1663_v55 = vsub.s32 0, %v6882_v58  ;;  %vm3293_vm4 = vcmp.lt.s32.totalorder %v3274_v51, 1  ;;  %vm3295_vm5 = vcmp.lt.s32.totalorder %v3274_v51, 3 }
 0x315   : > { %4854 = vsinq.f32 %v3453_v33  ;;  %vm3296_vm6 = vcmp.lt.s32.totalorder %v3274_v51, 4  ;;  %v3301_v54 = vsel %vm3293_vm4, %v3280_v48, %v3283_v20  ;;  %v3305_v11 = vsel %vm3293_vm4, %v3283_v20, %v3286_v36 }
 0x316   : > { %v4339_v62 = vmin.u32 %v1663_v55, %v6882_v58  ;;  %v3298_v52 = vsel %vm3296_vm6, %v3286_v36, 2102212464  ;;  %v3302_v28 = vsel %vm3296_vm6, %v3289_v60, 920167782  ;;  %v3306_v17 = vsel %vm3296_vm6, %v3292_v35, 1326507024 }
 0x317   : > { %v3303_v3 = vsel %vm3295_vm5, %v3286_v36, %v3302_v28  ;;  %v3309_v2 = vshll.u32 %v3269_v37, 8  ;;  %v1683_v15 = vsub.s32 4, %v6867_v53  ;;  %vm3294_vm7 = vcmp.lt.s32.totalorder %v3274_v51, 2 }
 0x318   : > { %v1665_v47 = vclz %v4339_v62  ;;  %v3297_v39 = vsel %vm3293_vm4, %v3277_v41, %v3280_v48  ;;  %v3299_v5 = vsel %vm3295_vm5, %v3283_v20, %v3298_v52  ;;  %v3304_v21 = vsel %vm3294_vm7, %v3301_v54, %v3303_v3 }
 0x319   : > { %v3307_v1 = vsel %vm3295_vm5, %v3289_v60, %v3306_v17  ;;  %v1913_v56 = vshrl.u32 %v1912_v13, 23  ;;  %v6897_v31 = vmul.u32.u64.low %v3309_v2, %v3304_v21  ;;  %v6898_v59 = vmul.u32.u64.high %v3309_v2, %v3304_v21, %v6897_v31 }
 0x31a   : > { %v4340_v0 = vadd.s32 4294967294, %v1665_v47  ;;  %v3308_v4 = vsel %vm3294_vm7, %v3305_v11, %v3307_v1  ;;  %vm1599_vm9 = vcmp.lt.s32.totalorder %v6719_v32, 0  ;;  %vm6906_vm8 = vcmp.le.f32.partialorder %v1597_v27, 0.7853982 }
 0x31b   : > { %v6901_v7 = vmul.u32.u64.low %v3309_v2, %v3308_v4  ;;  %v6902_v50 = vmul.u32.u64.high %v3309_v2, %v3308_v4, %v6901_v7  ;;  %v4350_v9 = vadd.s32 4294967169, %v1913_v56  ;;  %v3300_v44 = vsel %vm3294_vm7, %v3297_v39, %v3299_v5 }
 0x31c   : > { %vm4341_vm11 = vcmp.lt.s32.totalorder %v4340_v0, 0  ;;  %v6911_v51 = vadd.f32 %v6772_v24, %v4534_v6  ;;  %vm3460_vm12 = vcmp.lt.s32.totalorder %v6887_v38, 2  ;;  %v1653_v23 = vadd.s32 %v6832_v10, %v6830_v46 }
 0x31d   : > { %v1668_v34 = vsel %vm4341_vm11, 0, %v4340_v0  ;;  %v1909_v40 = vand.u32 2147483647, %v6863_v42  ;;  %v1919_v29 = vadd.s32 1, %v4350_v9  ;;  %vm3457_vm10 = vweird.f32 %v6621_v61 }
 0x31e   : > { %v1669_v27 = vsub.s32 32, %v1668_v34  ;;  %v1673_v26 = vsub.s32 4294967266, %v1668_v34  ;;  %v1684_v45 = vsel %vm1599_vm9, %v1683_v15, %v6867_v53  ;;  %v3319_v57 = vadd.s32 1, %v6898_v59 }
 0x31f   : > { %v1670_v48 = vshll.u32 %v6882_v58, %v1668_v34  ;;  %v3316_v20 = vmul.u32 %v3309_v2, %v3300_v44  ;;  %vm3318_vm14 = vc.u32 %v6902_v50, %v6897_v31  ;;  %vm1920_vm13 = vcmp.gt.s32.totalorder %v1919_v29, 0 }
 0x320   : > { %v1671_v46 = vshrl.u32 %v1653_v23, %v1669_v27  ;;  %v1674_v10 = vadd.s32 127, %v1673_v26  ;;  %v3320_v22 = vsel %vm3318_vm14, %v3319_v57, %v6898_v59  ;;  %v1921_v49 = vsel %vm1920_vm13, %v1919_v29, 0 }
 0x321   : > { %v4853_v30 = vpop.eup %4852  ;;  %v1686_v36 = vsel %vm6906_vm8, 0, %v1684_v45  ;;  %v3321_v60 = vadd.s32 %v3320_v22, %v3316_v20  ;;  %v1916_v53 = vand.u32 8388607, %v1909_v40  ;;  %v1923_v33 = vand.u32 31, %v1921_v49 }
 0x322   : > { %v4855_v37 = vpop.eup %4854  ;;  %vm3461_vm15 = vcmp.eq.s32.totalorder %v6887_v38, 0  ;;  %v3465_v58 = vxor.u32 2147483648, %v4853_v30  ;;  %v1672_v35 = vor.u32 %v1671_v46, %v1670_v48  ;;  %v1675_v55 = vshll.u32 %v1674_v10, 23 }
 0x323   : > { %v3462_v41 = vxor.u32 2147483648, %v4855_v37  ;;  %vm3464_vm1 = vcmp.eq.s32.totalorder %v6887_v38, 2  ;;  %v3322_v13 = vadd.s32 536870912, %v3321_v60  ;;  %v1924_v62 = vsub.s32 32, %v1923_v33 }
 0x324   : > { %v3466_v52 = vsel %vm3464_vm1, %v3465_v58, %v4855_v37  ;;  %v1676_v54 = vor.u32 4788187, %v1675_v55  ;;  %v6931_v28 = vadd.s32 3, %v1686_v36  ;;  %v3573_v3 = vand.u32 2147483647, %v6911_v51 }
 0x325   : > { %v3463_v11 = vsel %vm3461_vm15, %v4853_v30, %v3462_v41  ;;  %v3323_v17 = vshrl.u32 %v3322_v13, 30  ;;  %v1917_v2 = vor.u32 8388608, %v1916_v53  ;;  %v3576_v47 = vand.u32 2139095040, %v6911_v51 }
 0x326   : > { %v3467_v15 = vsel %vm3460_vm12, %v3463_v11, %v3466_v52  ;;  %v1677_v39 = vand.u32 2147483647, %v1676_v54  ;;  %v1679_v5 = vcvt.s32.f32 %v1672_v35  ;;  %v1927_v21 = vshrl.u32 %v4990_v12, %v1924_v62 }
 0x327   : > { %v3468_v1 = vsel %vm3457_vm10, nan, %v3467_v15  ;;  %v6941_v56 = vadd.s32 %v6897_v31, %v6902_v50  ;;  %v3324_v6 = vshll.u32 %v3323_v17, 30  ;;  %v1930_v0 = vshrl.u32 %v4991_v14, %v1924_v62 }
 0x328   : > { %3913 = vst.msk [vmem:[%s5437_s12 + $0xd8] sm:$0xff] %vm3885_vm0, %v3468_v1  ;;  %v1680_v4 = vmul.f32 %v1679_v5, %v1677_v39  ;;  %v1922_v59 = vshrl.u32 %v1921_v49, 5  ;;  %v1926_v38 = vshll.u32 %v4989_v8, %v1923_v33  ;;  %v1933_v7 = vshrl.u32 %v4992_v16, %v1924_v62 }
 0x329   : > { %v6948_v9 = vsub.s32 %v3321_v60, %v3324_v6  ;;  %v1929_v44 = vshll.u32 %v4990_v12, %v1923_v33  ;;  %v1932_v61 = vshll.u32 %v4991_v14, %v1923_v33  ;;  %v1936_v31 = vshrl.u32 %v4993_v18, %v1924_v62 }
 0x32a   : > { %v1681_v50 = vxor.u32 2147483648, %v1680_v4  ;;  %v1928_v23 = vor.u32 %v1927_v21, %v1926_v38  ;;  %v1935_v34 = vshll.u32 %v4992_v16, %v1923_v33  ;;  %v1939_v29 = vshrl.u32 %v4994_v25, %v1924_v62 }
 0x32b   : > { %vm3263_vm2 = vcmp.lt.s32.totalorder %v6775_v63, 0  ;;  %v3327_v27 = vsub.s32 0, %v6948_v9  ;;  %v1931_v26 = vor.u32 %v1930_v0, %v1929_v44  ;;  %v1934_v45 = vor.u32 %v1933_v7, %v1932_v61 }
 0x32c   : > { %v1938_v57 = vshll.u32 %v4993_v18, %v1923_v33  ;;  %v1682_v48 = vsel %vm1599_vm9, %v1681_v50, %v1680_v4  ;;  %v1937_v20 = vor.u32 %v1936_v31, %v1935_v34  ;;  %v1957_v46 = vshll.u32 %v1917_v2, 8 }
 0x32d   : > { %v3577_v10 = vshrl.u32 %v3576_v47, 23  ;;  %v1685_v22 = vsel %vm6906_vm8, %v6719_v32, %v1682_v48  ;;  %v4403_v49 = vmin.u32 %v3327_v27, %v6948_v9  ;;  %v1925_v30 = vshrl.u32 %v4989_v8, %v1924_v62 }
 0x32e   : > { %v1940_v36 = vor.u32 %v1939_v29, %v1938_v57  ;;  %4856 = vcosq.f32 %v1685_v22  ;;  %v3347_v60 = vsub.s32 4, %v3323_v17  ;;  %vm1941_vm3 = vcmp.lt.s32.totalorder %v1922_v59, 1 }
 0x32f   : > { %vm1944_vm4 = vcmp.lt.s32.totalorder %v1922_v59, 4  ;;  %4858 = vsinq.f32 %v1685_v22  ;;  %v3329_v53 = vclz %v4403_v49  ;;  %v1949_v37 = vsel %vm1941_vm3, %v1928_v23, %v1931_v26 }
 0x330   : > { %v1946_v33 = vsel %vm1944_vm4, %v1934_v45, 2102212464  ;;  %vm1942_vm5 = vcmp.lt.s32.totalorder %v1922_v59, 2  ;;  %vm1943_vm6 = vcmp.lt.s32.totalorder %v1922_v59, 3  ;;  %v1950_v58 = vsel %vm1944_vm4, %v1937_v20, 920167782 }
 0x331   : > { %v1953_v35 = vsel %vm1941_vm3, %v1931_v26, %v1934_v45  ;;  %v4404_v55 = vadd.s32 4294967294, %v3329_v53  ;;  %v1945_v43 = vsel %vm1941_vm3, %v1925_v30, %v1928_v23  ;;  %v1951_v41 = vsel %vm1943_vm6, %v1934_v45, %v1950_v58 }
 0x332   : > { %v1954_v13 = vsel %vm1944_vm4, %v1940_v36, 1326507024  ;;  %v1947_v52 = vsel %vm1943_vm6, %v1931_v26, %v1946_v33  ;;  %v1952_v62 = vsel %vm1942_vm5, %v1949_v37, %v1951_v41  ;;  %v4414_v11 = vadd.s32 4294967169, %v3577_v10 }
 0x333   : > { %v1955_v54 = vsel %vm1943_vm6, %v1937_v20, %v1954_v13  ;;  %vm4405_vm7 = vcmp.lt.s32.totalorder %v4404_v55, 0  ;;  %v6967_v47 = vmul.u32.u64.low %v1957_v46, %v1952_v62  ;;  %v6968_v15 = vmul.u32.u64.high %v1957_v46, %v1952_v62, %v6967_v47 }
 0x334   : > { %v1956_v2 = vsel %vm1942_vm5, %v1953_v35, %v1955_v54  ;;  %v3332_v39 = vsel %vm4405_vm7, 0, %v4404_v55  ;;  %v3348_v5 = vsel %vm3263_vm2, %v3347_v60, %v3323_v17  ;;  %v1948_v4 = vsel %vm1942_vm5, %v1945_v43, %v1947_v52 }
 0x335   : > { %v6973_v21 = vmul.u32.u64.low %v1957_v46, %v1956_v2  ;;  %v6974_v1 = vmul.u32.u64.high %v1957_v46, %v1956_v2, %v6973_v21  ;;  %v3333_v6 = vsub.s32 32, %v3332_v39  ;;  %v3337_v0 = vsub.s32 4294967266, %v3332_v39 }
 0x336   : > { %v3583_v38 = vadd.s32 1, %v4414_v11  ;;  %v1691_v7 = vand.u32 3, %v6931_v28  ;;  %vm6980_vm9 = vcmp.le.f32.partialorder %v3261_v19, 0.7853982  ;;  %v3334_v61 = vshll.u32 %v6948_v9, %v3332_v39  ;;  %v458_v39 = vpop.f32.mrf.mxu0 }
 0x337   : > { %v3335_v17 = vshrl.u32 %v6941_v56, %v3333_v6  ;;  %v3338_v31 = vadd.s32 127, %v3337_v0  ;;  %v1967_v50 = vadd.s32 1, %v6968_v15  ;;  %v3350_v59 = vsel %vm6980_vm9, 0, %v3348_v5 }
 0x338   : > { %vm3584_vm8 = vcmp.gt.s32.totalorder %v3583_v38, 0  ;;  %v1964_v23 = vmul.u32 %v1957_v46, %v1948_v4  ;;  %vm1966_vm11 = vc.u32 %v6974_v1, %v6967_v47  ;;  %v3580_v9 = vand.u32 8388607, %v3573_v3 }
 0x339   : > { %v3585_v28 = vsel %vm3584_vm8, %v3583_v38, 0  ;;  %v3336_v19 = vor.u32 %v3335_v17, %v3334_v61  ;;  %v3339_v34 = vshll.u32 %v3338_v31, 23  ;;  %v1968_v29 = vsel %vm1966_vm11, %v1967_v50, %v6968_v15 }
 0x33a   : > { %vm1689_vm12 = vweird.f32 %v6719_v32  ;;  %v1969_v56 = vadd.s32 %v1968_v29, %v1964_v23  ;;  %v3587_v27 = vand.u32 31, %v3585_v28  ;;  %vm1692_vm10 = vcmp.lt.s32.totalorder %v1691_v7, 2 }
 0x33b   : > { %v4857_v26 = vpop.eup %4856  ;;  %vm1693_vm14 = vcmp.eq.s32.totalorder %v1691_v7, 0  ;;  %vm1696_vm13 = vcmp.eq.s32.totalorder %v1691_v7, 2  ;;  %v3340_v45 = vor.u32 4788187, %v3339_v34  ;;  %v6995_v20 = vadd.s32 3, %v3350_v59 }
 0x33c   : > { %v4859_v57 = vpop.eup %4858  ;;  %v1697_v48 = vxor.u32 2147483648, %v4857_v26  ;;  %v1970_v46 = vadd.s32 536870912, %v1969_v56  ;;  %v3588_v10 = vsub.s32 32, %v3587_v27  ;;  %v3343_v30 = vcvt.s32.f32 %v3336_v19 }
 0x33d   : > { %v1694_v22 = vxor.u32 2147483648, %v4859_v57  ;;  %v3341_v49 = vand.u32 2147483647, %v3340_v45  ;;  %v3581_v36 = vor.u32 8388608, %v3580_v9  ;;  %v3590_v33 = vshll.u32 %v4989_v8, %v3587_v27 }
 0x33e   : > { %v1698_v60 = vsel %vm1696_vm13, %v1697_v48, %v4859_v57  ;;  %v1971_v53 = vshrl.u32 %v1970_v46, 30  ;;  %v3591_v37 = vshrl.u32 %v4990_v12, %v3588_v10  ;;  %v3594_v55 = vshrl.u32 %v4991_v14, %v3588_v10 }
 0x33f   : > { %v1695_v58 = vsel %vm1693_vm14, %v4857_v26, %v1694_v22  ;;  %v3344_v35 = vmul.f32 %v3343_v30, %v3341_v49  ;;  %v3597_v43 = vshrl.u32 %v4992_v16, %v3588_v10  ;;  %v3586_v52 = vshrl.u32 %v3585_v28, 5  ;;  %v538_v30 = vpop.f32.mrf.mxu1 }
 0x340   : > { %v1699_v41 = vsel %vm1692_vm10, %v1695_v58, %v1698_v60  ;;  %v1972_v13 = vshll.u32 %v1971_v53, 30  ;;  %v3593_v62 = vshll.u32 %v4990_v12, %v3587_v27  ;;  %vm1911_vm15 = vcmp.lt.s32.totalorder %v6863_v42, 0 }
 0x341   : > { %v1700_v54 = vsel %vm1689_vm12, nan, %v1699_v41  ;;  %v3345_v11 = vxor.u32 2147483648, %v3344_v35  ;;  %v3592_v2 = vor.u32 %v3591_v37, %v3590_v33  ;;  %v3596_v15 = vshll.u32 %v4991_v14, %v3587_v27 }
 0x342   : > { %3896 = vst.msk [vmem:[%s5437_s12 + $0x50] sm:$0xff] %vm3885_vm0, %v1700_v54  ;;  %v7010_v5 = vsub.s32 %v1969_v56, %v1972_v13  ;;  %v3595_v21 = vor.u32 %v3594_v55, %v3593_v62  ;;  %v3599_v6 = vshll.u32 %v4992_v16, %v3587_v27  ;;  %v3600_v0 = vshrl.u32 %v4993_v18, %v3588_v10 }
 0x343   : > { %v3346_v32 = vsel %vm3263_vm2, %v3345_v11, %v3344_v35  ;;  %v3598_v4 = vor.u32 %v3597_v43, %v3596_v15  ;;  %v3602_v38 = vshll.u32 %v4993_v18, %v3587_v27  ;;  %v3603_v7 = vshrl.u32 %v4994_v25, %v3588_v10 }
 0x344   : > { %v3349_v61 = vsel %vm6980_vm9, %v6775_v63, %v3346_v32  ;;  %v1975_v17 = vsub.s32 0, %v7010_v5  ;;  %v3601_v31 = vor.u32 %v3600_v0, %v3599_v6  ;;  %v7023_v50 = vadd.f32 %v6772_v24, %v458_v39 }
 0x345   : > { %4860 = vcosq.f32 %v3349_v61  ;;  %v3589_v59 = vshrl.u32 %v4989_v8, %v3588_v10  ;;  %v3604_v23 = vor.u32 %v3603_v7, %v3602_v38  ;;  %vm3605_vm1 = vcmp.lt.s32.totalorder %v3586_v52, 1 }
 0x346   : > { %4862 = vsinq.f32 %v3349_v61  ;;  %v4351_v28 = vmin.u32 %v1975_v17, %v7010_v5  ;;  %v1995_v19 = vsub.s32 4, %v1971_v53  ;;  %vm3608_vm2 = vcmp.lt.s32.totalorder %v3586_v52, 4 }
 0x347   : > { %v3610_v34 = vsel %vm3608_vm2, %v3598_v4, 2102212464  ;;  %v3613_v29 = vsel %vm3605_vm1, %v3592_v2, %v3595_v21  ;;  %v3614_v44 = vsel %vm3608_vm2, %v3601_v31, 920167782  ;;  %v3621_v9 = vshll.u32 %v3581_v36, 8 }
 0x348   : > { %v1977_v56 = vclz %v4351_v28  ;;  %vm3607_vm3 = vcmp.lt.s32.totalorder %v3586_v52, 3  ;;  %v3609_v27 = vsel %vm3605_vm1, %v3589_v59, %v3592_v2  ;;  %v3617_v26 = vsel %vm3605_vm1, %v3595_v21, %v3598_v4 }
 0x349   : > { %vm3606_vm4 = vcmp.lt.s32.totalorder %v3586_v52, 2  ;;  %v3611_v45 = vsel %vm3607_vm3, %v3595_v21, %v3610_v34  ;;  %v3615_v57 = vsel %vm3607_vm3, %v3598_v4, %v3614_v44  ;;  %v3618_v48 = vsel %vm3608_vm2, %v3604_v23, 1326507024 }
 0x34a   : > { %v4352_v46 = vadd.s32 4294967294, %v1977_v56  ;;  %v1996_v10 = vsel %vm1911_vm15, %v1995_v19, %v1971_v53  ;;  %v3616_v22 = vsel %vm3606_vm4, %v3613_v29, %v3615_v57  ;;  %v3619_v49 = vsel %vm3607_vm3, %v3601_v31, %v3618_v48 }
 0x34b   : > { %v3612_v60 = vsel %vm3606_vm4, %v3609_v27, %v3611_v45  ;;  %v3620_v33 = vsel %vm3606_vm4, %v3617_v26, %v3619_v49  ;;  %v7029_v37 = vmul.u32.u64.low %v3621_v9, %v3616_v22  ;;  %v7030_v58 = vmul.u32.u64.high %v3621_v9, %v3616_v22, %v7029_v37 }
 0x34c   : > { %vm4353_vm5 = vcmp.lt.s32.totalorder %v4352_v46, 0  ;;  %v7033_v36 = vmul.u32.u64.low %v3621_v9, %v3620_v33  ;;  %v7034_v35 = vmul.u32.u64.high %v3621_v9, %v3620_v33, %v7033_v36  ;;  %v1808_v55 = vand.u32 2139095040, %v7023_v50 }
 0x34d   : > { %v3355_v43 = vand.u32 3, %v6995_v20  ;;  %vm7040_vm6 = vcmp.le.f32.partialorder %v1909_v40, 0.7853982  ;;  %v1980_v41 = vsel %vm4353_vm5, 0, %v4352_v46  ;;  %v7045_v13 = vadd.f32 %v6772_v24, %v538_v30 }
 0x34e   : > { %v1965_v52 = vadd.s32 %v6967_v47, %v6974_v1  ;;  %v1981_v62 = vsub.s32 32, %v1980_v41  ;;  %v1985_v54 = vsub.s32 4294967266, %v1980_v41  ;;  %v1809_v11 = vshrl.u32 %v1808_v55, 23 }
 0x34f   : > { %v1998_v2 = vsel %vm7040_vm6, 0, %v1996_v10  ;;  %v3628_v20 = vmul.u32 %v3621_v9, %v3612_v60  ;;  %v3631_v15 = vadd.s32 1, %v7030_v58  ;;  %v1805_v40 = vand.u32 2147483647, %v7023_v50 }
 0x350   : > { %v1982_v39 = vshll.u32 %v7010_v5, %v1980_v41  ;;  %v1983_v21 = vshrl.u32 %v1965_v52, %v1981_v62  ;;  %v1986_v6 = vadd.s32 127, %v1985_v54  ;;  %vm3630_vm7 = vc.u32 %v7034_v35, %v7029_v37 }
 0x351   : > { %vm3356_vm9 = vcmp.lt.s32.totalorder %v3355_v43, 2  ;;  %v3632_v24 = vsel %vm3630_vm7, %v3631_v15, %v7030_v58  ;;  %v4346_v47 = vadd.s32 4294967169, %v1809_v11  ;;  %v3472_v1 = vand.u32 2139095040, %v7045_v13 }
 0x352   : > { %v4861_v0 = vpop.eup %4860  ;;  %vm3357_vm8 = vcmp.eq.s32.totalorder %v3355_v43, 0  ;;  %v1984_v32 = vor.u32 %v1983_v21, %v1982_v39  ;;  %v1987_v4 = vshll.u32 %v1986_v6, 23  ;;  %v3633_v38 = vadd.s32 %v3632_v24, %v3628_v20 }
 0x353   : > { %v4863_v7 = vpop.eup %4862  ;;  %vm3360_vm11 = vcmp.eq.s32.totalorder %v3355_v43, 2  ;;  %v3361_v61 = vxor.u32 2147483648, %v4861_v0  ;;  %v2002_v5 = vadd.s32 3, %v1998_v2  ;;  %v1815_v17 = vadd.s32 1, %v4346_v47 }
 0x354   : > { %v3358_v31 = vxor.u32 2147483648, %v4863_v7  ;;  %v1988_v59 = vor.u32 4788187, %v1987_v4  ;;  %v3634_v23 = vadd.s32 536870912, %v3633_v38  ;;  %v1812_v28 = vand.u32 8388607, %v1805_v40 }
 0x355   : > { %v3362_v19 = vsel %vm3360_vm11, %v3361_v61, %v4863_v7  ;;  %v1991_v34 = vcvt.s32.f32 %v1984_v32  ;;  %vm1816_vm12 = vcmp.gt.s32.totalorder %v1815_v17, 0  ;;  %v3473_v29 = vshrl.u32 %v3472_v1, 23 }
 0x356   : > { %v3359_v44 = vsel %vm3357_vm8, %v4861_v0, %v3358_v31  ;;  %v1989_v9 = vand.u32 2147483647, %v1988_v59  ;;  %v3635_v56 = vshrl.u32 %v3634_v23, 30  ;;  %v1817_v27 = vsel %vm1816_vm12, %v1815_v17, 0 }
 0x357   : > { %vm3353_vm10 = vweird.f32 %v6775_v63  ;;  %v3363_v26 = vsel %vm3356_vm9, %v3359_v44, %v3362_v19  ;;  %v1819_v45 = vand.u32 31, %v1817_v27  ;;  %v7063_v46 = vand.u32 3, %v2002_v5 }
 0x358   : > { %v3364_v57 = vsel %vm3353_vm10, nan, %v3363_v26  ;;  %v1992_v48 = vmul.f32 %v1991_v34, %v1989_v9  ;;  %vm3575_vm14 = vcmp.lt.s32.totalorder %v6911_v51, 0  ;;  %v3636_v10 = vshll.u32 %v3635_v56, 30 }
 0x359   : > { %3912 = vst.msk [vmem:[%s5437_s12 + $0xd0] sm:$0xff] %vm3885_vm0, %v3364_v57  ;;  %v1813_v22 = vor.u32 8388608, %v1812_v28  ;;  %v1820_v49 = vsub.s32 32, %v1819_v45  ;;  %v3469_v30 = vand.u32 2147483647, %v7045_v13  ;;  %v4410_v60 = vadd.s32 4294967169, %v3473_v29 }
 0x35a   : > { %v1993_v33 = vxor.u32 2147483648, %v1992_v48  ;;  %v7069_v58 = vsub.s32 %v3633_v38, %v3636_v10  ;;  %v3659_v63 = vsub.s32 4, %v3635_v56  ;;  %v1818_v36 = vshrl.u32 %v1817_v27, 5 }
 0x35b   : > { %v1822_v55 = vshll.u32 %v4989_v8, %v1819_v45  ;;  %v1823_v43 = vshrl.u32 %v4990_v12, %v1820_v49  ;;  %v1825_v41 = vshll.u32 %v4990_v12, %v1819_v45  ;;  %v1826_v52 = vshrl.u32 %v4991_v14, %v1820_v49 }
 0x35c   : > { %v1994_v62 = vsel %vm1911_vm15, %v1993_v33, %v1992_v48  ;;  %vm7079_vm13 = vcmp.le.f32.partialorder %v3573_v3, 0.7853982  ;;  %v3639_v11 = vsub.s32 0, %v7069_v58  ;;  %v1828_v2 = vshll.u32 %v4991_v14, %v1819_v45 }
 0x35d   : > { %v1829_v20 = vshrl.u32 %v4992_v16, %v1820_v49  ;;  %v1997_v15 = vsel %vm7040_vm6, %v6863_v42, %v1994_v62  ;;  %v1824_v39 = vor.u32 %v1823_v43, %v1822_v55  ;;  %v1831_v21 = vshll.u32 %v4992_v16, %v1819_v45 }
 0x35e   : > { %v1832_v6 = vshrl.u32 %v4993_v18, %v1820_v49  ;;  %4864 = vcosq.f32 %v1997_v15  ;;  %v4415_v3 = vmin.u32 %v3639_v11, %v7069_v58  ;;  %v1827_v24 = vor.u32 %v1826_v52, %v1825_v41 }
 0x35f   : > { %v1830_v47 = vor.u32 %v1829_v20, %v1828_v2  ;;  %4866 = vsinq.f32 %v1997_v15  ;;  %v1834_v0 = vshll.u32 %v4993_v18, %v1819_v45  ;;  %v1835_v32 = vshrl.u32 %v4994_v25, %v1820_v49 }
 0x360   : > { %v1833_v1 = vor.u32 %v1832_v6, %v1831_v21  ;;  %v3629_v53 = vadd.s32 %v7029_v37, %v7034_v35  ;;  %v3641_v4 = vclz %v4415_v3  ;;  %v1853_v38 = vshll.u32 %v1813_v22, 8 }
 0x361   : > { %v3479_v7 = vadd.s32 1, %v4410_v60  ;;  %v3660_v61 = vsel %vm3575_vm14, %v3659_v63, %v3635_v56  ;;  %v1821_v5 = vshrl.u32 %v4989_v8, %v1820_v49  ;;  %v1836_v17 = vor.u32 %v1835_v32, %v1834_v0 }
 0x362   : > { %vm1837_vm15 = vcmp.lt.s32.totalorder %v1818_v36, 1  ;;  %v4416_v31 = vadd.s32 4294967294, %v3641_v4  ;;  %vm1839_vm1 = vcmp.lt.s32.totalorder %v1818_v36, 3  ;;  %vm1840_vm2 = vcmp.lt.s32.totalorder %v1818_v36, 4 }
 0x363   : > { %v1845_v59 = vsel %vm1837_vm15, %v1824_v39, %v1827_v24  ;;  %v1842_v23 = vsel %vm1840_vm2, %v1830_v47, 2102212464  ;;  %v1846_v28 = vsel %vm1840_vm2, %v1833_v1, 920167782  ;;  %v1849_v19 = vsel %vm1837_vm15, %v1827_v24, %v1830_v47 }
 0x364   : > { %v1850_v37 = vsel %vm1840_vm2, %v1836_v17, 1326507024  ;;  %vm4417_vm3 = vcmp.lt.s32.totalorder %v4416_v31, 0  ;;  %vm1838_vm4 = vcmp.lt.s32.totalorder %v1818_v36, 2  ;;  %v1847_v35 = vsel %vm1839_vm1, %v1830_v47, %v1846_v28 }
 0x365   : > { %v1851_v34 = vsel %vm1839_vm1, %v1833_v1, %v1850_v37  ;;  %v3644_v29 = vsel %vm4417_vm3, 0, %v4416_v31  ;;  %v3662_v44 = vsel %vm7079_vm13, 0, %v3660_v61  ;;  %v1848_v9 = vsel %vm1838_vm4, %v1845_v59, %v1847_v35 }
 0x366   : > { %v1852_v56 = vsel %vm1838_vm4, %v1849_v19, %v1851_v34  ;;  %v3645_v27 = vsub.s32 32, %v3644_v29  ;;  %v3649_v26 = vsub.s32 4294967266, %v3644_v29  ;;  %v1841_v45 = vsel %vm1837_vm15, %v1821_v5, %v1824_v39 }
 0x367   : > { %v1843_v57 = vsel %vm1839_vm1, %v1827_v24, %v1842_v23  ;;  %v7109_v48 = vmul.u32.u64.low %v1853_v38, %v1852_v56  ;;  %v7110_v10 = vmul.u32.u64.high %v1853_v38, %v1852_v56, %v7109_v48  ;;  %vm2001_vm5 = vweird.f32 %v6863_v42 }
 0x368   : > { %v7112_v22 = vmul.u32.u64.low %v1853_v38, %v1848_v9  ;;  %v7113_v49 = vmul.u32.u64.high %v1853_v38, %v1848_v9, %v7112_v22  ;;  %v3646_v60 = vshll.u32 %v7069_v58, %v3644_v29  ;;  %v3647_v33 = vshrl.u32 %v3629_v53, %v3645_v27  ;;  %v4513_v9 = vpop.f32.mrf.mxu0 }
 0x369   : > { %v3650_v63 = vadd.s32 127, %v3649_v26  ;;  %vm3480_vm6 = vcmp.gt.s32.totalorder %v3479_v7, 0  ;;  %v3666_v55 = vadd.s32 3, %v3662_v44  ;;  %v1844_v43 = vsel %vm1838_vm4, %v1841_v45, %v1843_v57 }
 0x36a   : > { %v3476_v41 = vand.u32 8388607, %v3469_v30  ;;  %v3481_v52 = vsel %vm3480_vm6, %v3479_v7, 0  ;;  %vm2004_vm7 = vcmp.lt.s32.totalorder %v7063_v46, 2  ;;  %v3648_v62 = vor.u32 %v3647_v33, %v3646_v60 }
 0x36b   : > { %v3651_v11 = vshll.u32 %v3650_v63, 23  ;;  %v3483_v2 = vand.u32 31, %v3481_v52  ;;  %v4865_v20 = vpop.eup %4864  ;;  %vm2005_vm9 = vcmp.eq.s32.totalorder %v7063_v46, 0  ;;  %vm2008_vm8 = vcmp.eq.s32.totalorder %v7063_v46, 2 }
 0x36c   : > { %vm1862_vm11 = vc.u32 %v7110_v10, %v7112_v22  ;;  %v1863_v58 = vadd.s32 1, %v7113_v49  ;;  %v4867_v36 = vpop.eup %4866  ;;  %v2009_v15 = vxor.u32 2147483648, %v4865_v20  ;;  %v1860_v21 = vmul.u32 %v1853_v38, %v1844_v43 }
 0x36d   : > { %v3652_v39 = vor.u32 4788187, %v3651_v11  ;;  %v3484_v6 = vsub.s32 32, %v3483_v2  ;;  %v2006_v3 = vxor.u32 2147483648, %v4867_v36  ;;  %v7127_v24 = vand.u32 3, %v3666_v55 }
 0x36e   : > { %v1864_v47 = vsel %vm1862_vm11, %v1863_v58, %v7113_v49  ;;  %v3477_v1 = vor.u32 8388608, %v3476_v41  ;;  %v2010_v0 = vsel %vm2008_vm8, %v2009_v15, %v4867_v36  ;;  %v3655_v53 = vcvt.s32.f32 %v3648_v62  ;;  %v7158_v55 = vld [vmem:[%s7692_s2] ss:$0 sm:$0xff] }
 0x36f   : > { %v3653_v32 = vand.u32 2147483647, %v3652_v39  ;;  %v1865_v4 = vadd.s32 %v1864_v47, %v1860_v21  ;;  %v2007_v7 = vsel %vm2005_vm9, %v4865_v20, %v2006_v3  ;;  %v7132_v61 = vshrl.u32 %v3481_v52, 5  ;;  %v4537_v47 = vpop.f32.mrf.mxu1 }
 0x370   : > { %v3487_v5 = vshrl.u32 %v4990_v12, %v3484_v6  ;;  %v3490_v38 = vshrl.u32 %v4991_v14, %v3484_v6  ;;  %v2011_v17 = vsel %vm2004_vm7, %v2007_v7, %v2010_v0  ;;  %v3493_v23 = vshrl.u32 %v4992_v16, %v3484_v6 }
 0x371   : > { %v3656_v31 = vmul.f32 %v3655_v53, %v3653_v32  ;;  %v1866_v59 = vadd.s32 536870912, %v1865_v4  ;;  %v2012_v28 = vsel %vm2001_vm5, nan, %v2011_v17  ;;  %v3486_v19 = vshll.u32 %v4989_v8, %v3483_v2 }
 0x372   : > { %v3489_v37 = vshll.u32 %v4990_v12, %v3483_v2  ;;  %v3492_v35 = vshll.u32 %v4991_v14, %v3483_v2  ;;  %3899 = vst.msk [vmem:[%s5437_s12 + $0x68] sm:$0xff] %vm3885_vm0, %v2012_v28  ;;  %v3495_v46 = vshll.u32 %v4992_v16, %v3483_v2  ;;  %v3496_v44 = vshrl.u32 %v4993_v18, %v3484_v6 }
 0x373   : > { %v3657_v34 = vxor.u32 2147483648, %v3656_v31  ;;  %v1867_v29 = vshrl.u32 %v1866_v59, 30  ;;  %v3488_v56 = vor.u32 %v3487_v5, %v3486_v19  ;;  %v3498_v42 = vshll.u32 %v4993_v18, %v3483_v2 }
 0x374   : > { %v3491_v27 = vor.u32 %v3490_v38, %v3489_v37  ;;  %v3499_v26 = vshrl.u32 %v4994_v25, %v3484_v6  ;;  %v3494_v48 = vor.u32 %v3493_v23, %v3492_v35  ;;  %v3497_v49 = vor.u32 %v3496_v44, %v3495_v46 }
 0x375   : > { %v3658_v45 = vsel %vm3575_vm14, %v3657_v34, %v3656_v31  ;;  %v1868_v57 = vshll.u32 %v1867_v29, 30  ;;  %v3517_v63 = vshll.u32 %v3477_v1, 8  ;;  %v7161_v43 = vadd.f32 %v7158_v55, %v4513_v9 }
 0x376   : > { %v3661_v60 = vsel %vm7079_vm13, %v6911_v51, %v3658_v45  ;;  %v3500_v33 = vor.u32 %v3499_v26, %v3498_v42  ;;  %v3485_v52 = vshrl.u32 %v4989_v8, %v3484_v6  ;;  %vm3501_vm12 = vcmp.lt.s32.totalorder %v7132_v61, 1 }
 0x377   : > { %4868 = vcosq.f32 %v3661_v60  ;;  %v7163_v41 = vsub.s32 %v1865_v4, %v1868_v57  ;;  %vm3502_vm10 = vcmp.lt.s32.totalorder %v7132_v61, 2  ;;  %vm3504_vm14 = vcmp.lt.s32.totalorder %v7132_v61, 4 }
 0x378   : > { %4870 = vsinq.f32 %v3661_v60  ;;  %v3509_v54 = vsel %vm3501_vm12, %v3488_v56, %v3491_v27  ;;  %vm3503_vm13 = vcmp.lt.s32.totalorder %v7132_v61, 3  ;;  %v3506_v11 = vsel %vm3504_vm14, %v3494_v48, 2102212464 }
 0x379   : > { %v1871_v62 = vsub.s32 0, %v7163_v41  ;;  %v3510_v2 = vsel %vm3504_vm14, %v3497_v49, 920167782  ;;  %v1891_v20 = vsub.s32 4, %v1867_v29  ;;  %v3513_v36 = vsel %vm3501_vm12, %v3491_v27, %v3494_v48 }
 0x37a   : > { %v3511_v58 = vsel %vm3503_vm13, %v3494_v48, %v3510_v2  ;;  %v3514_v15 = vsel %vm3504_vm14, %v3500_v33, 1326507024  ;;  %v3505_v21 = vsel %vm3501_vm12, %v3485_v52, %v3488_v56  ;;  %v3507_v1 = vsel %vm3503_vm13, %v3491_v27, %v3506_v11 }
 0x37b   : > { %v4347_v39 = vmin.u32 %v1871_v62, %v7163_v41  ;;  %v3512_v6 = vsel %vm3502_vm10, %v3509_v54, %v3511_v58  ;;  %v3515_v3 = vsel %vm3503_vm13, %v3497_v49, %v3514_v15  ;;  %vm1807_vm15 = vcmp.lt.s32.totalorder %v7023_v50, 0 }
 0x37c   : > { %v3516_v0 = vsel %vm3502_vm10, %v3513_v36, %v3515_v3  ;;  %v7176_v32 = vmul.u32.u64.low %v3517_v63, %v3512_v6  ;;  %v7177_v53 = vmul.u32.u64.high %v3517_v63, %v3512_v6, %v7176_v32  ;;  %v7185_v38 = vadd.f32 %v7158_v55, %v4537_v47  ;;  %v468_v3 = vpop.f32.mrf.mxu0 }
 0x37d   : > { %v1873_v4 = vclz %v4347_v39  ;;  %v7181_v7 = vmul.u32.u64.low %v3517_v63, %v3516_v0  ;;  %v7182_v5 = vmul.u32.u64.high %v3517_v63, %v3516_v0, %v7181_v7  ;;  %vm7189_vm1 = vcmp.le.f32.partialorder %v1805_v40, 0.7853982 }
 0x37e   : > { %v3508_v59 = vsel %vm3502_vm10, %v3505_v21, %v3507_v1  ;;  %v2120_v23 = vand.u32 2139095040, %v7161_v43  ;;  %vm3668_vm2 = vcmp.lt.s32.totalorder %v7127_v24, 2  ;;  %vm3669_vm3 = vcmp.eq.s32.totalorder %v7127_v24, 0 }
 0x37f   : > { %v4348_v31 = vadd.s32 4294967294, %v1873_v4  ;;  %v1892_v28 = vsel %vm1807_vm15, %v1891_v20, %v1867_v29  ;;  %v3527_v19 = vadd.s32 1, %v7177_v53  ;;  %v2117_v40 = vand.u32 2147483647, %v7161_v43 }
 0x380   : > { %vm3665_vm4 = vweird.f32 %v6911_v51  ;;  %vm3672_vm5 = vcmp.eq.s32.totalorder %v7127_v24, 2  ;;  %v1861_v61 = vadd.s32 %v7112_v22, %v7110_v10  ;;  %v2121_v37 = vshrl.u32 %v2120_v23, 23 }
 0x381   : > { %vm4349_vm6 = vcmp.lt.s32.totalorder %v4348_v31, 0  ;;  %v3524_v34 = vmul.u32 %v3517_v63, %v3508_v59  ;;  %vm3526_vm7 = vc.u32 %v7182_v5, %v7176_v32  ;;  %v3784_v29 = vand.u32 2139095040, %v7185_v38 }
 0x382   : > { %v1876_v35 = vsel %vm4349_vm6, 0, %v4348_v31  ;;  %v1894_v9 = vsel %vm7189_vm1, 0, %v1892_v28  ;;  %v3528_v56 = vsel %vm3526_vm7, %v3527_v19, %v7177_v53  ;;  %v4358_v26 = vadd.s32 4294967169, %v2121_v37 }
 0x383   : > { %v1877_v46 = vsub.s32 32, %v1876_v35  ;;  %v1881_v44 = vsub.s32 4294967266, %v1876_v35  ;;  %v3529_v42 = vadd.s32 %v3528_v56, %v3524_v34  ;;  %v2124_v10 = vand.u32 8388607, %v2117_v40 }
 0x384   : > { %v4869_v27 = vpop.eup %4868  ;;  %v3781_v22 = vand.u32 2147483647, %v7185_v38  ;;  %v1878_v48 = vshll.u32 %v7163_v41, %v1876_v35  ;;  %v2127_v52 = vadd.s32 1, %v4358_v26  ;;  %v3785_v54 = vshrl.u32 %v3784_v29, 23 }
 0x385   : > { %v4871_v45 = vpop.eup %4870  ;;  %v3673_v57 = vxor.u32 2147483648, %v4869_v27  ;;  %v1879_v49 = vshrl.u32 %v1861_v61, %v1877_v46  ;;  %v1882_v60 = vadd.s32 127, %v1881_v44  ;;  %v3530_v63 = vadd.s32 536870912, %v3529_v42 }
 0x386   : > { %v3670_v33 = vxor.u32 2147483648, %v4871_v45  ;;  %v1898_v20 = vadd.s32 3, %v1894_v9  ;;  %v2125_v15 = vor.u32 8388608, %v2124_v10  ;;  %vm2128_vm9 = vcmp.gt.s32.totalorder %v2127_v52, 0 }
 0x387   : > { %v3674_v62 = vsel %vm3672_vm5, %v3673_v57, %v4871_v45  ;;  %v1880_v11 = vor.u32 %v1879_v49, %v1878_v48  ;;  %v1883_v2 = vshll.u32 %v1882_v60, 23  ;;  %v7220_v36 = vshrl.u32 %v3530_v63, 30 }
 0x388   : > { %v3671_v58 = vsel %vm3669_vm3, %v4869_v27, %v3670_v33  ;;  %v2129_v21 = vsel %vm2128_vm9, %v2127_v52, 0  ;;  %v7226_v6 = vand.u32 8388607, %v3781_v22  ;;  %v4422_v0 = vadd.s32 4294967169, %v3785_v54 }
 0x389   : > { %v3675_v41 = vsel %vm3668_vm2, %v3671_v58, %v3674_v62  ;;  %v1884_v39 = vor.u32 4788187, %v1883_v2  ;;  %v3532_v1 = vshll.u32 %v7220_v36, 30  ;;  %v1887_v4 = vcvt.s32.f32 %v1880_v11 }
 0x38a   : > { %v3676_v47 = vsel %vm3665_vm4, nan, %v3675_v41  ;;  %v2131_v7 = vand.u32 31, %v2129_v21  ;;  %v7233_v24 = vand.u32 3, %v1898_v20  ;;  %v3525_v31 = vadd.s32 %v7176_v32, %v7182_v5 }
 0x38b   : > { %3915 = vst.msk [vmem:[%s5437_s12 + $0xe8] sm:$0xff] %vm3885_vm0, %v3676_v47  ;;  %v1885_v53 = vand.u32 2147483647, %v1884_v39  ;;  %v7237_v59 = vsub.s32 %v3529_v42, %v3532_v1  ;;  %v7240_v23 = vadd.f32 %v7158_v55, %v468_v3  ;;  %v7242_v19 = vshll.u32 %v2125_v15, 8 }
 0x38c   : > { %v2132_v28 = vsub.s32 32, %v2131_v7  ;;  %v3789_v61 = vor.u32 8388608, %v7226_v6  ;;  %v2130_v35 = vshrl.u32 %v2129_v21, 5  ;;  %v2134_v34 = vshll.u32 %v4989_v8, %v2131_v7 }
 0x38d   : > { %v1888_v51 = vmul.f32 %v1887_v4, %v1885_v53  ;;  %v3535_v37 = vsub.s32 0, %v7237_v59  ;;  %v3791_v29 = vadd.s32 1, %v4422_v0  ;;  %v2137_v5 = vshll.u32 %v4990_v12, %v2131_v7 }
 0x38e   : > { %v2135_v32 = vshrl.u32 %v4990_v12, %v2132_v28  ;;  %v2138_v44 = vshrl.u32 %v4991_v14, %v2132_v28  ;;  %v2140_v56 = vshll.u32 %v4991_v14, %v2131_v7  ;;  %v2141_v27 = vshrl.u32 %v4992_v16, %v2132_v28 }
 0x38f   : > { %v1889_v46 = vxor.u32 2147483648, %v1888_v51  ;;  %v4411_v9 = vmin.u32 %v3535_v37, %v7237_v59  ;;  %v2143_v42 = vshll.u32 %v4992_v16, %v2131_v7  ;;  %v2144_v57 = vshrl.u32 %v4993_v18, %v2132_v28 }
 0x390   : > { %v2136_v10 = vor.u32 %v2135_v32, %v2134_v34  ;;  %v2139_v45 = vor.u32 %v2138_v44, %v2137_v5  ;;  %v3555_v60 = vsub.s32 4, %v7220_v36  ;;  %vm3792_vm8 = vcmp.gt.s32.totalorder %v3791_v29, 0 }
 0x391   : > { %v1890_v26 = vsel %vm1807_vm15, %v1889_v46, %v1888_v51  ;;  %v3537_v49 = vclz %v4411_v9  ;;  %v2142_v33 = vor.u32 %v2141_v27, %v2140_v56  ;;  %v2145_v63 = vor.u32 %v2144_v57, %v2143_v42 }
 0x392   : > { %v1893_v48 = vsel %vm7189_vm1, %v7023_v50, %v1890_v26  ;;  %vm2149_vm11 = vcmp.lt.s32.totalorder %v2130_v35, 1  ;;  %vm3471_vm12 = vcmp.lt.s32.totalorder %v7045_v13, 0  ;;  %v2146_v54 = vshll.u32 %v4993_v18, %v2131_v7 }
 0x393   : > { %4872 = vcosq.f32 %v1893_v48  ;;  %v4412_v52 = vadd.s32 4294967294, %v3537_v49  ;;  %v2147_v62 = vshrl.u32 %v4994_v25, %v2132_v28  ;;  %v2133_v11 = vshrl.u32 %v4989_v8, %v2132_v28 }
 0x394   : > { %4874 = vsinq.f32 %v1893_v48  ;;  %vm2151_vm10 = vcmp.lt.s32.totalorder %v2130_v35, 3  ;;  %vm2152_vm14 = vcmp.lt.s32.totalorder %v2130_v35, 4  ;;  %v2157_v17 = vsel %vm2149_vm11, %v2136_v10, %v2139_v45 }
 0x395   : > { %vm4413_vm13 = vcmp.lt.s32.totalorder %v4412_v52, 0  ;;  %v2148_v2 = vor.u32 %v2147_v62, %v2146_v54  ;;  %v2154_v20 = vsel %vm2152_vm14, %v2142_v33, 2102212464  ;;  %v2158_v58 = vsel %vm2152_vm14, %v2145_v63, 920167782 }
 0x396   : > { %v3540_v15 = vsel %vm4413_vm13, 0, %v4412_v52  ;;  %v2153_v41 = vsel %vm2149_vm11, %v2133_v11, %v2136_v10  ;;  %v2155_v39 = vsel %vm2151_vm10, %v2139_v45, %v2154_v20  ;;  %v2159_v21 = vsel %vm2151_vm10, %v2142_v33, %v2158_v58 }
 0x397   : > { %v3541_v3 = vsub.s32 32, %v3540_v15  ;;  %v3545_v47 = vsub.s32 4294967266, %v3540_v15  ;;  %vm2150_vm15 = vcmp.lt.s32.totalorder %v2130_v35, 2  ;;  %v2161_v1 = vsel %vm2149_vm11, %v2139_v45, %v2142_v33 }
 0x398   : > { %v3542_v0 = vshll.u32 %v7237_v59, %v3540_v15  ;;  %v2160_v53 = vsel %vm2150_vm15, %v2157_v17, %v2159_v21  ;;  %v2162_v4 = vsel %vm2152_vm14, %v2148_v2, 1326507024  ;;  %v3793_v7 = vsel %vm3792_vm8, %v3791_v29, 0 }
 0x399   : > { %v3543_v51 = vshrl.u32 %v3525_v31, %v3541_v3  ;;  %v3546_v28 = vadd.s32 127, %v3545_v47  ;;  %v2156_v37 = vsel %vm2150_vm15, %v2153_v41, %v2155_v39  ;;  %v2163_v34 = vsel %vm2151_vm10, %v2145_v63, %v2162_v4 }
 0x39a   : > { %vm1901_vm1 = vcmp.eq.s32.totalorder %v7233_v24, 0  ;;  %v2164_v46 = vsel %vm2150_vm15, %v2161_v1, %v2163_v34  ;;  %v7278_v32 = vmul.u32.u64.low %v7242_v19, %v2160_v53  ;;  %v7279_v5 = vmul.u32.u64.high %v7242_v19, %v2160_v53, %v7278_v32 }
 0x39b   : > { %v3795_v44 = vand.u32 31, %v3793_v7  ;;  %vm1900_vm2 = vcmp.lt.s32.totalorder %v7233_v24, 2  ;;  %vm7285_vm3 = vcmp.le.f32.partialorder %v3469_v30, 0.7853982  ;;  %v3544_v31 = vor.u32 %v3543_v51, %v3542_v0 }
 0x39c   : > { %v3547_v35 = vshll.u32 %v3546_v28, 23  ;;  %v7290_v29 = vmul.u32.u64.low %v7242_v19, %v2164_v46  ;;  %v7291_v9 = vmul.u32.u64.high %v7242_v19, %v2164_v46, %v7290_v29  ;;  %vm1897_vm4 = vweird.f32 %v7023_v50 }
 0x39d   : > { %vm1904_vm5 = vcmp.eq.s32.totalorder %v7233_v24, 2  ;;  %v3556_v56 = vsel %vm3471_vm12, %v3555_v60, %v7220_v36  ;;  %v3796_v27 = vsub.s32 32, %v3795_v44  ;;  %v7300_v30 = vshll.u32 %v3789_v61, 8 }
 0x39e   : > { %v3548_v42 = vor.u32 4788187, %v3547_v35  ;;  %v2172_v26 = vmul.u32 %v7242_v19, %v2156_v37  ;;  %v7303_v10 = vshrl.u32 %v3793_v7, 5  ;;  %v3798_v45 = vshll.u32 %v4989_v8, %v3795_v44 }
 0x39f   : > { %v2175_v57 = vadd.s32 1, %v7279_v5  ;;  %v3799_v48 = vshrl.u32 %v4990_v12, %v3796_v27  ;;  %v3801_v49 = vshll.u32 %v4990_v12, %v3795_v44  ;;  %v3804_v36 = vshll.u32 %v4991_v14, %v3795_v44 }
 0x3a0   : > { %v4873_v60 = vpop.eup %4872  ;;  %v3549_v33 = vand.u32 2147483647, %v3548_v42  ;;  %v3551_v6 = vcvt.s32.f32 %v3544_v31  ;;  %vm2174_vm6 = vc.u32 %v7291_v9, %v7278_v32  ;;  %v3802_v19 = vshrl.u32 %v4991_v14, %v3796_v27 }
 0x3a1   : > { %v4875_v61 = vpop.eup %4874  ;;  %v1905_v63 = vxor.u32 2147483648, %v4873_v60  ;;  %v2176_v52 = vsel %vm2174_vm6, %v2175_v57, %v7279_v5  ;;  %v3805_v54 = vshrl.u32 %v4992_v16, %v3796_v27  ;;  %v3807_v62 = vshll.u32 %v4992_v16, %v3795_v44 }
 0x3a2   : > { %v1902_v11 = vxor.u32 2147483648, %v4875_v61  ;;  %v3552_v17 = vmul.f32 %v3551_v6, %v3549_v33  ;;  %v2177_v2 = vadd.s32 %v2176_v52, %v2172_v26  ;;  %v3810_v20 = vshll.u32 %v4993_v18, %v3795_v44 }
 0x3a3   : > { %v1906_v58 = vsel %vm1904_vm5, %v1905_v63, %v4875_v61  ;;  %v3800_v15 = vor.u32 %v3799_v48, %v3798_v45  ;;  %v3808_v41 = vshrl.u32 %v4993_v18, %v3796_v27  ;;  %v3811_v39 = vshrl.u32 %v4994_v25, %v3796_v27 }
 0x3a4   : > { %v1903_v21 = vsel %vm1901_vm1, %v4873_v60, %v1902_v11  ;;  %v3553_v3 = vxor.u32 2147483648, %v3552_v17  ;;  %v2178_v47 = vadd.s32 536870912, %v2177_v2  ;;  %v3803_v1 = vor.u32 %v3802_v19, %v3801_v49 }
 0x3a5   : > { %v1907_v0 = vsel %vm1900_vm2, %v1903_v21, %v1906_v58  ;;  %v3558_v53 = vsel %vm7285_vm3, 0, %v3556_v56  ;;  %v3806_v4 = vor.u32 %v3805_v54, %v3804_v36  ;;  %v3809_v7 = vor.u32 %v3808_v41, %v3807_v62 }
 0x3a6   : > { %v1908_v51 = vsel %vm1897_vm4, nan, %v1907_v0  ;;  %v3554_v28 = vsel %vm3471_vm12, %v3553_v3, %v3552_v17  ;;  %v2179_v37 = vshrl.u32 %v2178_v47, 30  ;;  %v3812_v34 = vor.u32 %v3811_v39, %v3810_v20  ;;  %v548_v39 = vpop.f32.mrf.mxu1 }
 0x3a7   : > { %3898 = vst.msk [vmem:[%s5437_s12 + $0x60] sm:$0xff] %vm3885_vm0, %v1908_v51  ;;  %v3557_v24 = vsel %vm7285_vm3, %v7045_v13, %v3554_v28  ;;  %v3797_v46 = vshrl.u32 %v4989_v8, %v3796_v27  ;;  %vm3813_vm7 = vcmp.lt.s32.totalorder %v7303_v10, 1  ;;  %vm3815_vm9 = vcmp.lt.s32.totalorder %v7303_v10, 3 }
 0x3a8   : > { %4876 = vcosq.f32 %v3557_v24  ;;  %v2180_v50 = vshll.u32 %v2179_v37, 30  ;;  %vm3816_vm8 = vcmp.lt.s32.totalorder %v7303_v10, 4  ;;  %v3821_v5 = vsel %vm3813_vm7, %v3800_v15, %v3803_v1 }
 0x3a9   : > { %4878 = vsinq.f32 %v3557_v24  ;;  %v3818_v44 = vsel %vm3816_vm8, %v3806_v4, 2102212464  ;;  %v3822_v31 = vsel %vm3816_vm8, %v3809_v7, 920167782  ;;  %v3825_v59 = vsel %vm3813_vm7, %v3803_v1, %v3806_v4 }
 0x3aa   : > { %v7344_v35 = vsub.s32 %v2177_v2, %v2180_v50  ;;  %vm3814_vm11 = vcmp.lt.s32.totalorder %v7303_v10, 2  ;;  %v3823_v29 = vsel %vm3815_vm9, %v3806_v4, %v3822_v31  ;;  %v3826_v56 = vsel %vm3816_vm8, %v3812_v34, 1326507024 }
 0x3ab   : > { %v3562_v27 = vadd.s32 3, %v3558_v53  ;;  %v2203_v42 = vsub.s32 4, %v2179_v37  ;;  %v3824_v26 = vsel %vm3814_vm11, %v3821_v5, %v3823_v29  ;;  %v3827_v45 = vsel %vm3815_vm9, %v3809_v7, %v3826_v56 }
 0x3ac   : > { %v2183_v57 = vsub.s32 0, %v7344_v35  ;;  %v3817_v48 = vsel %vm3813_vm7, %v3797_v46, %v3800_v15  ;;  %v3819_v49 = vsel %vm3815_vm9, %v3803_v1, %v3818_v44  ;;  %v3828_v36 = vsel %vm3814_vm11, %v3825_v59, %v3827_v45 }
 0x3ad   : > { %v7361_v60 = vmul.u32.u64.low %v7300_v30, %v3828_v36  ;;  %v7362_v33 = vmul.u32.u64.high %v7300_v30, %v3828_v36, %v7361_v60  ;;  %v7365_v6 = vmul.u32.u64.low %v7300_v30, %v3824_v26  ;;  %v7366_v19 = vmul.u32.u64.high %v7300_v30, %v3824_v26, %v7365_v6 }
 0x3ae   : > { %vm2119_vm12 = vcmp.lt.s32.totalorder %v7161_v43, 0  ;;  %v4359_v61 = vmin.u32 %v2183_v57, %v7344_v35  ;;  %v3563_v63 = vand.u32 3, %v3562_v27  ;;  %v3820_v54 = vsel %vm3814_vm11, %v3817_v48, %v3819_v49 }
 0x3af   : > { %v2204_v52 = vsel %vm2119_vm12, %v2203_v42, %v2179_v37  ;;  %v2016_v62 = vand.u32 2139095040, %v7240_v23  ;;  %vm7377_vm10 = vcmp.le.f32.partialorder %v2117_v40, 0.7853982  ;;  %vm3838_vm14 = vc.u32 %v7362_v33, %v7365_v6 }
 0x3b0   : > { %v2185_v11 = vclz %v4359_v61  ;;  %v3839_v2 = vadd.s32 1, %v7366_v19  ;;  %v2206_v15 = vsel %vm7377_vm10, 0, %v2204_v52  ;;  %v3836_v10 = vmul.u32 %v7300_v30, %v3820_v54 }
 0x3b1   : > { %v2017_v20 = vshrl.u32 %v2016_v62, 23  ;;  %v2013_v41 = vand.u32 2147483647, %v7240_v23  ;;  %vm3564_vm13 = vcmp.lt.s32.totalorder %v3563_v63, 2  ;;  %vm3565_vm15 = vcmp.eq.s32.totalorder %v3563_v63, 0 }
 0x3b2   : > { %v4360_v58 = vadd.s32 4294967294, %v2185_v11  ;;  %v3840_v40 = vsel %vm3838_vm14, %v3839_v2, %v7366_v19  ;;  %vm3568_vm1 = vcmp.eq.s32.totalorder %v3563_v63, 2  ;;  %v2173_v3 = vadd.s32 %v7278_v32, %v7291_v9 }
 0x3b3   : > { %v4354_v21 = vadd.s32 4294967169, %v2017_v20  ;;  %v3841_v47 = vadd.s32 %v3840_v40, %v3836_v10  ;;  %v2210_v53 = vadd.s32 3, %v2206_v15  ;;  %v7391_v30 = vadd.f32 %v7158_v55, %v548_v39 }
 0x3b4   : > { %vm4361_vm2 = vcmp.lt.s32.totalorder %v4360_v58, 0  ;;  %v2020_v34 = vand.u32 8388607, %v2013_v41  ;;  %vm3561_vm4 = vweird.f32 %v7045_v13  ;;  %v3837_v49 = vadd.s32 %v7365_v6, %v7362_v33 }
 0x3b5   : > { %v4877_v1 = vpop.eup %4876  ;;  %v2188_v0 = vsel %vm4361_vm2, 0, %v4360_v58  ;;  %v2023_v4 = vadd.s32 1, %v4354_v21  ;;  %v3842_v32 = vadd.s32 536870912, %v3841_v47  ;;  %v3680_v29 = vand.u32 2139095040, %v7391_v30 }
 0x3b6   : > { %v4879_v7 = vpop.eup %4878  ;;  %v3569_v51 = vxor.u32 2147483648, %v4877_v1  ;;  %v2189_v28 = vsub.s32 32, %v2188_v0  ;;  %v2193_v37 = vsub.s32 4294967266, %v2188_v0  ;;  %v2190_v46 = vshll.u32 %v7344_v35, %v2188_v0 }
 0x3b7   : > { %v3566_v24 = vxor.u32 2147483648, %v4879_v7  ;;  %vm2024_vm3 = vcmp.gt.s32.totalorder %v2023_v4, 0  ;;  %v7398_v31 = vshrl.u32 %v3842_v32, 30  ;;  %v7406_v48 = vand.u32 3, %v2210_v53 }
 0x3b8   : > { %v3570_v9 = vsel %vm3568_vm1, %v3569_v51, %v4879_v7  ;;  %v2191_v50 = vshrl.u32 %v2173_v3, %v2189_v28  ;;  %v2194_v5 = vadd.s32 127, %v2193_v37  ;;  %v2025_v44 = vsel %vm2024_vm3, %v2023_v4, 0 }
 0x3b9   : > { %v3567_v55 = vsel %vm3565_vm15, %v4877_v1, %v3566_v24  ;;  %v2027_v59 = vand.u32 31, %v2025_v44  ;;  %v3844_v26 = vshll.u32 %v7398_v31, 30  ;;  %v2021_v60 = vor.u32 8388608, %v2020_v34 }
 0x3ba   : > { %v3571_v56 = vsel %vm3564_vm13, %v3567_v55, %v3570_v9  ;;  %v2192_v35 = vor.u32 %v2191_v50, %v2190_v46  ;;  %v2195_v27 = vshll.u32 %v2194_v5, 23  ;;  %v3681_v19 = vshrl.u32 %v3680_v29, 23 }
 0x3bb   : > { %v3572_v42 = vsel %vm3561_vm4, nan, %v3571_v56  ;;  %v2028_v45 = vsub.s32 32, %v2027_v59  ;;  %v7409_v36 = vsub.s32 %v3841_v47, %v3844_v26  ;;  %v2030_v52 = vshll.u32 %v4989_v8, %v2027_v59 }
 0x3bc   : > { %3914 = vst.msk [vmem:[%s5437_s12 + $0xe0] sm:$0xff] %vm3885_vm0, %v3572_v42  ;;  %v2196_v57 = vor.u32 4788187, %v2195_v27  ;;  %v2199_v63 = vcvt.s32.f32 %v2192_v35  ;;  %v2033_v11 = vshll.u32 %v4990_v12, %v2027_v59  ;;  %v2036_v2 = vshll.u32 %v4991_v14, %v2027_v59 }
 0x3bd   : > { %v2031_v13 = vshrl.u32 %v4990_v12, %v2028_v45  ;;  %v2034_v54 = vshrl.u32 %v4991_v14, %v2028_v45  ;;  %v3847_v62 = vsub.s32 0, %v7409_v36  ;;  %v2037_v33 = vshrl.u32 %v4992_v16, %v2028_v45 }
 0x3be   : > { %v2197_v61 = vand.u32 2147483647, %v2196_v57  ;;  %v2026_v20 = vshrl.u32 %v2025_v44, 5  ;;  %v2039_v58 = vshll.u32 %v4992_v16, %v2027_v59  ;;  %v2040_v15 = vshrl.u32 %v4993_v18, %v2028_v45 }
 0x3bf   : > { %v4423_v10 = vmin.u32 %v3847_v62, %v7409_v36  ;;  %v2032_v39 = vor.u32 %v2031_v13, %v2030_v52  ;;  %v2035_v40 = vor.u32 %v2034_v54, %v2033_v11  ;;  %v2038_v21 = vor.u32 %v2037_v33, %v2036_v2 }
 0x3c0   : > { %v2200_v6 = vmul.f32 %v2199_v63, %v2197_v61  ;;  %v2041_v47 = vor.u32 %v2040_v15, %v2039_v58  ;;  %v2042_v1 = vshll.u32 %v4993_v18, %v2027_v59  ;;  %v2043_v0 = vshrl.u32 %v4994_v25, %v2028_v45 }
 0x3c1   : > { %v3849_v53 = vclz %v4423_v10  ;;  %v3867_v4 = vsub.s32 4, %v7398_v31  ;;  %v2061_v7 = vshll.u32 %v2021_v60, 8  ;;  %v4418_v51 = vadd.s32 4294967169, %v3681_v19 }
 0x3c2   : > { %v2201_v3 = vxor.u32 2147483648, %v2200_v6  ;;  %v2029_v37 = vshrl.u32 %v4989_v8, %v2028_v45  ;;  %v2044_v34 = vor.u32 %v2043_v0, %v2042_v1  ;;  %vm2045_vm5 = vcmp.lt.s32.totalorder %v2026_v20, 1 }
 0x3c3   : > { %v4424_v46 = vadd.s32 4294967294, %v3849_v53  ;;  %vm2047_vm6 = vcmp.lt.s32.totalorder %v2026_v20, 3  ;;  %vm2048_vm7 = vcmp.lt.s32.totalorder %v2026_v20, 4  ;;  %v2053_v9 = vsel %vm2045_vm5, %v2032_v39, %v2035_v40 }
 0x3c4   : > { %v2202_v28 = vsel %vm2119_vm12, %v2201_v3, %v2200_v6  ;;  %v2050_v32 = vsel %vm2048_vm7, %v2038_v21, 2102212464  ;;  %v2054_v50 = vsel %vm2048_vm7, %v2041_v47, 920167782  ;;  %vm2046_vm8 = vcmp.lt.s32.totalorder %v2026_v20, 2 }
 0x3c5   : > { %v2205_v24 = vsel %vm7377_vm10, %v7161_v43, %v2202_v28  ;;  %vm4425_vm9 = vcmp.lt.s32.totalorder %v4424_v46, 0  ;;  %v2055_v5 = vsel %vm2047_vm6, %v2038_v21, %v2054_v50  ;;  %v2049_v55 = vsel %vm2045_vm5, %v2029_v37, %v2032_v39 }
 0x3c6   : > { %4880 = vcosq.f32 %v2205_v24  ;;  %v3852_v44 = vsel %vm4425_vm9, 0, %v4424_v46  ;;  %v2056_v17 = vsel %vm2046_vm8, %v2053_v9, %v2055_v5  ;;  %v2057_v59 = vsel %vm2045_vm5, %v2035_v40, %v2038_v21 }
 0x3c7   : > { %4882 = vsinq.f32 %v2205_v24  ;;  %v3853_v29 = vsub.s32 32, %v3852_v44  ;;  %v3857_v56 = vsub.s32 4294967266, %v3852_v44  ;;  %v2051_v35 = vsel %vm2047_vm6, %v2035_v40, %v2050_v32 }
 0x3c8   : > { %v2058_v27 = vsel %vm2048_vm7, %v2044_v34, 1326507024  ;;  %v3854_v42 = vshll.u32 %v7409_v36, %v3852_v44  ;;  %v7441_v45 = vmul.u32.u64.low %v2061_v7, %v2056_v17  ;;  %v7442_v57 = vmul.u32.u64.high %v2061_v7, %v2056_v17, %v7441_v45 }
 0x3c9   : > { %v2059_v26 = vsel %vm2047_vm6, %v2041_v47, %v2058_v27  ;;  %v3855_v60 = vshrl.u32 %v3837_v49, %v3853_v29  ;;  %v3858_v13 = vadd.s32 127, %v3857_v56  ;;  %v3687_v61 = vadd.s32 1, %v4418_v51 }
 0x3ca   : > { %v2060_v19 = vsel %vm2046_vm8, %v2057_v59, %v2059_v26  ;;  %vm3783_vm11 = vcmp.lt.s32.totalorder %v7185_v38, 0  ;;  %v2052_v36 = vsel %vm2046_vm8, %v2049_v55, %v2051_v35  ;;  %vm7453_vm10 = vcmp.le.f32.partialorder %v3781_v22, 0.7853982 }
 0x3cb   : > { %v7447_v63 = vmul.u32.u64.low %v2061_v7, %v2060_v19  ;;  %v7448_v52 = vmul.u32.u64.high %v2061_v7, %v2060_v19, %v7447_v63  ;;  %v3856_v54 = vor.u32 %v3855_v60, %v3854_v42  ;;  %v3859_v62 = vshll.u32 %v3858_v13, 23 }
 0x3cc   : > { %vm3688_vm12 = vcmp.gt.s32.totalorder %v3687_v61, 0  ;;  %v2071_v49 = vadd.s32 1, %v7442_v57  ;;  %v3677_v2 = vand.u32 2147483647, %v7391_v30  ;;  %vm2212_vm14 = vcmp.lt.s32.totalorder %v7406_v48, 2 }
 0x3cd   : > { %v3689_v33 = vsel %vm3688_vm12, %v3687_v61, 0  ;;  %v3860_v6 = vor.u32 4788187, %v3859_v62  ;;  %v3868_v20 = vsel %vm3783_vm11, %v3867_v4, %v7398_v31  ;;  %vm2209_vm13 = vweird.f32 %v7161_v43 }
 0x3ce   : > { %v3691_v58 = vand.u32 31, %v3689_v33  ;;  %vm2213_vm15 = vcmp.eq.s32.totalorder %v7406_v48, 0  ;;  %vm2216_vm1 = vcmp.eq.s32.totalorder %v7406_v48, 2  ;;  %v2068_v22 = vmul.u32 %v2061_v7, %v2052_v36 }
 0x3cf   : > { %vm2070_vm2 = vc.u32 %v7448_v52, %v7441_v45  ;;  %v3861_v15 = vand.u32 2147483647, %v3860_v6  ;;  %v3863_v10 = vcvt.s32.f32 %v3856_v54  ;;  %v3870_v21 = vsel %vm7453_vm10, 0, %v3868_v20 }
 0x3d0   : > { %v2072_v39 = vsel %vm2070_vm2, %v2071_v49, %v7442_v57  ;;  %v3692_v40 = vsub.s32 32, %v3691_v58  ;;  %v3684_v3 = vand.u32 8388607, %v3677_v2  ;;  %v7473_v47 = vshrl.u32 %v3689_v33, 5 }
 0x3d1   : > { %v2073_v31 = vadd.s32 %v2072_v39, %v2068_v22  ;;  %v3864_v0 = vmul.f32 %v3863_v10, %v3861_v15  ;;  %v3694_v53 = vshll.u32 %v4989_v8, %v3691_v58  ;;  %v3697_v7 = vshll.u32 %v4990_v12, %v3691_v58 }
 0x3d2   : > { %v3695_v4 = vshrl.u32 %v4990_v12, %v3692_v40  ;;  %v3698_v34 = vshrl.u32 %v4991_v14, %v3692_v40  ;;  %v3700_v24 = vshll.u32 %v4991_v14, %v3691_v58  ;;  %v3703_v9 = vshll.u32 %v4992_v16, %v3691_v58 }
 0x3d3   : > { %v4881_v1 = vpop.eup %4880  ;;  %v2074_v37 = vadd.s32 536870912, %v2073_v31  ;;  %v3865_v32 = vxor.u32 2147483648, %v3864_v0  ;;  %v3704_v50 = vshrl.u32 %v4993_v18, %v3692_v40  ;;  %v3701_v55 = vshrl.u32 %v4992_v16, %v3692_v40 }
 0x3d4   : > { %v4883_v51 = vpop.eup %4882  ;;  %v2217_v28 = vxor.u32 2147483648, %v4881_v1  ;;  %v3696_v12 = vor.u32 %v3695_v4, %v3694_v53  ;;  %v3706_v59 = vshll.u32 %v4993_v18, %v3691_v58  ;;  %v3707_v29 = vshrl.u32 %v4994_v25, %v3692_v40 }
 0x3d5   : > { %v2214_v46 = vxor.u32 2147483648, %v4883_v51  ;;  %v7484_v44 = vshrl.u32 %v2074_v37, 30  ;;  %v3866_v14 = vsel %vm3783_vm11, %v3865_v32, %v3864_v0  ;;  %v3699_v16 = vor.u32 %v3698_v34, %v3697_v7 }
 0x3d6   : > { %v2218_v5 = vsel %vm2216_vm1, %v2217_v28, %v4883_v51  ;;  %v3869_v35 = vsel %vm7453_vm10, %v7185_v38, %v3866_v14  ;;  %v3705_v26 = vor.u32 %v3704_v50, %v3703_v9  ;;  %v3708_v57 = vor.u32 %v3707_v29, %v3706_v59 }
 0x3d7   : > { %v2215_v17 = vsel %vm2213_vm15, %v4881_v1, %v2214_v46  ;;  %v2076_v27 = vshll.u32 %v7484_v44, 30  ;;  %4884 = vcosq.f32 %v3869_v35  ;;  %v3702_v25 = vor.u32 %v3701_v55, %v3700_v24 }
 0x3d8   : > { %v2219_v56 = vsel %vm2212_vm14, %v2215_v17, %v2218_v5  ;;  %4886 = vsinq.f32 %v3869_v35  ;;  %v3874_v48 = vadd.s32 3, %v3870_v21  ;;  %v3685_v60 = vor.u32 8388608, %v3684_v3 }
 0x3d9   : > { %v2220_v42 = vsel %vm2209_vm13, nan, %v2219_v56  ;;  %v2077_v18 = vsub.s32 %v2073_v31, %v2076_v27  ;;  %vm3709_vm3 = vcmp.lt.s32.totalorder %v7473_v47, 1  ;;  %v3693_v19 = vshrl.u32 %v4989_v8, %v3692_v40 }
 0x3da   : > { %3901 = vst.msk [vmem:[%s5437_s12 + $0x78] sm:$0xff] %vm3885_vm0, %v2220_v42  ;;  %vm3712_vm4 = vcmp.lt.s32.totalorder %v7473_v47, 4  ;;  %v3717_v43 = vsel %vm3709_vm3, %v3696_v12, %v3699_v16  ;;  %vm3710_vm5 = vcmp.lt.s32.totalorder %v7473_v47, 2  ;;  %vm3711_vm6 = vcmp.lt.s32.totalorder %v7473_v47, 3 }
 0x3db   : > { %v2079_v13 = vsub.s32 0, %v2077_v18  ;;  %v3718_v61 = vsel %vm3712_vm4, %v3705_v26, 920167782  ;;  %v3722_v63 = vsel %vm3712_vm4, %v3708_v57, 1326507024  ;;  %v3721_v11 = vsel %vm3709_vm3, %v3699_v16, %v3702_v25 }
 0x3dc   : > { %v3714_v62 = vsel %vm3712_vm4, %v3702_v25, 2102212464  ;;  %v3719_v36 = vsel %vm3711_vm6, %v3702_v25, %v3718_v61  ;;  %v3723_v49 = vsel %vm3711_vm6, %v3705_v26, %v3722_v63  ;;  %v3725_v33 = vshll.u32 %v3685_v60, 8 }
 0x3dd   : > { %v4355_v54 = vmin.u32 %v2079_v13, %v2077_v18  ;;  %v3720_v8 = vsel %vm3710_vm5, %v3717_v43, %v3719_v36  ;;  %v3713_v20 = vsel %vm3709_vm3, %v3693_v19, %v3696_v12  ;;  %v3715_v58 = vsel %vm3711_vm6, %v3699_v16, %v3714_v62 }
 0x3de   : > { %v3724_v22 = vsel %vm3710_vm5, %v3721_v11, %v3723_v49  ;;  %v7518_v15 = vmul.u32.u64.low %v3725_v33, %v3720_v8  ;;  %v7519_v10 = vmul.u32.u64.high %v3725_v33, %v3720_v8, %v7518_v15  ;;  %v3875_v39 = vand.u32 3, %v3874_v48 }
 0x3df   : > { %v2081_v6 = vclz %v4355_v54  ;;  %v7521_v21 = vmul.u32.u64.low %v3725_v33, %v3724_v22  ;;  %v7522_v31 = vmul.u32.u64.high %v3725_v33, %v3724_v22, %v7521_v21  ;;  %v3716_v3 = vsel %vm3710_vm5, %v3713_v20, %v3715_v58 }
 0x3e0   : > { %v3735_v0 = vadd.s32 1, %v7519_v10  ;;  %vm3880_vm9 = vcmp.eq.s32.totalorder %v3875_v39, 2  ;;  %v2069_v4 = vadd.s32 %v7441_v45, %v7448_v52  ;;  %v3732_v24 = vmul.u32 %v3725_v33, %v3716_v3 }
 0x3e1   : > { %v4356_v40 = vadd.s32 4294967294, %v2081_v6  ;;  %vm3734_vm8 = vc.u32 %v7522_v31, %v7518_v15  ;;  %vm3877_vm11 = vcmp.eq.s32.totalorder %v3875_v39, 0  ;;  %vm3876_vm12 = vcmp.lt.s32.totalorder %v3875_v39, 2 }
 0x3e2   : > { %v3736_v9 = vsel %vm3734_vm8, %v3735_v0, %v7519_v10  ;;  %vm3873_vm10 = vweird.f32 %v7185_v38  ;;  %vm2015_vm14 = vcmp.lt.s32.totalorder %v7240_v23, 0  ;;  %v2099_v57 = vsub.s32 4, %v7484_v44 }
 0x3e3   : > { %vm4357_vm7 = vcmp.lt.s32.totalorder %v4356_v40, 0  ;;  %v3737_v5 = vadd.s32 %v3736_v9, %v3732_v24  ;;  %vm2014_vm13 = vcmp.le.f32.partialorder %v2013_v41, 0.7853982  ;;  %v3733_v54 = vadd.s32 %v7518_v15, %v7522_v31 }
 0x3e4   : > { %v2084_v1 = vsel %vm4357_vm7, 0, %v4356_v40  ;;  %v4885_v53 = vpop.eup %4884  ;;  %v2100_v60 = vsel %vm2015_vm14, %v2099_v57, %v7484_v44  ;;  %vm2105_vm4 = vweird.f32 %v7240_v23  ;;  %vm3679_vm5 = vcmp.lt.s32.totalorder %v7391_v30, 0 }
 0x3e5   : > { %v2085_v7 = vsub.s32 32, %v2084_v1  ;;  %v2089_v51 = vsub.s32 4294967266, %v2084_v1  ;;  %v4887_v28 = vpop.eup %4886  ;;  %v3881_v37 = vxor.u32 2147483648, %v4885_v53  ;;  %v2086_v34 = vshll.u32 %v2077_v18, %v2084_v1 }
 0x3e6   : > { %v3878_v46 = vxor.u32 2147483648, %v4887_v28  ;;  %v3738_v17 = vadd.s32 536870912, %v3737_v5  ;;  %v2102_v43 = vsel %vm2014_vm13, 0, %v2100_v60  ;;  %vm3678_vm6 = vcmp.le.f32.partialorder %v3677_v2, 0.7853982 }
 0x3e7   : > { %v2087_v47 = vshrl.u32 %v2069_v4, %v2085_v7  ;;  %v2090_v32 = vadd.s32 127, %v2089_v51  ;;  %v3882_v50 = vsel %vm3880_vm9, %v3881_v37, %v4887_v28  ;;  %v2106_v63 = vadd.s32 3, %v2102_v43 }
 0x3e8   : > { %v3879_v12 = vsel %vm3877_vm11, %v4885_v53, %v3878_v46  ;;  %v3739_v29 = vshrl.u32 %v3738_v17, 30  ;;  %vm3769_vm11 = vweird.f32 %v7391_v30 }
 0x3e9   : > { %v2088_v45 = vor.u32 %v2087_v47, %v2086_v34  ;;  %v2091_v52 = vshll.u32 %v2090_v32, 23  ;;  %v3883_v55 = vsel %vm3876_vm12, %v3879_v12, %v3882_v50  ;;  %v2107_v49 = vand.u32 3, %v2106_v63 }
 0x3ea   : > { %v3884_v14 = vsel %vm3873_vm10, nan, %v3883_v55  ;;  %v3740_v27 = vshll.u32 %v3739_v29, 30  ;;  %v3763_v53 = vsub.s32 4, %v3739_v29 }
 0x3eb   : > { %v2092_v59 = vor.u32 4788187, %v2091_v52  ;;  %3917 = vst.msk [vmem:[%s5437_s12 + $0xf8] sm:$0xff] %vm3885_vm0, %v3884_v14  ;;  %v2095_v35 = vcvt.s32.f32 %v2088_v45  ;;  %vm2112_vm1 = vcmp.eq.s32.totalorder %v2107_v49, 2  ;;  %vm2109_vm2 = vcmp.eq.s32.totalorder %v2107_v49, 0 }
 0x3ec   : > { %v3741_v42 = vsub.s32 %v3737_v5, %v3740_v27  ;;  %vm2108_vm3 = vcmp.lt.s32.totalorder %v2107_v49, 2  ;;  %v3764_v51 = vsel %vm3679_vm5, %v3763_v53, %v3739_v29 }
 0x3ed   : > { %v2093_v56 = vand.u32 2147483647, %v2092_v59  ;;  %v3766_v28 = vsel %vm3678_vm6, 0, %v3764_v51 }
 0x3ee   : > { %v3743_v18 = vsub.s32 0, %v3741_v42 }
 0x3ef   : > { %v2096_v16 = vmul.f32 %v2095_v35, %v2093_v56 }
 0x3f0   : > { %v4419_v48 = vmin.u32 %v3743_v18, %v3741_v42 }
 0x3f1   : > { %v2097_v26 = vxor.u32 2147483648, %v2096_v16 }
 0x3f2   : > { %v3745_v13 = vclz %v4419_v48 }
 0x3f3   : > { %v2098_v38 = vsel %vm2015_vm14, %v2097_v26, %v2096_v16 }
 0x3f4   : > { %v2101_v25 = vsel %vm2014_vm13, %v7240_v23, %v2098_v38  ;;  %v4420_v19 = vadd.s32 4294967294, %v3745_v13  ;;  %v3770_v23 = vadd.s32 3, %v3766_v28 }
 0x3f5   : > { %4888 = vcosq.f32 %v2101_v25 }
 0x3f6   : > { %4890 = vsinq.f32 %v2101_v25  ;;  %vm4421_vm15 = vcmp.lt.s32.totalorder %v4420_v19, 0  ;;  %v3771_v37 = vand.u32 3, %v3770_v23 }
 0x3f7   : > { %v3748_v61 = vsel %vm4421_vm15, 0, %v4420_v19 }
 0x3f8   : > { %v3749_v62 = vsub.s32 32, %v3748_v61  ;;  %v3753_v36 = vsub.s32 4294967266, %v3748_v61  ;;  %v3750_v11 = vshll.u32 %v3741_v42, %v3748_v61  ;;  %vm3776_vm7 = vcmp.eq.s32.totalorder %v3771_v37, 2 }
 0x3f9   : > { %vm3773_vm9 = vcmp.eq.s32.totalorder %v3771_v37, 0  ;;  %vm3772_vm8 = vcmp.lt.s32.totalorder %v3771_v37, 2 }
 0x3fa   : > { %v3751_v41 = vshrl.u32 %v3733_v54, %v3749_v62  ;;  %v3754_v8 = vadd.s32 127, %v3753_v36 }
 0x3fc   : > { %v3752_v33 = vor.u32 %v3751_v41, %v3750_v11  ;;  %v3755_v6 = vshll.u32 %v3754_v8, 23 }
 0x3fe   : > { %v3756_v58 = vor.u32 4788187, %v3755_v6  ;;  %v3759_v40 = vcvt.s32.f32 %v3752_v33 }
 0x400   : > { %v3757_v39 = vand.u32 2147483647, %v3756_v58 }
 0x402   : > { %v4889_v20 = vpop.eup %4888  ;;  %v3760_v31 = vmul.f32 %v3759_v40, %v3757_v39 }
 0x403   : > { %v4891_v44 = vpop.eup %4890  ;;  %v2113_v22 = vxor.u32 2147483648, %v4889_v20 }
 0x404   : > { %v2110_v10 = vxor.u32 2147483648, %v4891_v44  ;;  %v3761_v0 = vxor.u32 2147483648, %v3760_v31 }
 0x405   : > { %v2114_v21 = vsel %vm2112_vm1, %v2113_v22, %v4891_v44 }
 0x406   : > { %v2111_v15 = vsel %vm2109_vm2, %v4889_v20, %v2110_v10  ;;  %v3762_v4 = vsel %vm3679_vm5, %v3761_v0, %v3760_v31 }
 0x407   : > { %v2115_v3 = vsel %vm2108_vm3, %v2111_v15, %v2114_v21  ;;  %v3765_v7 = vsel %vm3678_vm6, %v7391_v30, %v3762_v4 }
 0x408   : > { %v2116_v1 = vsel %vm2105_vm4, nan, %v2115_v3  ;;  %4892 = vcosq.f32 %v3765_v7 }
 0x409   : > { %3900 = vst.msk [vmem:[%s5437_s12 + $0x70] sm:$0xff] %vm3885_vm0, %v2116_v1  ;;  %4894 = vsinq.f32 %v3765_v7 }
 0x415   : > { %v4893_v34 = vpop.eup %4892 }
 0x416   : > { %v4895_v24 = vpop.eup %4894  ;;  %v3777_v46 = vxor.u32 2147483648, %v4893_v34 }
 0x417   : > { %v3774_v47 = vxor.u32 2147483648, %v4895_v24 }
 0x418   : > { %v3778_v32 = vsel %vm3776_vm7, %v3777_v46, %v4895_v24  ;;  %3924 = sbr.rel (!%p5040_p4) target bundleno = 1101 (0x44d), region = 36 }
 0x419   : > { %v3775_v9 = vsel %vm3773_vm9, %v4893_v34, %v3774_v47 }
 0x41a   : > { %v3779_v2 = vsel %vm3772_vm8, %v3775_v9, %v3778_v32 }
 0x41b   : > { %v3780_v50 = vsel %vm3769_vm11, nan, %v3779_v2 }
 0x41c   : > { %3916 = vst.msk [vmem:[%s5437_s12 + $0xf0] sm:$0xff] %vm3885_vm0, %v3780_v50 }
 0x41d   : > { %s7764_s29 = smov (!%p3927_p8, %s3926_s29), 32 }
 0x41e   : > { %s4428_s7 = sshll.u32 %s7764_s29, 7 }
 0x41f   : > { %p4431_p9 = scmp.eq.s32.totalorder %s4428_s7, 0 }
 0x420   : > { %s7564_s8 = sshrl.u32 (!%p4431_p9), %s7764_s29, 5 }
 0x421   : > { %3935 = sbr.rel (%p4431_p9) target bundleno = 1101 (0x44d), region = 40  ;;  %p4432_p10 = scmp.le.s32.totalorder (!%p4431_p9), %s7564_s8, 0 }
 0x426   : > { %4214 = sbr.rel (%p4432_p10) target bundleno = 1084 (0x43c), region = 116  ;;  %s7755_s15 = smov (!%p4432_p10), %s7558_s6 }
 0x427   : > { %s7756_s20 = smov (!%p4432_p10), %s5437_s12  ;;  %s7573_s25 = smov (!%p4432_p10), 0  }
 0x428   : > { %s7575_s9 = smov (!%p4432_p10), 0  }
 0x42b LB: >> { %v4060_v30 = vld [vmem:[%s4963_s20] sm:$0xff]  ;;  %v4062_v5 = vld [vmem:[%s4963_s20 + $0x8] sm:$0xff]  ;;  %v4064_v12 = vld [vmem:[%s4963_s20 + $0x10] sm:$0xff]  ;;  %s4124_s10 = sadd.s32 1, %s4967_s25  ;;  %s4054_s9 = sadd.s32 1, %s4971_s9   ;;  %s4971_s9 = sphi %s7575_s9, %s4054_s9   ;;  %s4967_s25 = sphi %s7573_s25, %s7759_s25   ;;  %s4963_s20 = sphi %s7756_s20, %s7758_s20   ;;  %s4959_s15 = sphi %s7755_s15, %s7757_s15  }
 0x42c   : >> { %4061 = vst [vmem:[%s4959_s15] sm:$0xff] %v4060_v30  ;;  %4063 = vst [vmem:[%s4959_s15 + $0x8] sm:$0xff] %v4062_v5  ;;  %v4066_v45 = vld [vmem:[%s4963_s20 + $0x18] sm:$0xff]  ;;  %v4068_v52 = vld [vmem:[%s4963_s20 + $0x20] sm:$0xff]  ;;  %p4125_p11 = scmp.ge.s32.totalorder %s4124_s10, %s7564_s8  ;;  %p4053_p12 = scmp.ge.s32.totalorder %s4054_s9, %s7564_s8 }
 0x42d   : >> { %4065 = vst [vmem:[%s4959_s15 + $0x10] sm:$0xff] %v4064_v12  ;;  %v4070_v55 = vld [vmem:[%s4963_s20 + $0x28] sm:$0xff]  ;;  %4067 = vst [vmem:[%s4959_s15 + $0x18] sm:$0xff] %v4066_v45  ;;  %v4072_v17 = vld [vmem:[%s4963_s20 + $0x30] sm:$0xff] }
 0x42e   : >> { %4069 = vst [vmem:[%s4959_s15 + $0x20] sm:$0xff] %v4068_v52  ;;  %4071 = vst [vmem:[%s4959_s15 + $0x28] sm:$0xff] %v4070_v55  ;;  %v4074_v14 = vld [vmem:[%s4963_s20 + $0x38] sm:$0xff]  ;;  %v4076_v59 = vld [vmem:[%s4963_s20 + $0x40] sm:$0xff]  ;;  %s7766_s10 = smov (%p4125_p11, %s4124_s10), 0 }
 0x42f   : >> { %4073 = vst [vmem:[%s4959_s15 + $0x30] sm:$0xff] %v4072_v17  ;;  %4075 = vst [vmem:[%s4959_s15 + $0x38] sm:$0xff] %v4074_v14  ;;  %v4078_v29 = vld [vmem:[%s4963_s20 + $0x48] sm:$0xff]  ;;  %v4080_v56 = vld [vmem:[%s4963_s20 + $0x50] sm:$0xff]  ;;  %s4433_s11 = sshll.u32 %s7766_s10, 8  ;;  %s7759_s25 = smov %s7766_s10 }
 0x430   : >> { %4077 = vst [vmem:[%s4959_s15 + $0x40] sm:$0xff] %v4076_v59  ;;  %v4082_v35 = vld [vmem:[%s4963_s20 + $0x58] sm:$0xff]  ;;  %4079 = vst [vmem:[%s4959_s15 + $0x48] sm:$0xff] %v4078_v29  ;;  %v4084_v27 = vld [vmem:[%s4963_s20 + $0x60] sm:$0xff]  ;;  %s7631_s14 = scalar_lea.vmem %s5437_s12, %s4433_s11 [#allocation2]   ;;  %s4130_s17 = scalar_lea.vmem %s7558_s6, %s4433_s11  }
 0x431   : >> { %4081 = vst [vmem:[%s4959_s15 + $0x50] sm:$0xff] %v4080_v56  ;;  %4083 = vst [vmem:[%s4959_s15 + $0x58] sm:$0xff] %v4082_v35  ;;  %v4086_v16 = vld [vmem:[%s4963_s20 + $0x68] sm:$0xff]  ;;  %v4088_v42 = vld [vmem:[%s4963_s20 + $0x70] sm:$0xff] }
 0x432   : >> { %4085 = vst [vmem:[%s4959_s15 + $0x60] sm:$0xff] %v4084_v27  ;;  %4087 = vst [vmem:[%s4959_s15 + $0x68] sm:$0xff] %v4086_v16  ;;  %v4090_v26 = vld [vmem:[%s4963_s20 + $0x78] sm:$0xff]  ;;  %v4092_v57 = vld [vmem:[%s4963_s20 + $0x80] sm:$0xff] }
 0x433   : >> { %4089 = vst [vmem:[%s4959_s15 + $0x70] sm:$0xff] %v4088_v42  ;;  %v4094_v18 = vld [vmem:[%s4963_s20 + $0x88] sm:$0xff]  ;;  %4091 = vst [vmem:[%s4959_s15 + $0x78] sm:$0xff] %v4090_v26  ;;  %v4096_v38 = vld [vmem:[%s4963_s20 + $0x90] sm:$0xff] }
 0x434   : >> { %4093 = vst [vmem:[%s4959_s15 + $0x80] sm:$0xff] %v4092_v57  ;;  %4095 = vst [vmem:[%s4959_s15 + $0x88] sm:$0xff] %v4094_v18  ;;  %v4098_v25 = vld [vmem:[%s4963_s20 + $0x98] sm:$0xff]  ;;  %v4100_v48 = vld [vmem:[%s4963_s20 + $0xa0] sm:$0xff] }
 0x435   : >> { %4097 = vst [vmem:[%s4959_s15 + $0x90] sm:$0xff] %v4096_v38  ;;  %4099 = vst [vmem:[%s4959_s15 + $0x98] sm:$0xff] %v4098_v25  ;;  %v4102_v60 = vld [vmem:[%s4963_s20 + $0xa8] sm:$0xff]  ;;  %v4104_v13 = vld [vmem:[%s4963_s20 + $0xb0] sm:$0xff] }
 0x436   : >> { %4101 = vst [vmem:[%s4959_s15 + $0xa0] sm:$0xff] %v4100_v48  ;;  %v4106_v19 = vld [vmem:[%s4963_s20 + $0xb8] sm:$0xff]  ;;  %4103 = vst [vmem:[%s4959_s15 + $0xa8] sm:$0xff] %v4102_v60  ;;  %v4108_v43 = vld [vmem:[%s4963_s20 + $0xc0] sm:$0xff] }
 0x437   : >> { %4105 = vst [vmem:[%s4959_s15 + $0xb0] sm:$0xff] %v4104_v13  ;;  %4107 = vst [vmem:[%s4959_s15 + $0xb8] sm:$0xff] %v4106_v19  ;;  %v4110_v61 = vld [vmem:[%s4963_s20 + $0xc8] sm:$0xff]  ;;  %v4112_v63 = vld [vmem:[%s4963_s20 + $0xd0] sm:$0xff]  ;;  %4056 = sbr.rel (!%p4053_p12) target bundleno = 1067 (0x42b), region = 122 }
 0x438   : >> { %4109 = vst [vmem:[%s4959_s15 + $0xc0] sm:$0xff] %v4108_v43  ;;  %4111 = vst [vmem:[%s4959_s15 + $0xc8] sm:$0xff] %v4110_v61  ;;  %v4114_v54 = vld [vmem:[%s4963_s20 + $0xd8] sm:$0xff]  ;;  %v4116_v62 = vld [vmem:[%s4963_s20 + $0xe0] sm:$0xff] }
 0x439   : >> { %4113 = vst [vmem:[%s4959_s15 + $0xd0] sm:$0xff] %v4112_v63  ;;  %v4118_v36 = vld [vmem:[%s4963_s20 + $0xe8] sm:$0xff]  ;;  %4115 = vst [vmem:[%s4959_s15 + $0xd8] sm:$0xff] %v4114_v54  ;;  %v4120_v11 = vld [vmem:[%s4963_s20 + $0xf0] sm:$0xff] }
 0x43a   : >> { %4117 = vst [vmem:[%s4959_s15 + $0xe0] sm:$0xff] %v4116_v62  ;;  %4119 = vst [vmem:[%s4959_s15 + $0xe8] sm:$0xff] %v4118_v36  ;;  %v4122_v41 = vld [vmem:[%s4963_s20 + $0xf8] sm:$0xff]  ;;  %s7758_s20 = smov %s7631_s14 }
 0x43b   : >> { %4121 = vst [vmem:[%s4959_s15 + $0xf0] sm:$0xff] %v4120_v11  ;;  %4123 = vst [vmem:[%s4959_s15 + $0xf8] sm:$0xff] %v4122_v41  ;;  %s7757_s15 = smov %s4130_s17 }
 0x43c PF: > { %s7672_s18 = sand.u32 31, %s7764_s29   ;;  %s4444_s21 = sshll.u32 %s7564_s8, 8 }
 0x43d   : > { %s4135_s22 = scalar_lea.vmem %s5437_s12, %s4444_s21 [#allocation2]   ;;  %s4137_s23 = scalar_lea.vmem %s7558_s6, %s4444_s21  }
 0x43e   : > { %p4438_p13 = scmp.le.s32.totalorder %s7672_s18, 0 }
 0x43f   : > { %s4973_s24 = smov (!%p4438_p13), %s4137_s23   ;;  %s4977_s26 = smov (!%p4438_p13), %s4135_s22  }
 0x440   : > { %4228 = sbr.rel (%p4438_p13) target bundleno = 1101 (0x44d), region = 127  ;;  %s4981_s27 = smov (!%p4438_p13), 0  }
 0x441   : > { %s4985_s28 = smov (!%p4438_p13), 0  }
 0x445 LB: >> { %v4147_v8 = vld [vmem:[%s4979_s26] sm:$0xff]  ;;  %s4149_s29 = sadd.s32 1, %s4983_s27  ;;  %s4141_s28 = sadd.s32 1, %s4987_s28   ;;  %s4987_s28 = sphi %s4985_s28, %s4141_s28   ;;  %s4983_s27 = sphi %s4981_s27, %s4982_s27   ;;  %s4979_s26 = sphi %s4977_s26, %s4154_s26   ;;  %s4975_s24 = sphi %s4973_s24, %s4155_s24  }
 0x446   : >> { %4148 = vst [vmem:[%s4975_s24] sm:$0xff] %v4147_v8  ;;  %p4150_p0 = scmp.ge.s32.totalorder %s4149_s29, %s7672_s18  ;;  %p4140_p1 = scmp.ge.s32.totalorder %s4141_s28, %s7672_s18 }
 0x448   : >> { %s7768_s29 = smov (%p4150_p0, %s4149_s29), 0  ;;  %4143 = sbr.rel (!%p4140_p1) target bundleno = 1093 (0x445), region = 133 }
 0x449   : >> { %s4439_s12 = sshll.u32 %s7768_s29, 3  ;;  %s4982_s27 = smov %s7768_s29  }
 0x44a   : >> { %s4154_s26 = scalar_lea.vmem %s4135_s22, %s4439_s12 [#allocation2]   ;;  %s4155_s24 = scalar_lea.vmem %s4137_s23, %s4439_s12  }
 0x44d PF: > { %p10_p2 = scmp.ge.s32.totalorder %s5030_s16, 6   ;;  %s7760_s12 = smov %s4951_s13 }
 0x44e   : > { %s7761_s13 = smov %s5038_s19  ;;  %s7762_s14 = smov %s5030_s16 }
 0x44f   :  { %12 = sbr.rel (!%p10_p2) target bundleno = 2 (0x2), region = 144 }

</bundles_post_ra>
